<compile_context>
chip_gen: v6e
topology: v6e:2x2x1
jax: 0.10.0
libtpu: 0.0.40
codegen_flags: <defaults>
</compile_context>

<pallas_src>
import functools

import jax
import jax.numpy as jnp
from jax import lax
from jax.experimental import pallas as pl
from jax.experimental.pallas import tpu as pltpu

LANE = 128
BN_EPS = 1e-5


def _round_up(n, m=LANE):
    return ((n + m - 1) // m) * m


# ------------------------------ fused kernel --------------------------------


def _bottleneck_kernel(x_ref, mask_ref, w1_ref, b1_ref, w2_ref, b2_ref,
                       w3_ref, b3_ref, o_ref, y1_ref, *, H, W, dil):
    """One batch item: conv1+conv2+conv3 with BN folded, residual + ReLU."""
    pad = dil
    Wp = W + 2 * pad
    HWp = H * Wp
    base = pad + pad * Wp          # flat offset of y1pad[pad, 0] (+pad guard)

    x = x_ref[...]                                     # (HWp, Cin_p) f32

    # ---- conv1 (1x1) + bn1 + relu; zero conv2's column-padding positions ----
    y1 = jnp.dot(x.astype(jnp.bfloat16), w1_ref[...],
                 preferred_element_type=jnp.float32)
    y1 = jnp.maximum(y1 + b1_ref[...], 0.0) * mask_ref[...]

    # Padded flat plane providing conv2's implicit zero padding (rows+guards).
    y1_ref[...] = jnp.zeros_like(y1_ref)
    y1_ref[pl.ds(base, HWp), :] = y1

    # ---- conv2 (3x3, dilation) + bn2 + relu: 9 shifted accumulating dots ----
    acc = jnp.zeros_like(y1)
    for kh in range(3):
        for kw in range(3):
            off = dil * (kh * Wp + kw)                 # static Python int
            tap = y1_ref[pl.ds(off, HWp), :].astype(jnp.bfloat16)
            acc = acc + jnp.dot(tap, w2_ref[kh * 3 + kw],
                                preferred_element_type=jnp.float32)
    y2 = jnp.maximum(acc + b2_ref[...], 0.0)

    # ---- conv3 (1x1) + bn3 + residual (kept f32) + final relu ----
    y3 = jnp.dot(y2.astype(jnp.bfloat16), w3_ref[...],
                 preferred_element_type=jnp.float32)
    y3 = y3 + b3_ref[...] + x
    o_ref[...] = jnp.maximum(y3, 0.0).astype(o_ref.dtype)


# --------------------------- wrapper-side glue -------------------------------


def _fold_bn(w, b, bn, eps=BN_EPS):
    gamma, beta, mean, var = bn
    scale = gamma / jnp.sqrt(var + eps)
    return w * scale[:, None, None, None], (b - mean) * scale + beta


def bottleneck_forward(x_nchw, params, *, stride=1, dilation=1):
    """Bottleneck forward (downsample=None), BN in inference mode."""
    n, c_in, h, w = x_nchw.shape
    w1, b1 = _fold_bn(params["w1"], params["b1"], params["bn1"])
    w2, b2 = _fold_bn(params["w2"], params["b2"], params["bn2"])
    w3, b3 = _fold_bn(params["w3"], params["b3"], params["bn3"])
    planes = w1.shape[0]
    c_out = w3.shape[0]
    assert stride == 1 and c_out == c_in, (
        "downsample=None requires stride==1 and inplanes == planes*4")

    pad = dilation
    wp = w + 2 * pad
    hwp = h * wp
    cp_in, cp_mid, cp_out = _round_up(c_in), _round_up(planes), _round_up(c_out)

    # NCHW -> NHWC once at entry; pad channels to 128 lanes and width by `pad`
    # (the width pad doubles as conv2's column zero-padding in the kernel).
    x_nhwc = jnp.transpose(x_nchw, (0, 2, 3, 1))
    x_ext = jnp.pad(x_nhwc, ((0, 0), (0, 0), (pad, pad), (0, cp_in - c_in)))
    x_flat = x_ext.reshape(n, hwp, cp_in)

    # Column-validity mask on the width-extended grid (zeros y1's pad columns).
    col = jnp.arange(hwp, dtype=jnp.int32) % wp
    col_mask = ((col >= pad) & (col < pad + w)).astype(jnp.float32)
    col_mask = col_mask.reshape(hwp, 1)

    # BN-folded, lane-padded, bf16 weights (f32 biases); pad entries are zero.
    w1m = jnp.pad(w1.reshape(planes, c_in).T,
                  ((0, cp_in - c_in), (0, cp_mid - planes))).astype(jnp.bfloat16)
    b1p = jnp.pad(b1, (0, cp_mid - planes)).reshape(1, cp_mid)
    w2t = jnp.transpose(w2, (2, 3, 1, 0))               # (kh, kw, cin, cout)
    w2m = jnp.pad(w2t, ((0, 0), (0, 0), (0, cp_mid - planes),
                        (0, cp_mid - planes)))
    w2m = w2m.reshape(9, cp_mid, cp_mid).astype(jnp.bfloat16)
    b2p = jnp.pad(b2, (0, cp_mid - planes)).reshape(1, cp_mid)
    w3m = jnp.pad(w3.reshape(c_out, planes).T,
                  ((0, cp_mid - planes), (0, cp_out - c_out))).astype(jnp.bfloat16)
    b3p = jnp.pad(b3, (0, cp_out - c_out)).reshape(1, cp_out)

    # Scratch covers top/bottom pad rows plus the max tap-read overhang.
    scratch_rows = (h + 2 * pad + 1) * wp

    kernel = functools.partial(_bottleneck_kernel, H=h, W=w, dil=dilation)

    # Real (unpadded) FLOPs; bytes = what is actually DMA'd HBM<->VMEM.
    flops = 2 * n * h * w * (c_in * planes + 9 * planes * planes
                             + planes * c_out)
    bytes_accessed = (4 * n * hwp * (cp_in + cp_out)
                      + 2 * (w1m.size + w2m.size + w3m.size)
                      + 4 * (b1p.size + b2p.size + b3p.size + col_mask.size))

    out_flat = pl.pallas_call(
        kernel,
        out_shape=jax.ShapeDtypeStruct((n, hwp, cp_out), x_nchw.dtype),
        grid_spec=pltpu.PrefetchScalarGridSpec(
            num_scalar_prefetch=0,
            grid=(n,),
            in_specs=[
                pl.BlockSpec((None, hwp, cp_in), lambda b: (b, 0, 0)),
                pl.BlockSpec((hwp, 1), lambda b: (0, 0)),
                pl.BlockSpec((cp_in, cp_mid), lambda b: (0, 0)),
                pl.BlockSpec((1, cp_mid), lambda b: (0, 0)),
                pl.BlockSpec((9, cp_mid, cp_mid), lambda b: (0, 0, 0)),
                pl.BlockSpec((1, cp_mid), lambda b: (0, 0)),
                pl.BlockSpec((cp_mid, cp_out), lambda b: (0, 0)),
                pl.BlockSpec((1, cp_out), lambda b: (0, 0)),
            ],
            out_specs=pl.BlockSpec((None, hwp, cp_out), lambda b: (b, 0, 0)),
            scratch_shapes=[pltpu.VMEM((scratch_rows, cp_mid), jnp.float32)],
        ),
        compiler_params=pltpu.CompilerParams(
            dimension_semantics=("parallel",)),
        cost_estimate=pl.CostEstimate(
            flops=flops, transcendentals=0, bytes_accessed=bytes_accessed),
    )(x_flat, col_mask, w1m, b1p, w2m, b2p, w3m, b3p)

    out = out_flat.reshape(n, h, wp, cp_out)[:, :, pad:pad + w, :c_out]
    return jnp.transpose(out, (0, 3, 1, 2))             # back to NCHW


# ------------------------------- reference -----------------------------------


def _bn_eval(x, bn, eps=BN_EPS):
    gamma, beta, mean, var = bn
    scale = gamma / jnp.sqrt(var + eps)
    return x * scale.reshape(1, -1, 1, 1) + (beta - mean * scale).reshape(1, -1, 1, 1)


def _reference_bottleneck(x, p, stride, dilation):
    def conv(inp, wt, bs, s=1, pad=0, dil=1):
        out = lax.conv_general_dilated(
            inp, wt, (s, s), ((pad, pad), (pad, pad)),
            rhs_dilation=(dil, dil),
            dimension_numbers=("NCHW", "OIHW", "NCHW"))
        return out + bs.reshape(1, -1, 1, 1)

    out = jax.nn.relu(_bn_eval(conv(x, p["w1"], p["b1"]), p["bn1"]))
    out = jax.nn.relu(_bn_eval(
        conv(out, p["w2"], p["b2"], s=stride, pad=dilation, dil=dilation), p["bn2"]))
    out = _bn_eval(conv(out, p["w3"], p["b3"]), p["bn3"])
    return jax.nn.relu(out + x)


# --------------------------------- main ---------------------------------------


if __name__ == "__main__":
    # Bottleneck(inplanes=16, planes=4, stride=1, dilation=1), downsample=None
    N, inplanes, H, W = 2, 16, 16, 16
    planes, stride, dilation = 4, 1, 1
    expansion = 4

    key = jax.random.PRNGKey(0)
    ks = jax.random.split(key, 8)

    def conv_params(k, cout, cin, ksz):
        kw_, kb_ = jax.random.split(k)
        fan_in = cin * ksz * ksz
        wt = jax.random.normal(kw_, (cout, cin, ksz, ksz), jnp.float32) / jnp.sqrt(fan_in)
        bs = jax.random.normal(kb_, (cout,), jnp.float32) * 0.01
        return wt, bs

    def bn_params(k, c):
        k1, k2, k3, k4 = jax.random.split(k, 4)
        gamma = 1.0 + 0.1 * jax.random.normal(k1, (c,), jnp.float32)
        beta = 0.1 * jax.random.normal(k2, (c,), jnp.float32)
        mean = 0.1 * jax.random.normal(k3, (c,), jnp.float32)
        var = 1.0 + 0.1 * jnp.abs(jax.random.normal(k4, (c,), jnp.float32))
        return gamma, beta, mean, var

    w1, b1 = conv_params(ks[0], planes, inplanes, 1)
    w2, b2 = conv_params(ks[1], planes, planes, 3)
    w3, b3 = conv_params(ks[2], planes * expansion, planes, 1)
    params = {
        "w1": w1, "b1": b1, "bn1": bn_params(ks[3], planes),
        "w2": w2, "b2": b2, "bn2": bn_params(ks[4], planes),
        "w3": w3, "b3": b3, "bn3": bn_params(ks[5], planes * expansion),
    }

    x = jax.random.normal(ks[6], (N, inplanes, H, W), dtype=jnp.float32)

    fwd = jax.jit(functools.partial(bottleneck_forward,
                                    stride=stride, dilation=dilation))
    out = jax.block_until_ready(fwd(x, params))

    ref = _reference_bottleneck(x, params, stride, dilation)
    assert out.shape == (N, planes * expansion, H, W), out.shape
    # bf16 MXU inputs (f32 accumulate / epilogue): tolerance relaxed accordingly.
    max_err = float(jnp.max(jnp.abs(out - ref)))
    assert jnp.allclose(out, ref, atol=4e-2, rtol=4e-2), max_err

    print("KERNEL_OK")
</pallas_src>

<mosaic_0001>
module attributes {stable_mosaic.version = 11 : i64} {
  func.func @_bottleneck_kernel(%arg0: i32, %arg1: memref<1x288x128xf32, #tpu.memory_space<vmem>>, %arg2: memref<288x1xf32, #tpu.memory_space<vmem>>, %arg3: memref<128x128xbf16, #tpu.memory_space<vmem>>, %arg4: memref<1x128xf32, #tpu.memory_space<vmem>>, %arg5: memref<9x128x128xbf16, #tpu.memory_space<vmem>>, %arg6: memref<1x128xf32, #tpu.memory_space<vmem>>, %arg7: memref<128x128xbf16, #tpu.memory_space<vmem>>, %arg8: memref<1x128xf32, #tpu.memory_space<vmem>>, %arg9: memref<1x288x128xf32, #tpu.memory_space<vmem>>, %arg10: memref<342x128xf32, #tpu.memory_space<vmem>>) attributes {dimension_semantics = [#tpu.dimension_semantics<parallel>], iteration_bounds = array<i64: 2>, scalar_prefetch = 0 : i64, scratch_operands = 1 : i64, tpu.core_type = #tpu.core_type<tc>, window_params = [{transform_indices = @transform_0, window_bounds = array<i64: 1, 288, 128>}, {pipeline_mode = #tpu.pipeline_mode<synchronous>, transform_indices = @transform_1, window_bounds = array<i64: 288, 1>}, {pipeline_mode = #tpu.pipeline_mode<synchronous>, transform_indices = @transform_2, window_bounds = array<i64: 128, 128>}, {pipeline_mode = #tpu.pipeline_mode<synchronous>, transform_indices = @transform_3, window_bounds = array<i64: 1, 128>}, {pipeline_mode = #tpu.pipeline_mode<synchronous>, transform_indices = @transform_4, window_bounds = array<i64: 9, 128, 128>}, {pipeline_mode = #tpu.pipeline_mode<synchronous>, transform_indices = @transform_5, window_bounds = array<i64: 1, 128>}, {pipeline_mode = #tpu.pipeline_mode<synchronous>, transform_indices = @transform_6, window_bounds = array<i64: 128, 128>}, {pipeline_mode = #tpu.pipeline_mode<synchronous>, transform_indices = @transform_7, window_bounds = array<i64: 1, 128>}, {transform_indices = @transform_8, window_bounds = array<i64: 1, 288, 128>}]} {
    %c0 = arith.constant 0 : index
    %c0_0 = arith.constant 0 : index
    %c0_1 = arith.constant 0 : index
    %0 = vector.load %arg1[%c0, %c0_0, %c0_1] : memref<1x288x128xf32, #tpu.memory_space<vmem>>, vector<1x288x128xf32>
    %1 = vector.shape_cast %0 : vector<1x288x128xf32> to vector<288x128xf32>
    %2 = arith.truncf %1 : vector<288x128xf32> to vector<288x128xbf16>
    %c0_2 = arith.constant 0 : index
    %c0_3 = arith.constant 0 : index
    %3 = vector.load %arg3[%c0_2, %c0_3] : memref<128x128xbf16, #tpu.memory_space<vmem>>, vector<128x128xbf16>
    %cst = arith.constant dense<0.000000e+00> : vector<288x128xf32>
    %4 = tpu.matmul %2, %3, %cst {dimension_numbers = #tpu.dot_dimension_numbers<[1], [0], [0], [1], [0, 0, 1, 1], [], []>} : vector<288x128xbf16>, vector<128x128xbf16>, vector<288x128xf32> -> vector<288x128xf32>
    %c0_4 = arith.constant 0 : index
    %c0_5 = arith.constant 0 : index
    %5 = vector.load %arg4[%c0_4, %c0_5] : memref<1x128xf32, #tpu.memory_space<vmem>>, vector<1x128xf32>
    %6 = vector.broadcast %5 : vector<1x128xf32> to vector<288x128xf32>
    %7 = arith.addf %4, %6 : vector<288x128xf32>
    %cst_6 = arith.constant 0.000000e+00 : f32
    %8 = vector.broadcast %cst_6 : f32 to vector<288x128xf32>
    %9 = arith.maximumf %7, %8 : vector<288x128xf32>
    %c0_7 = arith.constant 0 : index
    %c0_8 = arith.constant 0 : index
    %10 = vector.load %arg2[%c0_7, %c0_8] : memref<288x1xf32, #tpu.memory_space<vmem>>, vector<288x1xf32>
    %11 = vector.broadcast %10 : vector<288x1xf32> to vector<288x128xf32>
    %12 = arith.mulf %9, %11 : vector<288x128xf32>
    %cst_9 = arith.constant 0.000000e+00 : f32
    %13 = vector.broadcast %cst_9 : f32 to vector<342x128xf32>
    %c0_10 = arith.constant 0 : index
    %c0_11 = arith.constant 0 : index
    %14 = vector.load %arg10[%c0_10, %c0_11] : memref<342x128xf32, #tpu.memory_space<vmem>>, vector<342x128xf32>
    tpu.vector_store %arg10[%c0_10, %c0_11], %13 {strides = array<i32>} : memref<342x128xf32, #tpu.memory_space<vmem>>, vector<342x128xf32>,
    %c19 = arith.constant 19 : index
    %c0_12 = arith.constant 0 : index
    %15 = vector.load %arg10[%c19, %c0_12] : memref<342x128xf32, #tpu.memory_space<vmem>>, vector<288x128xf32>
    tpu.vector_store %arg10[%c19, %c0_12], %12 {strides = array<i32>} : memref<342x128xf32, #tpu.memory_space<vmem>>, vector<288x128xf32>,
    %cst_13 = arith.constant 0.000000e+00 : f32
    %16 = vector.broadcast %cst_13 : f32 to vector<288x128xf32>
    %c0_14 = arith.constant 0 : index
    %c0_15 = arith.constant 0 : index
    %17 = vector.load %arg10[%c0_14, %c0_15] : memref<342x128xf32, #tpu.memory_space<vmem>>, vector<288x128xf32>
    %18 = arith.truncf %17 : vector<288x128xf32> to vector<288x128xbf16>
    %c0_16 = arith.constant 0 : index
    %c0_17 = arith.constant 0 : index
    %c0_18 = arith.constant 0 : index
    %19 = vector.load %arg5[%c0_16, %c0_17, %c0_18] : memref<9x128x128xbf16, #tpu.memory_space<vmem>>, vector<1x128x128xbf16>
    %20 = vector.shape_cast %19 : vector<1x128x128xbf16> to vector<128x128xbf16>
    %cst_19 = arith.constant dense<0.000000e+00> : vector<288x128xf32>
    %21 = tpu.matmul %18, %20, %cst_19 {dimension_numbers = #tpu.dot_dimension_numbers<[1], [0], [0], [1], [0, 0, 1, 1], [], []>} : vector<288x128xbf16>, vector<128x128xbf16>, vector<288x128xf32> -> vector<288x128xf32>
    %22 = arith.addf %16, %21 : vector<288x128xf32>
    %c1 = arith.constant 1 : index
    %c0_20 = arith.constant 0 : index
    %23 = vector.load %arg10[%c1, %c0_20] : memref<342x128xf32, #tpu.memory_space<vmem>>, vector<288x128xf32>
    %24 = arith.truncf %23 : vector<288x128xf32> to vector<288x128xbf16>
    %c1_21 = arith.constant 1 : index
    %c0_22 = arith.constant 0 : index
    %c0_23 = arith.constant 0 : index
    %25 = vector.load %arg5[%c1_21, %c0_22, %c0_23] : memref<9x128x128xbf16, #tpu.memory_space<vmem>>, vector<1x128x128xbf16>
    %26 = vector.shape_cast %25 : vector<1x128x128xbf16> to vector<128x128xbf16>
    %cst_24 = arith.constant dense<0.000000e+00> : vector<288x128xf32>
    %27 = tpu.matmul %24, %26, %cst_24 {dimension_numbers = #tpu.dot_dimension_numbers<[1], [0], [0], [1], [0, 0, 1, 1], [], []>} : vector<288x128xbf16>, vector<128x128xbf16>, vector<288x128xf32> -> vector<288x128xf32>
    %28 = arith.addf %22, %27 : vector<288x128xf32>
    %c2 = arith.constant 2 : index
    %c0_25 = arith.constant 0 : index
    %29 = vector.load %arg10[%c2, %c0_25] : memref<342x128xf32, #tpu.memory_space<vmem>>, vector<288x128xf32>
    %30 = arith.truncf %29 : vector<288x128xf32> to vector<288x128xbf16>
    %c2_26 = arith.constant 2 : index
    %c0_27 = arith.constant 0 : index
    %c0_28 = arith.constant 0 : index
    %31 = vector.load %arg5[%c2_26, %c0_27, %c0_28] : memref<9x128x128xbf16, #tpu.memory_space<vmem>>, vector<1x128x128xbf16>
    %32 = vector.shape_cast %31 : vector<1x128x128xbf16> to vector<128x128xbf16>
    %cst_29 = arith.constant dense<0.000000e+00> : vector<288x128xf32>
    %33 = tpu.matmul %30, %32, %cst_29 {dimension_numbers = #tpu.dot_dimension_numbers<[1], [0], [0], [1], [0, 0, 1, 1], [], []>} : vector<288x128xbf16>, vector<128x128xbf16>, vector<288x128xf32> -> vector<288x128xf32>
    %34 = arith.addf %28, %33 : vector<288x128xf32>
    %c18 = arith.constant 18 : index
    %c0_30 = arith.constant 0 : index
    %35 = vector.load %arg10[%c18, %c0_30] : memref<342x128xf32, #tpu.memory_space<vmem>>, vector<288x128xf32>
    %36 = arith.truncf %35 : vector<288x128xf32> to vector<288x128xbf16>
    %c3 = arith.constant 3 : index
    %c0_31 = arith.constant 0 : index
    %c0_32 = arith.constant 0 : index
    %37 = vector.load %arg5[%c3, %c0_31, %c0_32] : memref<9x128x128xbf16, #tpu.memory_space<vmem>>, vector<1x128x128xbf16>
    %38 = vector.shape_cast %37 : vector<1x128x128xbf16> to vector<128x128xbf16>
    %cst_33 = arith.constant dense<0.000000e+00> : vector<288x128xf32>
    %39 = tpu.matmul %36, %38, %cst_33 {dimension_numbers = #tpu.dot_dimension_numbers<[1], [0], [0], [1], [0, 0, 1, 1], [], []>} : vector<288x128xbf16>, vector<128x128xbf16>, vector<288x128xf32> -> vector<288x128xf32>
    %40 = arith.addf %34, %39 : vector<288x128xf32>
    %c19_34 = arith.constant 19 : index
    %c0_35 = arith.constant 0 : index
    %41 = vector.load %arg10[%c19_34, %c0_35] : memref<342x128xf32, #tpu.memory_space<vmem>>, vector<288x128xf32>
    %42 = arith.truncf %41 : vector<288x128xf32> to vector<288x128xbf16>
    %c4 = arith.constant 4 : index
    %c0_36 = arith.constant 0 : index
    %c0_37 = arith.constant 0 : index
    %43 = vector.load %arg5[%c4, %c0_36, %c0_37] : memref<9x128x128xbf16, #tpu.memory_space<vmem>>, vector<1x128x128xbf16>
    %44 = vector.shape_cast %43 : vector<1x128x128xbf16> to vector<128x128xbf16>
    %cst_38 = arith.constant dense<0.000000e+00> : vector<288x128xf32>
    %45 = tpu.matmul %42, %44, %cst_38 {dimension_numbers = #tpu.dot_dimension_numbers<[1], [0], [0], [1], [0, 0, 1, 1], [], []>} : vector<288x128xbf16>, vector<128x128xbf16>, vector<288x128xf32> -> vector<288x128xf32>
    %46 = arith.addf %40, %45 : vector<288x128xf32>
    %c20 = arith.constant 20 : index
    %c0_39 = arith.constant 0 : index
    %47 = vector.load %arg10[%c20, %c0_39] : memref<342x128xf32, #tpu.memory_space<vmem>>, vector<288x128xf32>
    %48 = arith.truncf %47 : vector<288x128xf32> to vector<288x128xbf16>
    %c5 = arith.constant 5 : index
    %c0_40 = arith.constant 0 : index
    %c0_41 = arith.constant 0 : index
    %49 = vector.load %arg5[%c5, %c0_40, %c0_41] : memref<9x128x128xbf16, #tpu.memory_space<vmem>>, vector<1x128x128xbf16>
    %50 = vector.shape_cast %49 : vector<1x128x128xbf16> to vector<128x128xbf16>
    %cst_42 = arith.constant dense<0.000000e+00> : vector<288x128xf32>
    %51 = tpu.matmul %48, %50, %cst_42 {dimension_numbers = #tpu.dot_dimension_numbers<[1], [0], [0], [1], [0, 0, 1, 1], [], []>} : vector<288x128xbf16>, vector<128x128xbf16>, vector<288x128xf32> -> vector<288x128xf32>
    %52 = arith.addf %46, %51 : vector<288x128xf32>
    %c36 = arith.constant 36 : index
    %c0_43 = arith.constant 0 : index
    %53 = vector.load %arg10[%c36, %c0_43] : memref<342x128xf32, #tpu.memory_space<vmem>>, vector<288x128xf32>
    %54 = arith.truncf %53 : vector<288x128xf32> to vector<288x128xbf16>
    %c6 = arith.constant 6 : index
    %c0_44 = arith.constant 0 : index
    %c0_45 = arith.constant 0 : index
    %55 = vector.load %arg5[%c6, %c0_44, %c0_45] : memref<9x128x128xbf16, #tpu.memory_space<vmem>>, vector<1x128x128xbf16>
    %56 = vector.shape_cast %55 : vector<1x128x128xbf16> to vector<128x128xbf16>
    %cst_46 = arith.constant dense<0.000000e+00> : vector<288x128xf32>
    %57 = tpu.matmul %54, %56, %cst_46 {dimension_numbers = #tpu.dot_dimension_numbers<[1], [0], [0], [1], [0, 0, 1, 1], [], []>} : vector<288x128xbf16>, vector<128x128xbf16>, vector<288x128xf32> -> vector<288x128xf32>
    %58 = arith.addf %52, %57 : vector<288x128xf32>
    %c37 = arith.constant 37 : index
    %c0_47 = arith.constant 0 : index
    %59 = vector.load %arg10[%c37, %c0_47] : memref<342x128xf32, #tpu.memory_space<vmem>>, vector<288x128xf32>
    %60 = arith.truncf %59 : vector<288x128xf32> to vector<288x128xbf16>
    %c7 = arith.constant 7 : index
    %c0_48 = arith.constant 0 : index
    %c0_49 = arith.constant 0 : index
    %61 = vector.load %arg5[%c7, %c0_48, %c0_49] : memref<9x128x128xbf16, #tpu.memory_space<vmem>>, vector<1x128x128xbf16>
    %62 = vector.shape_cast %61 : vector<1x128x128xbf16> to vector<128x128xbf16>
    %cst_50 = arith.constant dense<0.000000e+00> : vector<288x128xf32>
    %63 = tpu.matmul %60, %62, %cst_50 {dimension_numbers = #tpu.dot_dimension_numbers<[1], [0], [0], [1], [0, 0, 1, 1], [], []>} : vector<288x128xbf16>, vector<128x128xbf16>, vector<288x128xf32> -> vector<288x128xf32>
    %64 = arith.addf %58, %63 : vector<288x128xf32>
    %c38 = arith.constant 38 : index
    %c0_51 = arith.constant 0 : index
    %65 = vector.load %arg10[%c38, %c0_51] : memref<342x128xf32, #tpu.memory_space<vmem>>, vector<288x128xf32>
    %66 = arith.truncf %65 : vector<288x128xf32> to vector<288x128xbf16>
    %c8 = arith.constant 8 : index
    %c0_52 = arith.constant 0 : index
    %c0_53 = arith.constant 0 : index
    %67 = vector.load %arg5[%c8, %c0_52, %c0_53] : memref<9x128x128xbf16, #tpu.memory_space<vmem>>, vector<1x128x128xbf16>
    %68 = vector.shape_cast %67 : vector<1x128x128xbf16> to vector<128x128xbf16>
    %cst_54 = arith.constant dense<0.000000e+00> : vector<288x128xf32>
    %69 = tpu.matmul %66, %68, %cst_54 {dimension_numbers = #tpu.dot_dimension_numbers<[1], [0], [0], [1], [0, 0, 1, 1], [], []>} : vector<288x128xbf16>, vector<128x128xbf16>, vector<288x128xf32> -> vector<288x128xf32>
    %70 = arith.addf %64, %69 : vector<288x128xf32>
    %c0_55 = arith.constant 0 : index
    %c0_56 = arith.constant 0 : index
    %71 = vector.load %arg6[%c0_55, %c0_56] : memref<1x128xf32, #tpu.memory_space<vmem>>, vector<1x128xf32>
    %72 = vector.broadcast %71 : vector<1x128xf32> to vector<288x128xf32>
    %73 = arith.addf %70, %72 : vector<288x128xf32>
    %cst_57 = arith.constant 0.000000e+00 : f32
    %74 = vector.broadcast %cst_57 : f32 to vector<288x128xf32>
    %75 = arith.maximumf %73, %74 : vector<288x128xf32>
    %76 = arith.truncf %75 : vector<288x128xf32> to vector<288x128xbf16>
    %c0_58 = arith.constant 0 : index
    %c0_59 = arith.constant 0 : index
    %77 = vector.load %arg7[%c0_58, %c0_59] : memref<128x128xbf16, #tpu.memory_space<vmem>>, vector<128x128xbf16>
    %cst_60 = arith.constant dense<0.000000e+00> : vector<288x128xf32>
    %78 = tpu.matmul %76, %77, %cst_60 {dimension_numbers = #tpu.dot_dimension_numbers<[1], [0], [0], [1], [0, 0, 1, 1], [], []>} : vector<288x128xbf16>, vector<128x128xbf16>, vector<288x128xf32> -> vector<288x128xf32>
    %c0_61 = arith.constant 0 : index
    %c0_62 = arith.constant 0 : index
    %79 = vector.load %arg8[%c0_61, %c0_62] : memref<1x128xf32, #tpu.memory_space<vmem>>, vector<1x128xf32>
    %80 = vector.broadcast %79 : vector<1x128xf32> to vector<288x128xf32>
    %81 = arith.addf %78, %80 : vector<288x128xf32>
    %82 = arith.addf %81, %1 : vector<288x128xf32>
    %cst_63 = arith.constant 0.000000e+00 : f32
    %83 = vector.broadcast %cst_63 : f32 to vector<288x128xf32>
    %84 = arith.maximumf %82, %83 : vector<288x128xf32>
    %c0_64 = arith.constant 0 : index
    %c0_65 = arith.constant 0 : index
    %c0_66 = arith.constant 0 : index
    %85 = vector.load %arg9[%c0_64, %c0_65, %c0_66] : memref<1x288x128xf32, #tpu.memory_space<vmem>>, vector<1x288x128xf32>
    %86 = vector.shape_cast %85 : vector<1x288x128xf32> to vector<288x128xf32>
    %87 = vector.shape_cast %84 : vector<288x128xf32> to vector<1x288x128xf32>
    tpu.vector_store %arg9[%c0_64, %c0_65, %c0_66], %87 {strides = array<i32>} : memref<1x288x128xf32, #tpu.memory_space<vmem>>, vector<1x288x128xf32>,
    return
  }
  func.func @transform_0(%arg0: i32) -> (i32, i32, i32) {
    %c0_i32 = arith.constant 0 : i32
    %c0_i32_0 = arith.constant 0 : i32
    %c0_i32_1 = arith.constant 0 : i32
    return %arg0, %c0_i32, %c0_i32_0 : i32, i32, i32
  }
  func.func @transform_1(%arg0: i32) -> (i32, i32) {
    %c0_i32 = arith.constant 0 : i32
    %c0_i32_0 = arith.constant 0 : i32
    %c0_i32_1 = arith.constant 0 : i32
    return %c0_i32, %c0_i32_0 : i32, i32
  }
  func.func @transform_2(%arg0: i32) -> (i32, i32) {
    %c0_i32 = arith.constant 0 : i32
    %c0_i32_0 = arith.constant 0 : i32
    %c0_i32_1 = arith.constant 0 : i32
    return %c0_i32, %c0_i32_0 : i32, i32
  }
  func.func @transform_3(%arg0: i32) -> (i32, i32) {
    %c0_i32 = arith.constant 0 : i32
    %c0_i32_0 = arith.constant 0 : i32
    %c0_i32_1 = arith.constant 0 : i32
    return %c0_i32, %c0_i32_0 : i32, i32
  }
  func.func @transform_4(%arg0: i32) -> (i32, i32, i32) {
    %c0_i32 = arith.constant 0 : i32
    %c0_i32_0 = arith.constant 0 : i32
    %c0_i32_1 = arith.constant 0 : i32
    %c0_i32_2 = arith.constant 0 : i32
    return %c0_i32, %c0_i32_0, %c0_i32_1 : i32, i32, i32
  }
  func.func @transform_5(%arg0: i32) -> (i32, i32) {
    %c0_i32 = arith.constant 0 : i32
    %c0_i32_0 = arith.constant 0 : i32
    %c0_i32_1 = arith.constant 0 : i32
    return %c0_i32, %c0_i32_0 : i32, i32
  }
  func.func @transform_6(%arg0: i32) -> (i32, i32) {
    %c0_i32 = arith.constant 0 : i32
    %c0_i32_0 = arith.constant 0 : i32
    %c0_i32_1 = arith.constant 0 : i32
    return %c0_i32, %c0_i32_0 : i32, i32
  }
  func.func @transform_7(%arg0: i32) -> (i32, i32) {
    %c0_i32 = arith.constant 0 : i32
    %c0_i32_0 = arith.constant 0 : i32
    %c0_i32_1 = arith.constant 0 : i32
    return %c0_i32, %c0_i32_0 : i32, i32
  }
  func.func @transform_8(%arg0: i32) -> (i32, i32, i32) {
    %c0_i32 = arith.constant 0 : i32
    %c0_i32_0 = arith.constant 0 : i32
    %c0_i32_1 = arith.constant 0 : i32
    return %arg0, %c0_i32, %c0_i32_0 : i32, i32, i32
  }
}

</mosaic_0001>

<bundles_post_ra>
// kernel: bottleneck_forward.1
= control target key start
LH: loop header
LB: loop body
LE: loop exit
PB: predicated region body
PF: predicated region fallthrough
CT: control target
= control target key end

     0   :  { %s5694_s27 = smov 0   ;;  %s7038_s0 = inlined_call_operand.vmem [shape: f32[2,288,128], index: 0, kind: input, shape index: {}]   ;;  %s7039_s1 = inlined_call_operand.vmem [shape: f32[288,1], index: 1, kind: input, shape index: {}]   ;;  %s7040_s2 = inlined_call_operand.vmem [shape: bf16[128,128], index: 2, kind: input, shape index: {}]   ;;  %s7041_s3 = inlined_call_operand.vmem [shape: f32[1,128], index: 3, kind: input, shape index: {}]   ;;  %s7042_s4 = inlined_call_operand.vmem [shape: bf16[9,128,128], index: 4, kind: input, shape index: {}]   ;;  %s7043_s5 = inlined_call_operand.vmem [shape: f32[1,128], index: 5, kind: input, shape index: {}]   ;;  %s7044_s6 = inlined_call_operand.vmem [shape: bf16[128,128], index: 6, kind: input, shape index: {}]   ;;  %s7045_s7 = inlined_call_operand.vmem [shape: f32[1,128], index: 7, kind: input, shape index: {}]   ;;  %s7046_s8 = inlined_call_operand.vmem [shape: f32[2,288,128], index: 8, kind: output, shape index: {}]  }
   0x1 LB: > { %s4399_s28 = sadd.s32 4294967295, %s5644_s27   ;;  %p4403_p0 = scmp.ge.s32.totalorder %s5644_s27, 1  ;;  %s5644_s27 = sphi %s5694_s27, %s18_s27  }
   0x2   : > { %p262_p1 = scmp.lt.s32.totalorder %s5644_s27, 3 }
   0x4   : > { %p263_p2 = pnand %p4403_p0, %p262_p1 }
   0x6   : > { %266 = sbr.rel (%p263_p2) target bundleno = 1026 (0x402), region = 52 }
   0xb   : > { %v5514_v0 = vld [vmem:[%s7040_s2 + $0x38] sm:$0xff]   ;;  %p296_p3 = scmp.lt.s32.totalorder %s4399_s28, 1  ;;  %v5515_v1 = vld [vmem:[%s7040_s2 + $0x30] sm:$0xff]   ;;  %v5516_v2 = vld [vmem:[%s7040_s2 + $0x28] sm:$0xff]   ;;  %v5646_v3 = vmov 0  }
   0xc   : > { %4913 = vmatprep.subr.bf16.mxu0 %v5514_v0  ;;  %5485 = vmatprep.subr.bf16.mxu1 %v5514_v0  ;;  %v5517_v4 = vld [vmem:[%s7040_s2 + $0x20] sm:$0xff]   ;;  %v5518_v12 = vld [vmem:[%s7040_s2 + $0x18] sm:$0xff]   ;;  %v647_v13 = vld [vmem:[%s7039_s1 + $0x10] sm:$0xff] }
   0xd   : > { %s7054_s28 = smov (!%p296_p3, %s4399_s28), 1  ;;  %4914 = vmatpush3.bf16.msra.mxu0 %v5514_v0  ;;  %5493 = vmatpush3.bf16.msra.mxu1 %v5514_v0  ;;  %v645_v11 = vld [vmem:[%s7039_s1] sm:$0xff]  ;;  %v646_v14 = vld [vmem:[%s7039_s1 + $0x8] sm:$0xff]  ;;  %v648_v15 = vld [vmem:[%s7039_s1 + $0x18] sm:$0xff] }
   0xe   : > { %4915 = vmatprep.subr.bf16.mxu0 %v5515_v1  ;;  %5486 = vmatprep.subr.bf16.mxu1 %v5515_v1  ;;  %s5501_s13 = smul.u32 288, %s7054_s28  ;;  %v5519_v16 = vld [vmem:[%s7040_s2 + $0x10] sm:$0xff]   ;;  %v649_v17 = vld [vmem:[%s7039_s1 + $0x20] sm:$0xff]  ;;  %v650_v18 = vld [vmem:[%s7039_s1 + $0x28] sm:$0xff] }
   0xf   : > { %5512 = vset.pattern.permute.xlu0 %v5646_v3  ;;  %5513 = vset.pattern.permute.xlu1 %v5646_v3  ;;  %v5520_v19 = vld [vmem:[%s7040_s2 + $0x8] sm:$0xff]   ;;  %v651_v20 = vld [vmem:[%s7039_s1 + $0x30] sm:$0xff]  ;;  %v652_v21 = vld [vmem:[%s7039_s1 + $0x38] sm:$0xff] }
  0x10   : > { %s5719_s16 = scalar_lea.vmem %s7038_s0, %s5501_s13  ;;  %683 = vperm.xlu0 %5512, %v645_v11   ;;  %693 = vperm.xlu1 %5513, %v647_v13   ;;  %v5521_v22 = vld [vmem:[%s7040_s2] sm:$0xff]   ;;  %v654_v29 = vld [vmem:[%s7039_s1 + $0x48] sm:$0xff]  ;;  %v655_v37 = vld [vmem:[%s7039_s1 + $0x50] sm:$0xff]  ;;  %s6928_s14 = scalar_lea.vmem %s7046_s8, %s5501_s13 }
  0x11   : > { %4916 = vmatpush3.bf16.msra.mxu0 %v5515_v1  ;;  %5494 = vmatpush3.bf16.msra.mxu1 %v5515_v1  ;;  %v307_v5 = vld [vmem:[%s5719_s16] sm:$0xff]  ;;  %v308_v6 = vld [vmem:[%s5719_s16 + $0x8] sm:$0xff]  ;;  %v309_v23 = vld [vmem:[%s5719_s16 + $0x10] sm:$0xff] }
  0x12   : > { %4917 = vmatprep.subr.bf16.mxu0 %v5516_v2  ;;  %5487 = vmatprep.subr.bf16.mxu1 %v5516_v2  ;;  %v323_v7 = vld [vmem:[%s5719_s16 + $0x80] sm:$0xff]  ;;  %v343_v8 = vpack.c.bf16 %v308_v6, %v307_v5  ;;  %v324_v9 = vld [vmem:[%s5719_s16 + $0x88] sm:$0xff]  ;;  %v310_v24 = vld [vmem:[%s5719_s16 + $0x18] sm:$0xff] }
  0x13   : > { %v351_v10 = vpack.c.bf16 %v324_v9, %v323_v7  ;;  %v325_v25 = vld [vmem:[%s5719_s16 + $0x90] sm:$0xff]  ;;  %v326_v26 = vld [vmem:[%s5719_s16 + $0x98] sm:$0xff]  ;;  %v311_v27 = vld [vmem:[%s5719_s16 + $0x20] sm:$0xff]  ;;  %v344_v33 = vpack.c.bf16 %v310_v24, %v309_v23 }
  0x14   : > { %4929 = vmatprep.mubr.bf16.mxu0 %v343_v8  ;;  %688 = vperm.xlu0 %5512, %v646_v14   ;;  %v653_v28 = vld [vmem:[%s7039_s1 + $0x40] sm:$0xff]  ;;  %v312_v30 = vld [vmem:[%s5719_s16 + $0x28] sm:$0xff]  ;;  %v352_v34 = vpack.c.bf16 %v326_v26, %v325_v25  ;;  %v656_v38 = vld [vmem:[%s7039_s1 + $0x58] sm:$0xff] }
  0x15   : > { %4918 = vmatpush3.bf16.msra.mxu0 %v5516_v2  ;;  %5495 = vmatpush3.bf16.msra.mxu1 %v5516_v2  ;;  %v327_v31 = vld [vmem:[%s5719_s16 + $0xa0] sm:$0xff]  ;;  %v328_v32 = vld [vmem:[%s5719_s16 + $0xa8] sm:$0xff]  ;;  %v345_v35 = vpack.c.bf16 %v312_v30, %v311_v27  ;;  %v313_v39 = vld [vmem:[%s5719_s16 + $0x30] sm:$0xff] }
  0x16   : > { %4919 = vmatprep.subr.bf16.mxu0 %v5517_v4  ;;  %5488 = vmatprep.subr.bf16.mxu1 %v5517_v4  ;;  %v353_v36 = vpack.c.bf16 %v328_v32, %v327_v31  ;;  %v314_v40 = vld [vmem:[%s5719_s16 + $0x38] sm:$0xff]  ;;  %v329_v41 = vld [vmem:[%s5719_s16 + $0xb0] sm:$0xff]  ;;  %v315_v43 = vld [vmem:[%s5719_s16 + $0x40] sm:$0xff] }
  0x17   : > { %4945 = vmatprep.mubr.bf16.mxu1 %v351_v10  ;;  %698 = vperm.xlu1 %5513, %v648_v15   ;;  %v330_v42 = vld [vmem:[%s5719_s16 + $0xb8] sm:$0xff]  ;;  %v316_v44 = vld [vmem:[%s5719_s16 + $0x48] sm:$0xff]  ;;  %v331_v45 = vld [vmem:[%s5719_s16 + $0xc0] sm:$0xff]  ;;  %v346_v49 = vpack.c.bf16 %v314_v40, %v313_v39 }
  0x18   : > { %703 = vperm.xlu0 %5512, %v649_v17   ;;  %v332_v46 = vld [vmem:[%s5719_s16 + $0xc8] sm:$0xff]  ;;  %v657_v47 = vld [vmem:[%s7039_s1 + $0x60] sm:$0xff]  ;;  %v354_v50 = vpack.c.bf16 %v330_v42, %v329_v41  ;;  %v347_v51 = vpack.c.bf16 %v316_v44, %v315_v43  ;;  %v659_v53 = vld [vmem:[%s7039_s1 + $0x70] sm:$0xff]  ;;  %v5647_v44 = vmov 0.0  }
  0x19   : > { %4920 = vmatpush3.bf16.msra.mxu0 %v5517_v4  ;;  %5496 = vmatpush3.bf16.msra.mxu1 %v5517_v4  ;;  %v658_v48 = vld [vmem:[%s7039_s1 + $0x68] sm:$0xff]  ;;  %v355_v52 = vpack.c.bf16 %v332_v46, %v331_v45  ;;  %v660_v54 = vld [vmem:[%s7039_s1 + $0x78] sm:$0xff]  ;;  %v317_v55 = vld [vmem:[%s5719_s16 + $0x50] sm:$0xff]  ;;  %901 = vst [vmem:[#allocation2 + $0x20] sm:$0xff] %v5647_v44 }
  0x1a   : > { %4921 = vmatprep.subr.bf16.mxu0 %v5518_v12  ;;  %5489 = vmatprep.subr.bf16.mxu1 %v5518_v12  ;;  %v318_v56 = vld [vmem:[%s5719_s16 + $0x58] sm:$0xff]  ;;  %v333_v57 = vld [vmem:[%s5719_s16 + $0xd0] sm:$0xff]  ;;  %v319_v59 = vld [vmem:[%s5719_s16 + $0x60] sm:$0xff]  ;;  %902 = vst [vmem:[#allocation2 + $0x28] sm:$0xff] %v5647_v44 }
  0x1b   : > { %708 = vperm.xlu1 %5513, %v650_v18   ;;  %v334_v58 = vld [vmem:[%s5719_s16 + $0xd8] sm:$0xff]  ;;  %v320_v60 = vld [vmem:[%s5719_s16 + $0x68] sm:$0xff]  ;;  %v335_v61 = vld [vmem:[%s5719_s16 + $0xe0] sm:$0xff]  ;;  %v348_v1 = vpack.c.bf16 %v318_v56, %v317_v55  ;;  %897 = vst [vmem:[#allocation2] sm:$0xff] %v5647_v44  ;;  %v5648_v55 = vmov 0.0|0.0  }
  0x1c   : > { %713 = vperm.xlu0 %5512, %v651_v20   ;;  %v336_v62 = vld [vmem:[%s5719_s16 + $0xe8] sm:$0xff]  ;;  %v661_v63 = vld [vmem:[%s7039_s1 + $0x80] sm:$0xff]  ;;  %v356_v2 = vpack.c.bf16 %v334_v58, %v333_v57  ;;  %v349_v3 = vpack.c.bf16 %v320_v60, %v319_v59  ;;  %v663_v5 = vld [vmem:[%s7039_s1 + $0x90] sm:$0xff]  ;;  %898 = vst [vmem:[#allocation2 + $0x8] sm:$0xff] %v5647_v44 }
  0x1d   : > { %4922 = vmatpush3.bf16.msra.mxu0 %v5518_v12  ;;  %5497 = vmatpush3.bf16.msra.mxu1 %v5518_v12  ;;  %v662_v0 = vld [vmem:[%s7039_s1 + $0x88] sm:$0xff]  ;;  %v357_v4 = vpack.c.bf16 %v336_v62, %v335_v61  ;;  %v664_v6 = vld [vmem:[%s7039_s1 + $0x98] sm:$0xff]  ;;  %v321_v7 = vld [vmem:[%s5719_s16 + $0x70] sm:$0xff]  ;;  %899 = vst [vmem:[#allocation2 + $0x10] sm:$0xff] %v5647_v44 }
  0x1e   : > { %4923 = vmatprep.subr.bf16.mxu0 %v5519_v16  ;;  %5490 = vmatprep.subr.bf16.mxu1 %v5519_v16  ;;  %v322_v8 = vld [vmem:[%s5719_s16 + $0x78] sm:$0xff]  ;;  %v337_v9 = vld [vmem:[%s5719_s16 + $0xf0] sm:$0xff]  ;;  %v339_v11 = vld [vmem:[%s5719_s16 + $0x100] sm:$0xff]  ;;  %900 = vst [vmem:[#allocation2 + $0x18] sm:$0xff] %v5647_v44 }
  0x1f   : > { %718 = vperm.xlu1 %5513, %v652_v21   ;;  %v338_v10 = vld [vmem:[%s5719_s16 + $0xf8] sm:$0xff]  ;;  %v340_v12 = vld [vmem:[%s5719_s16 + $0x108] sm:$0xff]  ;;  %v665_v13 = vld [vmem:[%s7039_s1 + $0xa0] sm:$0xff]  ;;  %v350_v15 = vpack.c.bf16 %v322_v8, %v321_v7  ;;  %903 = vst [vmem:[#allocation2 + $0x30] sm:$0xff] %v5647_v44 }
  0x20   : > { %723 = vperm.xlu0 %5512, %v653_v28   ;;  %v666_v14 = vld [vmem:[%s7039_s1 + $0xa8] sm:$0xff]  ;;  %v359_v17 = vpack.c.bf16 %v340_v12, %v339_v11  ;;  %v667_v18 = vld [vmem:[%s7039_s1 + $0xb0] sm:$0xff]  ;;  %v5522_v20 = vld [vmem:[%s7042_s4 + $0x78] sm:$0xff]   ;;  %904 = vst [vmem:[#allocation2 + $0x38] sm:$0xff] %v5647_v44 }
  0x21   : > { %4924 = vmatpush3.bf16.msra.mxu0 %v5519_v16  ;;  %5498 = vmatpush3.bf16.msra.mxu1 %v5519_v16  ;;  %v358_v16 = vpack.c.bf16 %v338_v10, %v337_v9  ;;  %v341_v21 = vld [vmem:[%s5719_s16 + $0x110] sm:$0xff]  ;;  %v669_v23 = vld [vmem:[%s7039_s1 + $0xc0] sm:$0xff]  ;;  %v670_v24 = vld [vmem:[%s7039_s1 + $0xc8] sm:$0xff]  ;;  %905 = vst [vmem:[#allocation2 + $0x40] sm:$0xff] %v5647_v44 }
  0x22   : > { %4925 = vmatprep.subr.bf16.mxu0 %v5520_v19  ;;  %5491 = vmatprep.subr.bf16.mxu1 %v5520_v19  ;;  %v5523_v25 = vld [vmem:[%s7042_s4 + $0x70] sm:$0xff]   ;;  %v672_v28 = vld [vmem:[%s7039_s1 + $0xd8] sm:$0xff]  ;;  %v5525_v30 = vld [vmem:[%s7042_s4 + $0x68] sm:$0xff]   ;;  %906 = vst [vmem:[#allocation2 + $0x48] sm:$0xff] %v5647_v44 }
  0x23   : > { %728 = vperm.xlu1 %5513, %v654_v29   ;;  %v671_v27 = vld [vmem:[%s7039_s1 + $0xd0] sm:$0xff]  ;;  %v5524_v29 = vld [vmem:[%s7042_s4 + $0x38] sm:$0xff]   ;;  %v673_v31 = vld [vmem:[%s7039_s1 + $0xe0] sm:$0xff]  ;;  %907 = vst [vmem:[#allocation2 + $0x50] sm:$0xff] %v5647_v44 }
  0x24   : > { %733 = vperm.xlu0 %5512, %v655_v37   ;;  %v674_v32 = vld [vmem:[%s7039_s1 + $0xe8] sm:$0xff]  ;;  %v679_v40 = vld [vmem:[%s7039_s1 + $0x110] sm:$0xff]  ;;  %v680_v41 = vld [vmem:[%s7039_s1 + $0x118] sm:$0xff]  ;;  %908 = vst [vmem:[#allocation2 + $0x58] sm:$0xff] %v5647_v44 }
  0x25   : > { %4926 = vmatpush3.bf16.msra.mxu0 %v5520_v19  ;;  %5499 = vmatpush3.bf16.msra.mxu1 %v5520_v19  ;;  %v668_v19 = vld [vmem:[%s7039_s1 + $0xb8] sm:$0xff]  ;;  %v5528_v37 = vld [vmem:[%s7042_s4 + $0x28] sm:$0xff]   ;;  %v5530_v42 = vld [vmem:[%s7042_s4 + $0x20] sm:$0xff]   ;;  %909 = vst [vmem:[#allocation2 + $0x60] sm:$0xff] %v5647_v44 }
  0x26   : > { %4927 = vmatprep.subr.bf16.mxu0 %v5521_v22  ;;  %5492 = vmatprep.subr.bf16.mxu1 %v5521_v22  ;;  %v678_v39 = vld [vmem:[%s7039_s1 + $0x108] sm:$0xff]  ;;  %v5529_v43 = vld [vmem:[%s7042_s4 + $0x58] sm:$0xff]   ;;  %910 = vst [vmem:[#allocation2 + $0x68] sm:$0xff] %v5647_v44  ;;  %911 = vst [vmem:[#allocation2 + $0x70] sm:$0xff] %v5647_v44 }
  0x27   : > { %738 = vperm.xlu1 %5513, %v656_v38   ;;  %v677_v38 = vld [vmem:[%s7039_s1 + $0x100] sm:$0xff]  ;;  %912 = vst [vmem:[#allocation2 + $0x78] sm:$0xff] %v5647_v44  ;;  %913 = vst [vmem:[#allocation2 + $0x80] sm:$0xff] %v5647_v44  ;;  %v5532_v45 = vld [vmem:[%s7042_s4 + $0x18] sm:$0xff]  }
  0x28   : > { %743 = vperm.xlu0 %5512, %v657_v47   ;;  %914 = vst [vmem:[#allocation2 + $0x88] sm:$0xff] %v5647_v44  ;;  %915 = vst [vmem:[#allocation2 + $0x90] sm:$0xff] %v5647_v44  ;;  %v5531_v46 = vld [vmem:[%s7042_s4 + $0x50] sm:$0xff]   ;;  %v5931_v56 = vld [vmem:[%s7042_s4 + $0xb8] sm:$0xff]  }
  0x29   : > { %4928 = vmatpush3.bf16.msra.mxu0 %v5521_v22  ;;  %5500 = vmatpush3.bf16.msra.mxu1 %v5521_v22  ;;  %v342_v22 = vld [vmem:[%s5719_s16 + $0x118] sm:$0xff]  ;;  %916 = vst [vmem:[#allocation2 + $0x98] sm:$0xff] %v5647_v44  ;;  %917 = vst [vmem:[#allocation2 + $0xa0] sm:$0xff] %v5647_v44  ;;  %v5533_v47 = vld [vmem:[%s7042_s4 + $0x10] sm:$0xff]  }
  0x2a   : > { %4965 = vmatprep.subr.bf16.mxu1 %v5522_v20  ;;  %v360_v26 = vpack.c.bf16 %v342_v22, %v341_v21  ;;  %5017 = vmatprep.subr.bf16.mxu0 %v5524_v29  ;;  %918 = vst [vmem:[#allocation2 + $0xa8] sm:$0xff] %v5647_v44  ;;  %919 = vst [vmem:[#allocation2 + $0xb0] sm:$0xff] %v5647_v44  ;;  %v5937_v58 = vld [vmem:[%s7042_s4 + $0xf8] sm:$0xff]  }
  0x2b   : > { %748 = vperm.xlu1 %5513, %v658_v48   ;;  %920 = vst [vmem:[#allocation2 + $0xb8] sm:$0xff] %v5647_v44  ;;  %921 = vst [vmem:[#allocation2 + $0xc0] sm:$0xff] %v5647_v44  ;;  %v5534_v48 = vld [vmem:[%s7042_s4 + $0x48] sm:$0xff]  }
  0x2c   : > { %4930 = vmatmul.mubr.bf16.vlgmr.msra.gmra.mxu0 %v344_v33  ;;  %4946 = vmatmul.mubr.bf16.vlgmr.msra.gmra.mxu1 %v352_v34  ;;  %v5526_v33 = vld [vmem:[%s7042_s4 + $0x30] sm:$0xff]   ;;  %v5527_v34 = vld [vmem:[%s7042_s4 + $0x60] sm:$0xff]   ;;  %922 = vst [vmem:[#allocation2 + $0xc8] sm:$0xff] %v5647_v44  ;;  %923 = vst [vmem:[#allocation2 + $0xd0] sm:$0xff] %v5647_v44 }
  0x2d   : > { %4933 = vmatprep.mubr.bf16.mxu0 %v345_v35  ;;  %4949 = vmatprep.mubr.bf16.mxu1 %v353_v36  ;;  %v675_v35 = vld [vmem:[%s7039_s1 + $0xf0] sm:$0xff]  ;;  %v676_v36 = vld [vmem:[%s7039_s1 + $0xf8] sm:$0xff]  ;;  %924 = vst [vmem:[#allocation2 + $0xd8] sm:$0xff] %v5647_v44  ;;  %925 = vst [vmem:[#allocation2 + $0xe0] sm:$0xff] %v5647_v44 }
  0x2e   : > { %753 = vperm.xlu0 %5512, %v659_v53   ;;  %4966 = vmatpush3.bf16.msra.mxu1 %v5522_v20  ;;  %926 = vst [vmem:[#allocation2 + $0xe8] sm:$0xff] %v5647_v44  ;;  %927 = vst [vmem:[#allocation2 + $0xf0] sm:$0xff] %v5647_v44  ;;  %v1047_v53 = vld [vmem:[#allocation2 + $0x9] sm:$0xff] }
  0x2f   : > { %758 = vperm.xlu1 %5513, %v660_v54   ;;  %4967 = vmatprep.subr.bf16.mxu1 %v5523_v25  ;;  %928 = vst [vmem:[#allocation2 + $0xf8] sm:$0xff] %v5647_v44  ;;  %929 = vst [vmem:[#allocation2 + $0x100] sm:$0xff] %v5647_v44 }
  0x30   : > { %5018 = vmatpush3.bf16.msra.mxu0 %v5524_v29  ;;  %930 = vst [vmem:[#allocation2 + $0x108] sm:$0xff] %v5647_v44  ;;  %931 = vst [vmem:[#allocation2 + $0x110] sm:$0xff] %v5647_v44 }
  0x31   : > { %5019 = vmatprep.subr.bf16.mxu0 %v5526_v33  ;;  %932 = vst [vmem:[#allocation2 + $0x118] sm:$0xff] %v5647_v44  ;;  %933 = vst [vmem:[#allocation2 + $0x120] sm:$0xff] %v5647_v44 }
  0x32   : > { %763 = vperm.xlu0 %5512, %v661_v63   ;;  %4968 = vmatpush3.bf16.msra.mxu1 %v5523_v25  ;;  %934 = vst [vmem:[#allocation2 + $0x128] sm:$0xff] %v5647_v44  ;;  %935 = vst [vmem:[#allocation2 + $0x130] sm:$0xff] %v5647_v44 }
  0x33   : > { %768 = vperm.xlu1 %5513, %v662_v0   ;;  %4969 = vmatprep.subr.bf16.mxu1 %v5525_v30  ;;  %936 = vst [vmem:[#allocation2 + $0x138] sm:$0xff] %v5647_v44  ;;  %937 = vst [vmem:[#allocation2 + $0x140] sm:$0xff] %v5647_v44 }
  0x34   : > { %4934 = vmatmul.mubr.bf16.gmra.mxu0 %v346_v49  ;;  %4950 = vmatmul.mubr.bf16.gmra.mxu1 %v354_v50  ;;  %v5535_v49 = vld [vmem:[%s7042_s4 + $0x8] sm:$0xff]   ;;  %v5536_v50 = vld [vmem:[%s7042_s4 + $0x40] sm:$0xff]  }
  0x35   : > { %4937 = vmatprep.mubr.bf16.mxu0 %v347_v51  ;;  %4953 = vmatprep.mubr.bf16.mxu1 %v355_v52  ;;  %v5537_v51 = vld [vmem:[%s7042_s4] sm:$0xff]  }
  0x36   : > { %773 = vperm.xlu0 %5512, %v663_v5   ;;  %4970 = vmatpush3.bf16.msra.mxu1 %v5525_v30  ;;  %v1046_v52 = vld [vmem:[#allocation2 + $0x1] sm:$0xff] }
  0x37   : > { %778 = vperm.xlu1 %5513, %v664_v6   ;;  %4971 = vmatprep.subr.bf16.mxu1 %v5527_v34  ;;  %v1082_v54 = vpack.c.bf16 %v1047_v53, %v1046_v52 }
  0x38   : > { %5020 = vmatpush3.bf16.msra.mxu0 %v5526_v33 }
  0x39   : > { %5021 = vmatprep.subr.bf16.mxu0 %v5528_v37 }
  0x3a   : > { %783 = vperm.xlu0 %5512, %v665_v13   ;;  %4972 = vmatpush3.bf16.msra.mxu1 %v5527_v34 }
  0x3b   : > { %788 = vperm.xlu1 %5513, %v666_v14   ;;  %4973 = vmatprep.subr.bf16.mxu1 %v5529_v43 }
  0x3c   : > { %4938 = vmatmul.mubr.bf16.gmra.mxu0 %v348_v1  ;;  %4954 = vmatmul.mubr.bf16.gmra.mxu1 %v356_v2 }
  0x3d   : > { %4941 = vmatprep.mubr.bf16.mxu0 %v349_v3  ;;  %4957 = vmatprep.mubr.bf16.mxu1 %v357_v4 }
  0x3e   : > { %793 = vperm.xlu0 %5512, %v667_v18   ;;  %5022 = vmatpush3.bf16.msra.mxu0 %v5528_v37 }
  0x3f   : > { %798 = vperm.xlu1 %5513, %v668_v19   ;;  %5023 = vmatprep.subr.bf16.mxu0 %v5530_v42 }
  0x40   : > { %4974 = vmatpush3.bf16.msra.mxu1 %v5529_v43 }
  0x41   : > { %4975 = vmatprep.subr.bf16.mxu1 %v5531_v46 }
  0x42   : > { %803 = vperm.xlu0 %5512, %v669_v23   ;;  %5024 = vmatpush3.bf16.msra.mxu0 %v5530_v42 }
  0x43   : > { %808 = vperm.xlu1 %5513, %v670_v24   ;;  %5025 = vmatprep.subr.bf16.mxu0 %v5532_v45 }
  0x44   : > { %4942 = vmatmul.mubr.bf16.gmra.mxu0 %v350_v15  ;;  %4958 = vmatmul.mubr.bf16.gmra.mxu1 %v358_v16  ;;  %v5973_v16 = vld [vmem:[%s7041_s3] ss:$0 sm:$0xff] }
  0x45   : > { %4961 = vmatprep.mubr.bf16.mxu1 %v359_v17  ;;  %4976 = vmatpush3.bf16.msra.mxu1 %v5531_v46 }
  0x46   : > { %813 = vperm.xlu0 %5512, %v671_v27   ;;  %5026 = vmatpush3.bf16.msra.mxu0 %v5532_v45 }
  0x47   : > { %818 = vperm.xlu1 %5513, %v672_v28   ;;  %5027 = vmatprep.subr.bf16.mxu0 %v5533_v47 }
  0x48   : > { %4977 = vmatprep.subr.bf16.mxu1 %v5534_v48  ;;  %5033 = vmatprep.mubr.bf16.mxu0 %v5648_v55 }
  0x49   : > { %4978 = vmatpush3.bf16.msra.mxu1 %v5534_v48 }
  0x4a   : > { %823 = vperm.xlu0 %5512, %v673_v31   ;;  %5028 = vmatpush3.bf16.msra.mxu0 %v5533_v47 }
  0x4b   : > { %828 = vperm.xlu1 %5513, %v674_v32   ;;  %5029 = vmatprep.subr.bf16.mxu0 %v5535_v49 }
  0x4c   : > { %4962 = vmatmul.mubr.bf16.gmra.mxu1 %v360_v26  ;;  %4979 = vmatprep.subr.bf16.mxu1 %v5536_v50 }
  0x4d   : > { %4980 = vmatpush3.bf16.msra.mxu1 %v5536_v50  ;;  %4981 = vmatprep.mubr.bf16.mxu1 %v1082_v54 }
  0x4e   : > { %833 = vperm.xlu0 %5512, %v675_v35   ;;  %5030 = vmatpush3.bf16.msra.mxu0 %v5535_v49 }
  0x4f   : > { %838 = vperm.xlu1 %5513, %v676_v36   ;;  %5031 = vmatprep.subr.bf16.mxu0 %v5537_v51 }
  0x50   : > { %5069 = vmatprep.subr.bf16.mxu1 %v5931_v56 }
  0x52   : > { %843 = vperm.xlu0 %5512, %v677_v38   ;;  %5032 = vmatpush3.bf16.msra.mxu0 %v5537_v51 }
  0x53   : > { %848 = vperm.xlu1 %5513, %v678_v39   ;;  %5121 = vmatprep.subr.bf16.mxu0 %v5937_v58 }
  0x56   : > { %853 = vperm.xlu0 %5512, %v679_v40  }
  0x57   : > { %858 = vperm.xlu1 %5513, %v680_v41  }
  0x8b   : > { %v684_v57 = vpop.permute.xlu0 %683  ;;  %v694_v59 = vpop.permute.xlu1 %693 }
  0x8f   : > { %v5940_v60 = vpop.permute.xlu0 %688 }
  0x92   : > { %v699_v61 = vpop.permute.xlu1 %698 }
  0x93   : > { %v5942_v62 = vpop.permute.xlu0 %703 }
  0x96   : > { %v5944_v63 = vpop.permute.xlu1 %708 }
  0x97   : > { %v5946_v0 = vpop.permute.xlu0 %713 }
  0x9a   : > { %v5948_v1 = vpop.permute.xlu1 %718 }
  0x9b   : > { %v5950_v2 = vpop.permute.xlu0 %723 }
  0x9e   : > { %v5952_v3 = vpop.permute.xlu1 %728 }
  0x9f   : > { %v5954_v4 = vpop.permute.xlu0 %733 }
  0xa2   : > { %v5956_v5 = vpop.permute.xlu1 %738 }
  0xa3   : > { %v5958_v6 = vpop.permute.xlu0 %743 }
  0xa6   : > { %v5960_v7 = vpop.permute.xlu1 %748 }
  0xa9   : > { %v5962_v8 = vpop.permute.xlu0 %753 }
  0xaa   : > { %v5964_v9 = vpop.permute.xlu1 %758 }
  0xad   : > { %v764_v10 = vpop.permute.xlu0 %763 }
  0xae   : > { %v769_v11 = vpop.permute.xlu1 %768 }
  0xb1   : > { %v774_v12 = vpop.permute.xlu0 %773 }
  0xb2   : > { %v779_v13 = vpop.permute.xlu1 %778 }
  0xb5   : > { %v5966_v14 = vpop.permute.xlu0 %783 }
  0xb6   : > { %v5968_v15 = vpop.permute.xlu1 %788 }
  0xb9   : > { %v794_v17 = vpop.permute.xlu0 %793 }
  0xba   : > { %v5977_v24 = vpop.permute.xlu1 %798 }
  0xbd   : > { %v5981_v31 = vpop.permute.xlu0 %803 }
  0xbe   : > { %v5987_v48 = vpop.permute.xlu1 %808 }
  0xec   : > { %v4931_v18 = vpop.f32.mrf.mxu0  ;;  %v4947_v19 = vpop.f32.mrf.mxu1 }
  0xed   : > { %v475_v20 = vadd.f32 %v4931_v18, %v5973_v16  ;;  %v539_v21 = vadd.f32 %v4947_v19, %v5973_v16 }
  0xee   : > { %v466_v22 = vpop.f32.mrf.mxu0  ;;  %v530_v23 = vpop.f32.mrf.mxu1 }
  0xef   : > { %v611_v25 = vmax.f32 %v475_v20, 0.0  ;;  %v627_v26 = vmax.f32 %v539_v21, 0.0  ;;  %v467_v27 = vadd.f32 %v5973_v16, %v466_v22  ;;  %v531_v28 = vadd.f32 %v5973_v16, %v530_v23 }
  0xf0   : > { %v4932_v29 = vpop.f32.mrf.mxu0  ;;  %v4948_v30 = vpop.f32.mrf.mxu1 }
  0xf1   : > { %v863_v32 = vmul.f32 %v694_v59, %v611_v25  ;;  %v879_v33 = vmul.f32 %v774_v12, %v627_v26  ;;  %v609_v34 = vmax.f32 %v467_v27, 0.0  ;;  %v625_v35 = vmax.f32 %v531_v28, 0.0  ;;  %v5991_v59 = vpop.permute.xlu0 %813 }
  0xf2   : > { %v478_v36 = vadd.f32 %v4932_v29, %v5973_v16  ;;  %v542_v37 = vadd.f32 %v4948_v30, %v5973_v16  ;;  %v469_v38 = vpop.f32.mrf.mxu0  ;;  %v533_v39 = vpop.f32.mrf.mxu1 }
  0xf3   : > { %942 = vst [vmem:[#allocation2 + $0x23] sm:$0xff] %v863_v32  ;;  %958 = vst [vmem:[#allocation2 + $0xa3] sm:$0xff] %v879_v33  ;;  %v861_v40 = vmul.f32 %v684_v57, %v609_v34  ;;  %v877_v41 = vmul.f32 %v764_v10, %v625_v35  ;;  %v470_v42 = vadd.f32 %v5973_v16, %v469_v38  ;;  %v5999_v29 = vpop.permute.xlu1 %818 }
  0xf4   : > { %v534_v43 = vadd.f32 %v5973_v16, %v533_v39  ;;  %v612_v44 = vmax.f32 %v478_v36, 0.0  ;;  %v628_v45 = vmax.f32 %v542_v37, 0.0  ;;  %v4935_v46 = vpop.f32.mrf.mxu0  ;;  %v4951_v47 = vpop.f32.mrf.mxu1 }
  0xf5   : > { %940 = vst [vmem:[#allocation2 + $0x13] sm:$0xff] %v861_v40  ;;  %956 = vst [vmem:[#allocation2 + $0x93] sm:$0xff] %v877_v41  ;;  %v610_v49 = vmax.f32 %v470_v42, 0.0  ;;  %v491_v51 = vadd.f32 %v4935_v46, %v5973_v16  ;;  %v555_v52 = vadd.f32 %v4951_v47, %v5973_v16  ;;  %v6005_v37 = vpop.permute.xlu0 %823 }
  0xf6   : > { %v626_v50 = vmax.f32 %v534_v43, 0.0  ;;  %v864_v53 = vmul.f32 %v699_v61, %v612_v44  ;;  %v880_v54 = vmul.f32 %v779_v13, %v628_v45  ;;  %v482_v55 = vpop.f32.mrf.mxu0  ;;  %v546_v57 = vpop.f32.mrf.mxu1 }
  0xf7   : > { %v862_v10 = vmul.f32 %v5940_v60, %v610_v49  ;;  %v615_v18 = vmax.f32 %v491_v51, 0.0  ;;  %v631_v19 = vmax.f32 %v555_v52, 0.0  ;;  %v483_v20 = vadd.f32 %v5973_v16, %v482_v55 }
  0xf8   : > { %v878_v12 = vmul.f32 %v769_v11, %v626_v50  ;;  %943 = vst [vmem:[#allocation2 + $0x2b] sm:$0xff] %v864_v53  ;;  %959 = vst [vmem:[#allocation2 + $0xab] sm:$0xff] %v880_v54  ;;  %v547_v21 = vadd.f32 %v5973_v16, %v546_v57  ;;  %v4936_v22 = vpop.f32.mrf.mxu0  ;;  %v4952_v23 = vpop.f32.mrf.mxu1 }
  0xf9   : > { %941 = vst [vmem:[#allocation2 + $0x1b] sm:$0xff] %v862_v10  ;;  %v867_v61 = vmul.f32 %v5946_v0, %v615_v18  ;;  %v883_v13 = vmul.f32 %v794_v17, %v631_v19  ;;  %v494_v25 = vadd.f32 %v4936_v22, %v5973_v16  ;;  %v558_v60 = vadd.f32 %v4952_v23, %v5973_v16  ;;  %v6015_v53 = vpop.permute.xlu1 %828 }
  0xfa   : > { %957 = vst [vmem:[#allocation2 + $0x9b] sm:$0xff] %v878_v12  ;;  %v613_v11 = vmax.f32 %v483_v20, 0.0  ;;  %v629_v26 = vmax.f32 %v547_v21, 0.0  ;;  %v485_v27 = vpop.f32.mrf.mxu0  ;;  %v549_v28 = vpop.f32.mrf.mxu1 }
  0xfb   : > { %946 = vst [vmem:[#allocation2 + $0x43] sm:$0xff] %v867_v61  ;;  %962 = vst [vmem:[#allocation2 + $0xc3] sm:$0xff] %v883_v13  ;;  %v616_v30 = vmax.f32 %v494_v25, 0.0  ;;  %v632_v32 = vmax.f32 %v558_v60, 0.0  ;;  %v486_v33 = vadd.f32 %v5973_v16, %v485_v27  ;;  %v550_v34 = vadd.f32 %v5973_v16, %v549_v28  ;;  %v5539_v61 = vld [vmem:[%s7042_s4 + $0xb0] sm:$0xff]   ;;  %v834_v13 = vpop.permute.xlu0 %833 }
  0xfc   : > { %v865_v0 = vmul.f32 %v5942_v62, %v613_v11  ;;  %v881_v17 = vmul.f32 %v5966_v14, %v629_v26  ;;  %v4939_v35 = vpop.f32.mrf.mxu0  ;;  %v4955_v36 = vpop.f32.mrf.mxu1  ;;  %v1048_v57 = vld [vmem:[#allocation2 + $0x11] sm:$0xff] }
  0xfd   : > { %v868_v38 = vmul.f32 %v5948_v1, %v616_v30  ;;  %v884_v39 = vmul.f32 %v5977_v24, %v632_v32  ;;  %v614_v40 = vmax.f32 %v486_v33, 0.0  ;;  %v630_v41 = vmax.f32 %v550_v34, 0.0  ;;  %v978_v10 = vld [vmem:[#allocation2 + $0x10] sm:$0xff] }
  0xfe   : > { %944 = vst [vmem:[#allocation2 + $0x33] sm:$0xff] %v865_v0  ;;  %960 = vst [vmem:[#allocation2 + $0xb3] sm:$0xff] %v881_v17  ;;  %v507_v42 = vadd.f32 %v4939_v35, %v5973_v16  ;;  %v571_v43 = vadd.f32 %v4955_v36, %v5973_v16  ;;  %v498_v44 = vpop.f32.mrf.mxu0  ;;  %v562_v62 = vpop.f32.mrf.mxu1 }
  0xff   : > { %947 = vst [vmem:[#allocation2 + $0x4b] sm:$0xff] %v868_v38  ;;  %963 = vst [vmem:[#allocation2 + $0xcb] sm:$0xff] %v884_v39  ;;  %v866_v14 = vmul.f32 %v5944_v63, %v614_v40  ;;  %v882_v45 = vmul.f32 %v5968_v15, %v630_v41  ;;  %v499_v1 = vadd.f32 %v5973_v16, %v498_v44  ;;  %v1051_v27 = vld [vmem:[#allocation2 + $0x29] sm:$0xff] }
 0x100   : > { %v563_v24 = vadd.f32 %v5973_v16, %v562_v62  ;;  %v619_v46 = vmax.f32 %v507_v42, 0.0  ;;  %v635_v47 = vmax.f32 %v571_v43, 0.0  ;;  %v4940_v49 = vpop.f32.mrf.mxu0  ;;  %v4956_v50 = vpop.f32.mrf.mxu1  ;;  %v1049_v51 = vld [vmem:[#allocation2 + $0x19] sm:$0xff]  ;;  %v1050_v12 = vld [vmem:[#allocation2 + $0x21] sm:$0xff] }
 0x101   : > { %v979_v52 = vld [vmem:[#allocation2 + $0x18] sm:$0xff]  ;;  %945 = vst [vmem:[#allocation2 + $0x3b] sm:$0xff] %v866_v14  ;;  %961 = vst [vmem:[#allocation2 + $0xbb] sm:$0xff] %v882_v45  ;;  %v617_v54 = vmax.f32 %v499_v1, 0.0  ;;  %v510_v63 = vadd.f32 %v4940_v49, %v5973_v16  ;;  %v574_v15 = vadd.f32 %v4956_v50, %v5973_v16  ;;  %v1083_v22 = vpack.c.bf16 %v1049_v51, %v1048_v57  ;;  %v980_v28 = vld [vmem:[#allocation2 + $0x20] sm:$0xff]  ;;  %v6039_v42 = vpop.permute.xlu1 %838  ;;  %v6051_v50 = vpop.permute.xlu0 %843 }
 0x102   : > { %v633_v55 = vmax.f32 %v563_v24, 0.0  ;;  %v871_v18 = vmul.f32 %v5954_v4, %v619_v46  ;;  %v887_v19 = vmul.f32 %v5991_v59, %v635_v47  ;;  %v501_v20 = vpop.f32.mrf.mxu0  ;;  %v565_v21 = vpop.f32.mrf.mxu1  ;;  %v1013_v23 = vpack.c.bf16 %v979_v52, %v978_v10  ;;  %v981_v35 = vld [vmem:[#allocation2 + $0x28] sm:$0xff] }
 0x103   : > { %v869_v25 = vmul.f32 %v5950_v2, %v617_v54  ;;  %v620_v11 = vmax.f32 %v510_v63, 0.0  ;;  %v636_v26 = vmax.f32 %v574_v15, 0.0  ;;  %v502_v4 = vadd.f32 %v5973_v16, %v501_v20  ;;  %4982 = vmatmul.mubr.bf16.vlgmr.msra.gmra.mxu1 %v1083_v22  ;;  %v5545_v2 = vld [vmem:[%s7042_s4 + $0xf0] sm:$0xff]   ;;  %v6047_v62 = vld [vmem:[%s7042_s4 + $0xe8] sm:$0xff]  }
 0x104   : > { %v885_v60 = vmul.f32 %v5981_v31, %v633_v55  ;;  %950 = vst [vmem:[#allocation2 + $0x63] sm:$0xff] %v871_v18  ;;  %966 = vst [vmem:[#allocation2 + $0xe3] sm:$0xff] %v887_v19  ;;  %v566_v59 = vadd.f32 %v5973_v16, %v565_v21  ;;  %5034 = vmatmul.mubr.bf16.vlgmr.msra.gmra.mxu0 %v1013_v23  ;;  %v4943_v30 = vpop.f32.mrf.mxu0  ;;  %v4959_v32 = vpop.f32.mrf.mxu1  ;;  %v1084_v33 = vpack.c.bf16 %v1051_v27, %v1050_v12 }
 0x105   : > { %948 = vst [vmem:[#allocation2 + $0x53] sm:$0xff] %v869_v25  ;;  %v872_v31 = vmul.f32 %v5956_v5, %v620_v11  ;;  %v888_v34 = vmul.f32 %v5999_v29, %v636_v26  ;;  %5070 = vmatpush3.bf16.msra.mxu1 %v5931_v56  ;;  %v523_v0 = vadd.f32 %v4943_v30, %v5973_v16  ;;  %v618_v36 = vmax.f32 %v502_v4, 0.0  ;;  %v5540_v5 = vld [vmem:[%s7042_s4 + $0xa8] sm:$0xff]   ;;  %v1052_v46 = vld [vmem:[#allocation2 + $0x31] sm:$0xff]  ;;  %v849_v4 = vpop.permute.xlu1 %848 }
 0x106   : > { %964 = vst [vmem:[#allocation2 + $0xd3] sm:$0xff] %v885_v60  ;;  %v587_v17 = vadd.f32 %v4959_v32, %v5973_v16  ;;  %v634_v38 = vmax.f32 %v566_v59, 0.0  ;;  %4985 = vmatprep.mubr.bf16.mxu1 %v1084_v33  ;;  %v1014_v39 = vpack.c.bf16 %v981_v35, %v980_v28  ;;  %v514_v40 = vpop.f32.mrf.mxu0  ;;  %v578_v41 = vpop.f32.mrf.mxu1  ;;  %5071 = vmatprep.subr.bf16.mxu1 %v5539_v61  ;;  %v982_v55 = vld [vmem:[#allocation2 + $0x30] sm:$0xff]  ;;  %v985_v23 = vld [vmem:[#allocation2 + $0x48] sm:$0xff]  ;;  %v5542_v33 = vld [vmem:[%s7042_s4 + $0x98] sm:$0xff]  }
 0x107   : > { %951 = vst [vmem:[#allocation2 + $0x6b] sm:$0xff] %v872_v31  ;;  %967 = vst [vmem:[#allocation2 + $0xeb] sm:$0xff] %v888_v34  ;;  %v623_v56 = vmax.f32 %v523_v0, 0.0  ;;  %v515_v43 = vadd.f32 %v5973_v16, %v514_v40  ;;  %v579_v44 = vadd.f32 %v5973_v16, %v578_v41  ;;  %5122 = vmatpush3.bf16.msra.mxu0 %v5937_v58  ;;  %v1055_v22 = vld [vmem:[#allocation2 + $0x49] sm:$0xff] }
 0x108   : > { %v639_v29 = vmax.f32 %v587_v17, 0.0  ;;  %v870_v14 = vmul.f32 %v5952_v3, %v618_v36  ;;  %v886_v45 = vmul.f32 %v5987_v48, %v634_v38  ;;  %5037 = vmatprep.mubr.bf16.mxu0 %v1014_v39  ;;  %v4944_v1 = vpop.f32.mrf.mxu0  ;;  %v4960_v24 = vpop.f32.mrf.mxu1  ;;  %v1053_v47 = vld [vmem:[#allocation2 + $0x39] sm:$0xff]  ;;  %5123 = vmatprep.subr.bf16.mxu0 %v5545_v2  ;;  %v1054_v63 = vld [vmem:[#allocation2 + $0x41] sm:$0xff] }
 0x109   : > { %v983_v49 = vld [vmem:[#allocation2 + $0x38] sm:$0xff]  ;;  %v875_v58 = vmul.f32 %v5962_v8, %v623_v56  ;;  %v621_v52 = vmax.f32 %v515_v43, 0.0  ;;  %v637_v54 = vmax.f32 %v579_v44, 0.0  ;;  %v984_v15 = vld [vmem:[#allocation2 + $0x40] sm:$0xff]  ;;  %5072 = vmatpush3.bf16.msra.mxu1 %v5539_v61  ;;  %v526_v3 = vadd.f32 %v4944_v1, %v5973_v16 }
 0x10a   : > { %v891_v51 = vmul.f32 %v834_v13, %v639_v29  ;;  %949 = vst [vmem:[#allocation2 + $0x5b] sm:$0xff] %v870_v14  ;;  %965 = vst [vmem:[#allocation2 + $0xdb] sm:$0xff] %v886_v45  ;;  %v590_v48 = vadd.f32 %v4960_v24, %v5973_v16  ;;  %v517_v57 = vpop.f32.mrf.mxu0  ;;  %v581_v10 = vpop.f32.mrf.mxu1  ;;  %v1085_v12 = vpack.c.bf16 %v1053_v47, %v1052_v46  ;;  %5073 = vmatprep.subr.bf16.mxu1 %v5540_v5  ;;  %v5541_v61 = vld [vmem:[%s7042_s4 + $0xa0] sm:$0xff]   ;;  %v5549_v14 = vld [vmem:[%s7042_s4 + $0xd8] sm:$0xff]  }
 0x10b   : > { %v1015_v18 = vpack.c.bf16 %v983_v49, %v982_v55  ;;  %954 = vst [vmem:[#allocation2 + $0x83] sm:$0xff] %v875_v58  ;;  %v873_v8 = vmul.f32 %v5958_v6, %v621_v52  ;;  %v889_v19 = vmul.f32 %v6005_v37, %v637_v54  ;;  %v518_v20 = vadd.f32 %v5973_v16, %v517_v57  ;;  %v5547_v37 = vld [vmem:[%s7042_s4 + $0xe0] sm:$0xff]   ;;  %v5544_v47 = vld [vmem:[%s7042_s4 + $0x90] sm:$0xff]   ;;  %v859_v49 = vpop.permute.xlu1 %858 }
 0x10c   : > { %970 = vst [vmem:[#allocation2 + $0x103] sm:$0xff] %v891_v51  ;;  %v582_v21 = vadd.f32 %v5973_v16, %v581_v10  ;;  %5124 = vmatpush3.bf16.msra.mxu0 %v5545_v2  ;;  %v624_v13 = vmax.f32 %v526_v3, 0.0  ;;  %v640_v25 = vmax.f32 %v590_v48, 0.0  ;;  %4986 = vmatmul.mubr.bf16.gmra.mxu1 %v1085_v12  ;;  %v4963_v60 = vpop.f32.mrf.mxu1  ;;  %v1086_v11 = vpack.c.bf16 %v1055_v22, %v1054_v63  ;;  %v1056_v35 = vld [vmem:[#allocation2 + $0x51] sm:$0xff]  ;;  %v5553_v22 = vld [vmem:[%s7042_s4 + $0xc0] sm:$0xff]  }
 0x10d   : > { %5038 = vmatmul.mubr.bf16.gmra.mxu0 %v1015_v18  ;;  %v1016_v6 = vpack.c.bf16 %v985_v23, %v984_v15  ;;  %952 = vst [vmem:[#allocation2 + $0x73] sm:$0xff] %v873_v8  ;;  %968 = vst [vmem:[#allocation2 + $0xf3] sm:$0xff] %v889_v19  ;;  %v622_v26 = vmax.f32 %v518_v20, 0.0  ;;  %v603_v28 = vadd.f32 %v4963_v60, %v5973_v16  ;;  %5074 = vmatpush3.bf16.msra.mxu1 %v5540_v5  ;;  %v986_v36 = vld [vmem:[#allocation2 + $0x50] sm:$0xff]  ;;  %v5552_v20 = vld [vmem:[%s7042_s4 + $0xc8] sm:$0xff]  }
 0x10e   : > { %v638_v27 = vmax.f32 %v582_v21, 0.0  ;;  %5125 = vmatprep.subr.bf16.mxu0 %v6047_v62  ;;  %v876_v59 = vmul.f32 %v5964_v9, %v624_v13  ;;  %v892_v30 = vmul.f32 %v6039_v42, %v640_v25  ;;  %4989 = vmatprep.mubr.bf16.mxu1 %v1086_v11  ;;  %v594_v32 = vpop.f32.mrf.mxu1  ;;  %v854_v9 = vpop.permute.xlu0 %853  ;;  %v1059_v38 = vld [vmem:[#allocation2 + $0x69] sm:$0xff]  ;;  %v5551_v21 = vld [vmem:[%s7042_s4 + $0x80] sm:$0xff]   ;;  %v6107_v13 = vld [vmem:[%s7042_s4 + $0x138] sm:$0xff]  }
 0x10f   : > { %5041 = vmatprep.mubr.bf16.mxu0 %v1016_v6  ;;  %v6074_v2 = vmul.f32 %v5960_v7, %v622_v26  ;;  %v643_v34 = vmax.f32 %v603_v28, 0.0  ;;  %v595_v0 = vadd.f32 %v5973_v16, %v594_v32  ;;  %5075 = vmatprep.subr.bf16.mxu1 %v5541_v61  ;;  %v5550_v58 = vld [vmem:[%s7042_s4 + $0xd0] sm:$0xff]   ;;  %v1066_v25 = vld [vmem:[#allocation2 + $0xa1] sm:$0xff]  ;;  %v1065_v11 = vld [vmem:[#allocation2 + $0x99] sm:$0xff] }
 0x110   : > { %v890_v31 = vmul.f32 %v6015_v53, %v638_v27  ;;  %5126 = vmatpush3.bf16.msra.mxu0 %v6047_v62  ;;  %955 = vst [vmem:[#allocation2 + $0x8b] sm:$0xff] %v876_v59  ;;  %971 = vst [vmem:[#allocation2 + $0x10b] sm:$0xff] %v892_v30  ;;  %v4964_v17 = vpop.f32.mrf.mxu1  ;;  %v989_v62 = vld [vmem:[#allocation2 + $0x68] sm:$0xff]  ;;  %v996_v60 = vld [vmem:[#allocation2 + $0xa0] sm:$0xff] }
 0x111   : > { %5127 = vmatprep.subr.bf16.mxu0 %v5547_v37  ;;  %953 = vst [vmem:[#allocation2 + $0x7b] sm:$0xff] %v6074_v2  ;;  %v895_v7 = vmul.f32 %v854_v9, %v643_v34  ;;  %v641_v39 = vmax.f32 %v595_v0, 0.0  ;;  %v606_v53 = vadd.f32 %v4964_v17, %v5973_v16  ;;  %v1057_v40 = vld [vmem:[#allocation2 + $0x59] sm:$0xff]  ;;  %v1058_v5 = vld [vmem:[#allocation2 + $0x61] sm:$0xff]  ;;  %5076 = vmatpush3.bf16.msra.mxu1 %v5541_v61  ;;  %v1067_v27 = vld [vmem:[#allocation2 + $0xa9] sm:$0xff] }
 0x112   : > { %969 = vst [vmem:[#allocation2 + $0xfb] sm:$0xff] %v890_v31  ;;  %v987_v41 = vld [vmem:[#allocation2 + $0x58] sm:$0xff]  ;;  %v597_v42 = vpop.f32.mrf.mxu1  ;;  %v1087_v56 = vpack.c.bf16 %v1057_v40, %v1056_v35  ;;  %v1088_v43 = vpack.c.bf16 %v1059_v38, %v1058_v5  ;;  %v988_v44 = vld [vmem:[#allocation2 + $0x60] sm:$0xff]  ;;  %5077 = vmatprep.subr.bf16.mxu1 %v5542_v33  ;;  %v997_v28 = vld [vmem:[#allocation2 + $0xa8] sm:$0xff]  ;;  %v1092_v59 = vpack.c.bf16 %v1067_v27, %v1066_v25 }
 0x113   : > { %v1017_v29 = vpack.c.bf16 %v987_v41, %v986_v36  ;;  %974 = vst [vmem:[#allocation2 + $0x123] sm:$0xff] %v895_v7  ;;  %v893_v45 = vmul.f32 %v6051_v50, %v641_v39  ;;  %v644_v1 = vmax.f32 %v606_v53, 0.0  ;;  %v598_v24 = vadd.f32 %v5973_v16, %v597_v42  ;;  %v5548_v16 = vld [vmem:[%s7042_s4 + $0x88] sm:$0xff]   ;;  %v995_v6 = vld [vmem:[#allocation2 + $0x98] sm:$0xff]  ;;  %v1000_v34 = vld [vmem:[#allocation2 + $0xc0] sm:$0xff] }
 0x114   : > { %v1018_v46 = vpack.c.bf16 %v989_v62, %v988_v44  ;;  %5128 = vmatpush3.bf16.msra.mxu0 %v5547_v37  ;;  %4990 = vmatmul.mubr.bf16.gmra.mxu1 %v1087_v56  ;;  %v1060_v54 = vld [vmem:[#allocation2 + $0x71] sm:$0xff]  ;;  %v1022_v30 = vpack.c.bf16 %v997_v28, %v996_v60  ;;  %v1069_v32 = vld [vmem:[#allocation2 + $0xb9] sm:$0xff]  ;;  %v1070_v31 = vld [vmem:[#allocation2 + $0xc1] sm:$0xff] }
 0x115   : > { %5042 = vmatmul.mubr.bf16.gmra.mxu0 %v1017_v29  ;;  %972 = vst [vmem:[#allocation2 + $0x113] sm:$0xff] %v893_v45  ;;  %v896_v51 = vmul.f32 %v859_v49, %v644_v1  ;;  %v642_v52 = vmax.f32 %v598_v24, 0.0  ;;  %4993 = vmatprep.mubr.bf16.mxu1 %v1088_v43  ;;  %v990_v55 = vld [vmem:[#allocation2 + $0x70] sm:$0xff]  ;;  %v1001_v38 = vld [vmem:[#allocation2 + $0xc8] sm:$0xff]  ;;  %v1073_v53 = vld [vmem:[#allocation2 + $0xd9] sm:$0xff] }
 0x116   : > { %5045 = vmatprep.mubr.bf16.mxu0 %v1018_v46  ;;  %5078 = vmatpush3.bf16.msra.mxu1 %v5542_v33  ;;  %v999_v33 = vld [vmem:[#allocation2 + $0xb8] sm:$0xff]  ;;  %v998_v9 = vld [vmem:[#allocation2 + $0xb0] sm:$0xff]  ;;  %v1024_v39 = vpack.c.bf16 %v1001_v38, %v1000_v34  ;;  %v1074_v41 = vld [vmem:[#allocation2 + $0xe1] sm:$0xff] }
 0x117   : > { %5129 = vmatprep.subr.bf16.mxu0 %v5549_v14  ;;  %975 = vst [vmem:[#allocation2 + $0x12b] sm:$0xff] %v896_v51  ;;  %v894_v50 = vmul.f32 %v849_v4, %v642_v52  ;;  %v1063_v63 = vld [vmem:[#allocation2 + $0x89] sm:$0xff]  ;;  %5079 = vmatprep.subr.bf16.mxu1 %v5544_v47  ;;  %v1064_v23 = vld [vmem:[#allocation2 + $0x91] sm:$0xff]  ;;  %v1023_v35 = vpack.c.bf16 %v999_v33, %v998_v9  ;;  %v1004_v5 = vld [vmem:[#allocation2 + $0xe0] sm:$0xff] }
 0x118   : > { %5130 = vmatpush3.bf16.msra.mxu0 %v5549_v14  ;;  %v1061_v15 = vld [vmem:[#allocation2 + $0x79] sm:$0xff]  ;;  %v1062_v48 = vld [vmem:[#allocation2 + $0x81] sm:$0xff]  ;;  %v994_v61 = vld [vmem:[#allocation2 + $0x90] sm:$0xff]  ;;  %v1091_v37 = vpack.c.bf16 %v1065_v11, %v1064_v23 }
 0x119   : > { %v991_v3 = vld [vmem:[#allocation2 + $0x78] sm:$0xff]  ;;  %5131 = vmatprep.subr.bf16.mxu0 %v5550_v58  ;;  %973 = vst [vmem:[#allocation2 + $0x11b] sm:$0xff] %v894_v50  ;;  %v1089_v57 = vpack.c.bf16 %v1061_v15, %v1060_v54  ;;  %v1090_v12 = vpack.c.bf16 %v1063_v63, %v1062_v48  ;;  %v992_v18 = vld [vmem:[#allocation2 + $0x80] sm:$0xff]  ;;  %v993_v8 = vld [vmem:[#allocation2 + $0x88] sm:$0xff]  ;;  %v1021_v26 = vpack.c.bf16 %v995_v6, %v994_v61 }
 0x11a   : > { %v1019_v10 = vpack.c.bf16 %v991_v3, %v990_v55  ;;  %v1020_v19 = vpack.c.bf16 %v993_v8, %v992_v18  ;;  %5080 = vmatpush3.bf16.msra.mxu1 %v5544_v47  ;;  %v6112_v4 = vld [vmem:[%s7042_s4 + $0x178] sm:$0xff]   ;;  %v1071_v36 = vld [vmem:[#allocation2 + $0xc9] sm:$0xff]  ;;  %v1078_v46 = vld [vmem:[#allocation2 + $0x101] sm:$0xff] }
 0x11b   : > { %5081 = vmatprep.subr.bf16.mxu1 %v5548_v16  ;;  %v1068_v0 = vld [vmem:[#allocation2 + $0xb1] sm:$0xff]  ;;  %v1094_v7 = vpack.c.bf16 %v1071_v36, %v1070_v31  ;;  %v1075_v44 = vld [vmem:[#allocation2 + $0xe9] sm:$0xff]  ;;  %v1077_v1 = vld [vmem:[#allocation2 + $0xf9] sm:$0xff] }
 0x11c   : > { %5132 = vmatpush3.bf16.msra.mxu0 %v5550_v58  ;;  %4994 = vmatmul.mubr.bf16.gmra.mxu1 %v1089_v57  ;;  %v1093_v17 = vpack.c.bf16 %v1069_v32, %v1068_v0  ;;  %v1003_v40 = vld [vmem:[#allocation2 + $0xd8] sm:$0xff]  ;;  %v1002_v56 = vld [vmem:[#allocation2 + $0xd0] sm:$0xff]  ;;  %v1005_v62 = vld [vmem:[#allocation2 + $0xe8] sm:$0xff]  ;;  %v1096_v14 = vpack.c.bf16 %v1075_v44, %v1074_v41 }
 0x11d   : > { %5046 = vmatmul.mubr.bf16.gmra.mxu0 %v1019_v10  ;;  %4997 = vmatprep.mubr.bf16.mxu1 %v1090_v12  ;;  %v1072_v42 = vld [vmem:[#allocation2 + $0xd1] sm:$0xff]  ;;  %v1025_v43 = vpack.c.bf16 %v1003_v40, %v1002_v56  ;;  %v1026_v45 = vpack.c.bf16 %v1005_v62, %v1004_v5  ;;  %v1008_v47 = vld [vmem:[#allocation2 + $0x100] sm:$0xff]  ;;  %v1009_v50 = vld [vmem:[#allocation2 + $0x108] sm:$0xff] }
 0x11e   : > { %5049 = vmatprep.mubr.bf16.mxu0 %v1020_v19  ;;  %5082 = vmatpush3.bf16.msra.mxu1 %v5548_v16  ;;  %v1095_v29 = vpack.c.bf16 %v1073_v53, %v1072_v42  ;;  %v1007_v24 = vld [vmem:[#allocation2 + $0xf8] sm:$0xff]  ;;  %v1006_v58 = vld [vmem:[#allocation2 + $0xf0] sm:$0xff]  ;;  %v1028_v55 = vpack.c.bf16 %v1009_v50, %v1008_v47  ;;  %v1567_v63 = vld [vmem:[#allocation2 + $0x2] sm:$0xff] }
 0x11f   : > { %5133 = vmatprep.subr.bf16.mxu0 %v5552_v20  ;;  %5083 = vmatprep.subr.bf16.mxu1 %v5551_v21  ;;  %v1076_v49 = vld [vmem:[#allocation2 + $0xf1] sm:$0xff]  ;;  %v1027_v52 = vpack.c.bf16 %v1007_v24, %v1006_v58  ;;  %v1079_v16 = vld [vmem:[#allocation2 + $0x109] sm:$0xff]  ;;  %v1900_v57 = vld [vmem:[#allocation2 + $0x1a] sm:$0xff] }
 0x120   : > { %5134 = vmatpush3.bf16.msra.mxu0 %v5552_v20  ;;  %v1097_v51 = vpack.c.bf16 %v1077_v1, %v1076_v49  ;;  %v1098_v54 = vpack.c.bf16 %v1079_v16, %v1078_v46  ;;  %v1568_v15 = vld [vmem:[#allocation2 + $0xa] sm:$0xff]  ;;  %v1081_v3 = vld [vmem:[#allocation2 + $0x119] sm:$0xff]  ;;  %v1905_v27 = vld [vmem:[#allocation2 + $0x42] sm:$0xff] }
 0x121   : > { %5135 = vmatprep.subr.bf16.mxu0 %v5553_v22  ;;  %v1011_v48 = vld [vmem:[#allocation2 + $0x118] sm:$0xff]  ;;  %v1010_v12 = vld [vmem:[#allocation2 + $0x110] sm:$0xff]  ;;  %v1603_v18 = vpack.c.bf16 %v1568_v15, %v1567_v63  ;;  %v5557_v31 = vld [vmem:[%s7042_s4 + $0x120] sm:$0xff]  }
 0x122   : > { %5084 = vmatpush3.bf16.msra.mxu1 %v5551_v21  ;;  %v1080_v10 = vld [vmem:[#allocation2 + $0x111] sm:$0xff]  ;;  %v1029_v19 = vpack.c.bf16 %v1011_v48, %v1010_v12  ;;  %v1904_v61 = vld [vmem:[#allocation2 + $0x3a] sm:$0xff]  ;;  %v1909_v34 = vld [vmem:[#allocation2 + $0x62] sm:$0xff] }
 0x123   : > { %5173 = vmatprep.subr.bf16.mxu1 %v6107_v13  ;;  %v1099_v8 = vpack.c.bf16 %v1081_v3, %v1080_v10  ;;  %v1899_v20 = vld [vmem:[#allocation2 + $0x12] sm:$0xff]  ;;  %v1902_v23 = vld [vmem:[#allocation2 + $0x2a] sm:$0xff]  ;;  %v1908_v28 = vld [vmem:[#allocation2 + $0x5a] sm:$0xff] }
 0x124   : > { %5136 = vmatpush3.bf16.msra.mxu0 %v5553_v22  ;;  %4998 = vmatmul.mubr.bf16.gmra.mxu1 %v1091_v37  ;;  %v1935_v21 = vpack.c.bf16 %v1900_v57, %v1899_v20  ;;  %v1901_v22 = vld [vmem:[#allocation2 + $0x22] sm:$0xff]  ;;  %v5555_v60 = vld [vmem:[%s7042_s4 + $0x130] sm:$0xff]   ;;  %v5558_v0 = vld [vmem:[%s7042_s4 + $0x118] sm:$0xff]  }
 0x125   : > { %5050 = vmatmul.mubr.bf16.gmra.mxu0 %v1021_v26  ;;  %5001 = vmatprep.mubr.bf16.mxu1 %v1092_v59  ;;  %v1936_v25 = vpack.c.bf16 %v1902_v23, %v1901_v22  ;;  %v1903_v11 = vld [vmem:[#allocation2 + $0x32] sm:$0xff]  ;;  %v5556_v26 = vld [vmem:[%s7042_s4 + $0x128] sm:$0xff]   ;;  %v1912_v9 = vld [vmem:[#allocation2 + $0x7a] sm:$0xff] }
 0x126   : > { %5053 = vmatprep.mubr.bf16.mxu0 %v1022_v30  ;;  %5225 = vmatprep.subr.bf16.mxu0 %v6112_v4  ;;  %v1937_v6 = vpack.c.bf16 %v1904_v61, %v1903_v11  ;;  %v5561_v37 = vld [vmem:[%s7042_s4 + $0x170] sm:$0xff]   ;;  %v5565_v38 = vld [vmem:[%s7042_s4 + $0x158] sm:$0xff]   ;;  %v1913_v40 = vld [vmem:[#allocation2 + $0x82] sm:$0xff] }
 0x127   : > { %v1906_v59 = vld [vmem:[#allocation2 + $0x4a] sm:$0xff]  ;;  %v1907_v32 = vld [vmem:[#allocation2 + $0x52] sm:$0xff]  ;;  %v5567_v62 = vld [vmem:[%s7042_s4 + $0x100] sm:$0xff]  }
 0x128   : > { %v1938_v30 = vpack.c.bf16 %v1906_v59, %v1905_v27  ;;  %v1939_v33 = vpack.c.bf16 %v1908_v28, %v1907_v32  ;;  %v1911_v36 = vld [vmem:[#allocation2 + $0x72] sm:$0xff]  ;;  %v5564_v41 = vld [vmem:[%s7042_s4 + $0x108] sm:$0xff]   ;;  %v1920_v24 = vld [vmem:[#allocation2 + $0xba] sm:$0xff] }
 0x129   : > { %v5566_v53 = vld [vmem:[%s7042_s4 + $0x150] sm:$0xff]   ;;  %v6163_v1 = vld [vmem:[%s7042_s4 + $0x1b8] sm:$0xff]   ;;  %v1925_v15 = vld [vmem:[#allocation2 + $0xe2] sm:$0xff] }
 0x12a   : > { %v1915_v5 = vld [vmem:[#allocation2 + $0x92] sm:$0xff]  ;;  %v1914_v42 = vld [vmem:[#allocation2 + $0x8a] sm:$0xff]  ;;  %v1924_v16 = vld [vmem:[#allocation2 + $0xda] sm:$0xff] }
 0x12b   : > { %v1942_v56 = vpack.c.bf16 %v1914_v42, %v1913_v40  ;;  %v1918_v46 = vld [vmem:[#allocation2 + $0xaa] sm:$0xff]  ;;  %v1919_v49 = vld [vmem:[#allocation2 + $0xb2] sm:$0xff]  ;;  %v1928_v3 = vld [vmem:[#allocation2 + $0xfa] sm:$0xff] }
 0x12c   : > { %5002 = vmatmul.mubr.bf16.gmra.mxu1 %v1093_v17  ;;  %v1910_v17 = vld [vmem:[#allocation2 + $0x6a] sm:$0xff]  ;;  %v6168_v58 = vld [vmem:[%s7042_s4 + $0x1f8] sm:$0xff]   ;;  %v1933_v23 = vld [vmem:[#allocation2 + $0x122] sm:$0xff] }
 0x12d   : > { %5054 = vmatmul.mubr.bf16.gmra.mxu0 %v1023_v35  ;;  %5005 = vmatprep.mubr.bf16.mxu1 %v1094_v7  ;;  %v1940_v35 = vpack.c.bf16 %v1910_v17, %v1909_v34  ;;  %v1941_v7 = vpack.c.bf16 %v1912_v9, %v1911_v36  ;;  %v1922_v50 = vld [vmem:[#allocation2 + $0xca] sm:$0xff]  ;;  %v1927_v10 = vld [vmem:[#allocation2 + $0xf2] sm:$0xff]  ;;  %v2232_v61 = vld [vmem:[#allocation2 + $0x1b] sm:$0xff] }
 0x12e   : > { %5057 = vmatprep.mubr.bf16.mxu0 %v1024_v39  ;;  %v5560_v39 = vld [vmem:[%s7042_s4 + $0x110] sm:$0xff]   ;;  %v1949_v12 = vpack.c.bf16 %v1928_v3, %v1927_v10  ;;  %v2236_v32 = vld [vmem:[#allocation2 + $0x3b] sm:$0xff]  ;;  %v2569_v42 = vld [vmem:[#allocation2 + $0x44] sm:$0xff] }
 0x12f   : > { %v1926_v48 = vld [vmem:[#allocation2 + $0xea] sm:$0xff]  ;;  %v2571_v40 = vld [vmem:[#allocation2 + $0x54] sm:$0xff] }
 0x130   : > { %v1948_v57 = vpack.c.bf16 %v1926_v48, %v1925_v15  ;;  %v1934_v11 = vld [vmem:[#allocation2 + $0x12a] sm:$0xff] }
 0x131   : > { %v2234_v28 = vld [vmem:[#allocation2 + $0x2b] sm:$0xff] }
 0x132   : > { %v2566_v59 = vld [vmem:[#allocation2 + $0x2c] sm:$0xff] }
 0x133   : > { %v5571_v9 = vld [vmem:[%s7042_s4 + $0x1b0] sm:$0xff]  }
 0x134   : > { %5006 = vmatmul.mubr.bf16.gmra.mxu1 %v1095_v29  ;;  %v1916_v29 = vld [vmem:[#allocation2 + $0x9a] sm:$0xff]  ;;  %v5577_v36 = vld [vmem:[%s7042_s4 + $0x1f0] sm:$0xff]  }
 0x135   : > { %5058 = vmatmul.mubr.bf16.gmra.mxu0 %v1025_v43  ;;  %5009 = vmatprep.mubr.bf16.mxu1 %v1096_v14  ;;  %v5568_v43 = vld [vmem:[%s7042_s4 + $0x148] sm:$0xff]   ;;  %v1943_v44 = vpack.c.bf16 %v1916_v29, %v1915_v5  ;;  %v5569_v14 = vld [vmem:[%s7042_s4 + $0x140] sm:$0xff]   ;;  %v5576_v3 = vld [vmem:[%s7042_s4 + $0x190] sm:$0xff]  }
 0x136   : > { %5061 = vmatprep.mubr.bf16.mxu0 %v1026_v45  ;;  %v1917_v45 = vld [vmem:[#allocation2 + $0xa2] sm:$0xff]  ;;  %v5582_v48 = vld [vmem:[%s7042_s4 + $0x1d0] sm:$0xff]  }
 0x137   : > { %v1944_v47 = vpack.c.bf16 %v1918_v46, %v1917_v45  ;;  %v2237_v5 = vld [vmem:[#allocation2 + $0x43] sm:$0xff]  ;;  %v2574_v46 = vld [vmem:[#allocation2 + $0x6c] sm:$0xff] }
 0x138   : > { %v5573_v45 = vld [vmem:[%s7042_s4 + $0x1a0] sm:$0xff]   ;;  %v2578_v10 = vld [vmem:[#allocation2 + $0x8c] sm:$0xff] }
 0x13c   : > { %5010 = vmatmul.mubr.bf16.gmra.mxu1 %v1097_v51  ;;  %v1945_v51 = vpack.c.bf16 %v1920_v24, %v1919_v49  ;;  %v2242_v24 = vld [vmem:[#allocation2 + $0x6b] sm:$0xff]  ;;  %v2243_v49 = vld [vmem:[#allocation2 + $0x73] sm:$0xff] }
 0x13d   : > { %5062 = vmatmul.mubr.bf16.gmra.mxu0 %v1027_v52  ;;  %5013 = vmatprep.mubr.bf16.mxu1 %v1098_v54  ;;  %v1921_v52 = vld [vmem:[#allocation2 + $0xc2] sm:$0xff] }
 0x13e   : > { %5065 = vmatprep.mubr.bf16.mxu0 %v1028_v55  ;;  %v1946_v54 = vpack.c.bf16 %v1922_v50, %v1921_v52  ;;  %v1923_v55 = vld [vmem:[#allocation2 + $0xd2] sm:$0xff]  ;;  %v2241_v52 = vld [vmem:[#allocation2 + $0x63] sm:$0xff] }
 0x13f   : > { %v1947_v63 = vpack.c.bf16 %v1924_v16, %v1923_v55  ;;  %v2573_v16 = vld [vmem:[#allocation2 + $0x64] sm:$0xff]  ;;  %v2272_v50 = vpack.c.bf16 %v2242_v24, %v2241_v52  ;;  %v5581_v55 = vld [vmem:[%s7042_s4 + $0x1d8] sm:$0xff]  }
 0x140   : > { %v2592_v24 = vld [vmem:[#allocation2 + $0xfc] sm:$0xff] }
 0x144   : > { %5014 = vmatmul.mubr.bf16.gmra.mxu1 %v1099_v8  ;;  %v1932_v8 = vld [vmem:[#allocation2 + $0x11a] sm:$0xff] }
 0x145   : > { %5066 = vmatmul.mubr.bf16.gmra.mxu0 %v1029_v19  ;;  %5085 = vmatprep.mubr.bf16.mxu1 %v1603_v18  ;;  %v1929_v18 = vld [vmem:[#allocation2 + $0x102] sm:$0xff]  ;;  %v1930_v19 = vld [vmem:[#allocation2 + $0x10a] sm:$0xff] }
 0x146   : > { %5137 = vmatprep.mubr.bf16.mxu0 %v1935_v21  ;;  %v1950_v20 = vpack.c.bf16 %v1930_v19, %v1929_v18  ;;  %v2248_v18 = vld [vmem:[#allocation2 + $0x9b] sm:$0xff] }
 0x147   : > { %v2580_v19 = vld [vmem:[#allocation2 + $0x9c] sm:$0xff] }
 0x14c   : > { %5086 = vmatmul.mubr.bf16.vlgmr.msra.gmra.mxu1 %v1935_v21  ;;  %v1931_v21 = vld [vmem:[#allocation2 + $0x112] sm:$0xff] }
 0x14d   : > { %5138 = vmatmul.mubr.bf16.vlgmr.msra.gmra.mxu0 %v1936_v25  ;;  %5174 = vmatpush3.bf16.msra.mxu1 %v6107_v13  ;;  %v5562_v13 = vld [vmem:[%s7042_s4 + $0x168] sm:$0xff]   ;;  %v1951_v22 = vpack.c.bf16 %v1932_v8, %v1931_v21  ;;  %v2579_v8 = vld [vmem:[#allocation2 + $0x94] sm:$0xff] }
 0x14e   : > { %5089 = vmatprep.mubr.bf16.mxu1 %v1936_v25  ;;  %5141 = vmatprep.mubr.bf16.mxu0 %v1937_v6  ;;  %v2563_v25 = vld [vmem:[#allocation2 + $0x14] sm:$0xff] }
 0x14f   : > { %5175 = vmatprep.subr.bf16.mxu1 %v5555_v60  ;;  %5226 = vmatpush3.bf16.msra.mxu0 %v6112_v4  ;;  %v5563_v4 = vld [vmem:[%s7042_s4 + $0x160] sm:$0xff]  }
 0x150   : > { %5227 = vmatprep.subr.bf16.mxu0 %v5561_v37 }
 0x151   : > { %5176 = vmatpush3.bf16.msra.mxu1 %v5555_v60  ;;  %v2564_v60 = vld [vmem:[#allocation2 + $0x1c] sm:$0xff] }
 0x152   : > { %5177 = vmatprep.subr.bf16.mxu1 %v5556_v26  ;;  %v2599_v27 = vpack.c.bf16 %v2564_v60, %v2563_v25  ;;  %v6231_v60 = vpack.c.bf16 %v2580_v19, %v2579_v8  ;;  %v2264_v8 = vld [vmem:[#allocation2 + $0x11b] sm:$0xff] }
 0x153   : > { %5228 = vmatpush3.bf16.msra.mxu0 %v5561_v37  ;;  %v2231_v37 = vld [vmem:[#allocation2 + $0x13] sm:$0xff] }
 0x154   : > { %5090 = vmatmul.mubr.bf16.gmra.mxu1 %v1937_v6  ;;  %5229 = vmatprep.subr.bf16.mxu0 %v5562_v13  ;;  %v1952_v6 = vpack.c.bf16 %v1934_v11, %v1933_v23  ;;  %v2247_v23 = vld [vmem:[#allocation2 + $0x93] sm:$0xff]  ;;  %v5583_v11 = vld [vmem:[%s7042_s4 + $0x180] sm:$0xff]  }
 0x155   : > { %5142 = vmatmul.mubr.bf16.gmra.mxu0 %v1938_v30  ;;  %5093 = vmatprep.mubr.bf16.mxu1 %v1938_v30  ;;  %v2233_v30 = vld [vmem:[#allocation2 + $0x23] sm:$0xff]  ;;  %v2275_v25 = vpack.c.bf16 %v2248_v18, %v2247_v23  ;;  %v2595_v19 = vld [vmem:[#allocation2 + $0x114] sm:$0xff] }
 0x156   : > { %5145 = vmatprep.mubr.bf16.mxu0 %v1939_v33  ;;  %5178 = vmatpush3.bf16.msra.mxu1 %v5556_v26  ;;  %v2267_v26 = vpack.c.bf16 %v2232_v61, %v2231_v37  ;;  %v5584_v61 = vld [vmem:[%s7042_s4 + $0x1c8] sm:$0xff]  }
 0x157   : > { %5179 = vmatprep.subr.bf16.mxu1 %v5557_v31  ;;  %5230 = vmatpush3.bf16.msra.mxu0 %v5562_v13  ;;  %v2565_v13 = vld [vmem:[#allocation2 + $0x24] sm:$0xff] }
 0x158   : > { %5231 = vmatprep.subr.bf16.mxu0 %v5563_v4  ;;  %v6172_v34 = vpack.c.bf16 %v2566_v59, %v2565_v13  ;;  %v2250_v37 = vld [vmem:[#allocation2 + $0xab] sm:$0xff]  ;;  %v2583_v59 = vld [vmem:[#allocation2 + $0xb4] sm:$0xff]  ;;  %v2261_v23 = vld [vmem:[#allocation2 + $0x103] sm:$0xff] }
 0x159   : > { %v2581_v13 = vld [vmem:[#allocation2 + $0xa4] sm:$0xff] }
 0x15a   : > { %5180 = vmatpush3.bf16.msra.mxu1 %v5557_v31  ;;  %v2568_v31 = vld [vmem:[#allocation2 + $0x3c] sm:$0xff] }
 0x15b   : > { %5181 = vmatprep.subr.bf16.mxu1 %v5558_v0  ;;  %5232 = vmatpush3.bf16.msra.mxu0 %v5563_v4  ;;  %v2268_v4 = vpack.c.bf16 %v2234_v28, %v2233_v30  ;;  %v2252_v28 = vld [vmem:[#allocation2 + $0xbb] sm:$0xff] }
 0x15c   : > { %5094 = vmatmul.mubr.bf16.gmra.mxu1 %v1939_v33  ;;  %5233 = vmatprep.subr.bf16.mxu0 %v5565_v38  ;;  %v2567_v33 = vld [vmem:[#allocation2 + $0x34] sm:$0xff]  ;;  %v2584_v30 = vld [vmem:[#allocation2 + $0xbc] sm:$0xff] }
 0x15d   : > { %5146 = vmatmul.mubr.bf16.gmra.mxu0 %v1940_v35  ;;  %5097 = vmatprep.mubr.bf16.mxu1 %v1940_v35  ;;  %v6178_v35 = vpack.c.bf16 %v2568_v31, %v2567_v33 }
 0x15e   : > { %5149 = vmatprep.mubr.bf16.mxu0 %v1941_v7  ;;  %5182 = vmatpush3.bf16.msra.mxu1 %v5558_v0  ;;  %v2235_v0 = vld [vmem:[#allocation2 + $0x33] sm:$0xff] }
 0x15f   : > { %5183 = vmatprep.subr.bf16.mxu1 %v5560_v39  ;;  %5234 = vmatpush3.bf16.msra.mxu0 %v5565_v38  ;;  %v2269_v17 = vpack.c.bf16 %v2236_v32, %v2235_v0  ;;  %v5572_v38 = vld [vmem:[%s7042_s4 + $0x1a8] sm:$0xff]  }
 0x160   : > { %5235 = vmatprep.subr.bf16.mxu0 %v5566_v53  ;;  %v2249_v32 = vld [vmem:[#allocation2 + $0xa3] sm:$0xff] }
 0x161   : > { %v2276_v33 = vpack.c.bf16 %v2250_v37, %v2249_v32 }
 0x162   : > { %5184 = vmatpush3.bf16.msra.mxu1 %v5560_v39  ;;  %v2570_v39 = vld [vmem:[#allocation2 + $0x4c] sm:$0xff] }
 0x163   : > { %5185 = vmatprep.subr.bf16.mxu1 %v5564_v41  ;;  %5236 = vmatpush3.bf16.msra.mxu0 %v5566_v53  ;;  %v2240_v53 = vld [vmem:[#allocation2 + $0x5b] sm:$0xff]  ;;  %v6189_v29 = vpack.c.bf16 %v2570_v39, %v2569_v42  ;;  %v2255_v42 = vld [vmem:[#allocation2 + $0xd3] sm:$0xff] }
 0x164   : > { %5098 = vmatmul.mubr.bf16.gmra.mxu1 %v1941_v7  ;;  %5237 = vmatprep.subr.bf16.mxu0 %v5568_v43  ;;  %v2238_v7 = vld [vmem:[#allocation2 + $0x4b] sm:$0xff]  ;;  %v2588_v39 = vld [vmem:[#allocation2 + $0xdc] sm:$0xff] }
 0x165   : > { %5150 = vmatmul.mubr.bf16.gmra.mxu0 %v1942_v56  ;;  %5101 = vmatprep.mubr.bf16.mxu1 %v1942_v56  ;;  %v2270_v56 = vpack.c.bf16 %v2238_v7, %v2237_v5  ;;  %v2587_v7 = vld [vmem:[#allocation2 + $0xd4] sm:$0xff] }
 0x166   : > { %5153 = vmatprep.mubr.bf16.mxu0 %v1943_v44  ;;  %5186 = vmatpush3.bf16.msra.mxu1 %v5564_v41  ;;  %v2572_v41 = vld [vmem:[#allocation2 + $0x5c] sm:$0xff] }
 0x167   : > { %5187 = vmatprep.subr.bf16.mxu1 %v5567_v62  ;;  %5238 = vmatpush3.bf16.msra.mxu0 %v5568_v43  ;;  %v2239_v43 = vld [vmem:[#allocation2 + $0x53] sm:$0xff] }
 0x168   : > { %5239 = vmatprep.subr.bf16.mxu0 %v5569_v14 }
 0x16a   : > { %5188 = vmatpush3.bf16.msra.mxu1 %v5567_v62  ;;  %v2271_v62 = vpack.c.bf16 %v2240_v53, %v2239_v43  ;;  %v2253_v53 = vld [vmem:[#allocation2 + $0xc3] sm:$0xff]  ;;  %v6255_v43 = vpack.c.bf16 %v2588_v39, %v2587_v7  ;;  %v2598_v7 = vld [vmem:[#allocation2 + $0x12c] sm:$0xff] }
 0x16b   : > { %5240 = vmatpush3.bf16.msra.mxu0 %v5569_v14  ;;  %5277 = vmatprep.subr.bf16.mxu1 %v6163_v1  ;;  %v6194_v14 = vpack.c.bf16 %v2572_v41, %v2571_v40  ;;  %v2585_v40 = vld [vmem:[#allocation2 + $0xc4] sm:$0xff] }
 0x16c   : > { %5102 = vmatmul.mubr.bf16.gmra.mxu1 %v1943_v44  ;;  %5329 = vmatprep.subr.bf16.mxu0 %v6168_v58  ;;  %v5578_v44 = vld [vmem:[%s7042_s4 + $0x1e8] sm:$0xff]  }
 0x16d   : > { %5154 = vmatmul.mubr.bf16.gmra.mxu0 %v1944_v47  ;;  %5105 = vmatprep.mubr.bf16.mxu1 %v1944_v47  ;;  %v5574_v47 = vld [vmem:[%s7042_s4 + $0x198] sm:$0xff]  }
 0x16e   : > { %5157 = vmatprep.mubr.bf16.mxu0 %v1945_v51 }
 0x174   : > { %5106 = vmatmul.mubr.bf16.gmra.mxu1 %v1945_v51  ;;  %v2576_v51 = vld [vmem:[#allocation2 + $0x7c] sm:$0xff] }
 0x175   : > { %5158 = vmatmul.mubr.bf16.gmra.mxu0 %v1946_v54  ;;  %5109 = vmatprep.mubr.bf16.mxu1 %v1946_v54  ;;  %v6207_v54 = vpack.c.bf16 %v2574_v46, %v2573_v16  ;;  %v2257_v46 = vld [vmem:[#allocation2 + $0xe3] sm:$0xff] }
 0x176   : > { %5161 = vmatprep.mubr.bf16.mxu0 %v1947_v63 }
 0x17c   : > { %5110 = vmatmul.mubr.bf16.gmra.mxu1 %v1947_v63  ;;  %v2273_v63 = vpack.c.bf16 %v6074_v2, %v2243_v49  ;;  %v2577_v2 = vld [vmem:[#allocation2 + $0x84] sm:$0xff] }
 0x17d   : > { %5162 = vmatmul.mubr.bf16.gmra.mxu0 %v1948_v57  ;;  %5113 = vmatprep.mubr.bf16.mxu1 %v1948_v57  ;;  %v2246_v57 = vld [vmem:[#allocation2 + $0x8b] sm:$0xff] }
 0x17e   : > { %5165 = vmatprep.mubr.bf16.mxu0 %v1949_v12 }
 0x184   : > { %5114 = vmatmul.mubr.bf16.gmra.mxu1 %v1949_v12  ;;  %v5580_v12 = vld [vmem:[%s7042_s4 + $0x188] sm:$0xff]  }
 0x185   : > { %5166 = vmatmul.mubr.bf16.gmra.mxu0 %v1950_v20  ;;  %5117 = vmatprep.mubr.bf16.mxu1 %v1950_v20  ;;  %v2245_v20 = vld [vmem:[#allocation2 + $0x83] sm:$0xff] }
 0x186   : > { %5169 = vmatprep.mubr.bf16.mxu0 %v1951_v22  ;;  %v2274_v21 = vpack.c.bf16 %v2246_v57, %v2245_v20  ;;  %v2596_v20 = vld [vmem:[#allocation2 + $0x11c] sm:$0xff] }
 0x18c   : > { %5118 = vmatmul.mubr.bf16.gmra.mxu1 %v1951_v22  ;;  %v6226_v22 = vpack.c.bf16 %v2578_v10, %v2577_v2  ;;  %v2262_v2 = vld [vmem:[#allocation2 + $0x10b] sm:$0xff] }
 0x18d   : > { %5170 = vmatmul.mubr.bf16.gmra.mxu0 %v1952_v6  ;;  %5189 = vmatprep.mubr.bf16.mxu1 %v2267_v26  ;;  %v5585_v6 = vld [vmem:[%s7042_s4 + $0x1c0] sm:$0xff]   ;;  %v2582_v26 = vld [vmem:[#allocation2 + $0xac] sm:$0xff] }
 0x18e   : > { %5241 = vmatprep.mubr.bf16.mxu0 %v2599_v27  ;;  %v6244_v27 = vld [vmem:[%s7042_s4 + $0x238] sm:$0xff]   ;;  %v6246_v31 = vpack.c.bf16 %v2582_v26, %v2581_v13  ;;  %v2594_v10 = vld [vmem:[#allocation2 + $0x10c] sm:$0xff] }
 0x18f   : > { %v2263_v26 = vld [vmem:[#allocation2 + $0x113] sm:$0xff] }
 0x194   : > { %5190 = vmatmul.mubr.bf16.vlgmr.msra.gmra.mxu1 %v2268_v4  ;;  %v2251_v4 = vld [vmem:[#allocation2 + $0xb3] sm:$0xff] }
 0x195   : > { %5242 = vmatmul.mubr.bf16.vlgmr.msra.gmra.mxu0 %v6172_v34  ;;  %5278 = vmatpush3.bf16.msra.mxu1 %v6163_v1  ;;  %v5579_v1 = vld [vmem:[%s7042_s4 + $0x1e0] sm:$0xff]   ;;  %v2277_v0 = vpack.c.bf16 %v2252_v28, %v2251_v4 }
 0x196   : > { %5193 = vmatprep.mubr.bf16.mxu1 %v2269_v17  ;;  %5245 = vmatprep.mubr.bf16.mxu0 %v6178_v35  ;;  %v2254_v17 = vld [vmem:[#allocation2 + $0xcb] sm:$0xff] }
 0x197   : > { %5279 = vmatprep.subr.bf16.mxu1 %v5571_v9  ;;  %5330 = vmatpush3.bf16.msra.mxu0 %v6168_v58  ;;  %v2575_v58 = vld [vmem:[#allocation2 + $0x74] sm:$0xff]  ;;  %v2278_v41 = vpack.c.bf16 %v2254_v17, %v2253_v53 }
 0x198   : > { %5331 = vmatprep.subr.bf16.mxu0 %v5577_v36  ;;  %v6213_v15 = vpack.c.bf16 %v2576_v51, %v2575_v58  ;;  %v2259_v51 = vld [vmem:[#allocation2 + $0xf3] sm:$0xff] }
 0x199   : > { %5280 = vmatpush3.bf16.msra.mxu1 %v5571_v9  ;;  %v6248_v9 = vpack.c.bf16 %v2584_v30, %v2583_v59  ;;  %v2283_v59 = vpack.c.bf16 %v2264_v8, %v2263_v26  ;;  %v6275_v30 = vpack.c.bf16 %v2596_v20, %v2595_v19 }
 0x19a   : > { %5281 = vmatprep.subr.bf16.mxu1 %v5572_v38 }
 0x19b   : > { %5332 = vmatpush3.bf16.msra.mxu0 %v5577_v36  ;;  %v2586_v36 = vld [vmem:[#allocation2 + $0xcc] sm:$0xff] }
 0x19c   : > { %5194 = vmatmul.mubr.bf16.gmra.mxu1 %v2270_v56  ;;  %5333 = vmatprep.subr.bf16.mxu0 %v5578_v44  ;;  %v6253_v5 = vpack.c.bf16 %v2586_v36, %v2585_v40  ;;  %v2266_v36 = vld [vmem:[#allocation2 + $0x12b] sm:$0xff] }
 0x19d   : > { %5246 = vmatmul.mubr.bf16.gmra.mxu0 %v6189_v29  ;;  %5197 = vmatprep.mubr.bf16.mxu1 %v2271_v62  ;;  %v2590_v62 = vld [vmem:[#allocation2 + $0xec] sm:$0xff] }
 0x19e   : > { %5249 = vmatprep.mubr.bf16.mxu0 %v6194_v14  ;;  %5282 = vmatpush3.bf16.msra.mxu1 %v5572_v38  ;;  %v2256_v38 = vld [vmem:[#allocation2 + $0xdb] sm:$0xff]  ;;  %v3228_v40 = vld [vmem:[#allocation2 + $0x2d] sm:$0xff] }
 0x19f   : > { %5283 = vmatprep.subr.bf16.mxu1 %v5573_v45  ;;  %5334 = vmatpush3.bf16.msra.mxu0 %v5578_v44  ;;  %v2279_v56 = vpack.c.bf16 %v2256_v38, %v2255_v42  ;;  %v2258_v44 = vld [vmem:[#allocation2 + $0xeb] sm:$0xff]  ;;  %v2265_v42 = vld [vmem:[#allocation2 + $0x123] sm:$0xff] }
 0x1a0   : > { %5335 = vmatprep.subr.bf16.mxu0 %v5579_v1  ;;  %v2280_v49 = vpack.c.bf16 %v2258_v44, %v2257_v46  ;;  %v2597_v38 = vld [vmem:[#allocation2 + $0x124] sm:$0xff] }
 0x1a2   : > { %5284 = vmatpush3.bf16.msra.mxu1 %v5573_v45  ;;  %v2260_v45 = vld [vmem:[#allocation2 + $0xfb] sm:$0xff] }
 0x1a3   : > { %5285 = vmatprep.subr.bf16.mxu1 %v5574_v47  ;;  %5336 = vmatpush3.bf16.msra.mxu0 %v5579_v1  ;;  %v2591_v1 = vld [vmem:[#allocation2 + $0xf4] sm:$0xff]  ;;  %v2281_v52 = vpack.c.bf16 %v2260_v45, %v2259_v51  ;;  %v6285_v45 = vpack.c.bf16 %v2598_v7, %v2597_v38 }
 0x1a4   : > { %5198 = vmatmul.mubr.bf16.gmra.mxu1 %v2272_v50  ;;  %5337 = vmatprep.subr.bf16.mxu0 %v5581_v55  ;;  %v6261_v16 = vpack.c.bf16 %v2592_v24, %v2591_v1  ;;  %v3227_v1 = vld [vmem:[#allocation2 + $0x25] sm:$0xff]  ;;  %v3236_v7 = vld [vmem:[#allocation2 + $0x6d] sm:$0xff] }
 0x1a5   : > { %5250 = vmatmul.mubr.bf16.gmra.mxu0 %v6207_v54  ;;  %5201 = vmatprep.mubr.bf16.mxu1 %v2273_v63  ;;  %v3263_v46 = vpack.c.bf16 %v3228_v40, %v3227_v1  ;;  %v3235_v40 = vld [vmem:[#allocation2 + $0x65] sm:$0xff] }
 0x1a6   : > { %5253 = vmatprep.mubr.bf16.mxu0 %v6213_v15  ;;  %5286 = vmatpush3.bf16.msra.mxu1 %v5574_v47  ;;  %v2589_v47 = vld [vmem:[#allocation2 + $0xe4] sm:$0xff] }
 0x1a7   : > { %5287 = vmatprep.subr.bf16.mxu1 %v5576_v3  ;;  %5338 = vmatpush3.bf16.msra.mxu0 %v5581_v55  ;;  %v6259_v58 = vpack.c.bf16 %v2590_v62, %v2589_v47  ;;  %v2284_v62 = vpack.c.bf16 %v2266_v36, %v2265_v42 }
 0x1a8   : > { %5339 = vmatprep.subr.bf16.mxu0 %v5582_v48 }
 0x1aa   : > { %5288 = vmatpush3.bf16.msra.mxu1 %v5576_v3 }
 0x1ab   : > { %5289 = vmatprep.subr.bf16.mxu1 %v5580_v12  ;;  %5340 = vmatpush3.bf16.msra.mxu0 %v5582_v48 }
 0x1ac   : > { %5202 = vmatmul.mubr.bf16.gmra.mxu1 %v2274_v21  ;;  %5341 = vmatprep.subr.bf16.mxu0 %v5584_v61 }
 0x1ad   : > { %5254 = vmatmul.mubr.bf16.gmra.mxu0 %v6226_v22  ;;  %5205 = vmatprep.mubr.bf16.mxu1 %v2275_v25 }
 0x1ae   : > { %5257 = vmatprep.mubr.bf16.mxu0 %v6231_v60  ;;  %5290 = vmatpush3.bf16.msra.mxu1 %v5580_v12 }
 0x1af   : > { %5291 = vmatprep.subr.bf16.mxu1 %v5583_v11  ;;  %5342 = vmatpush3.bf16.msra.mxu0 %v5584_v61  ;;  %v2593_v61 = vld [vmem:[#allocation2 + $0x104] sm:$0xff] }
 0x1b0   : > { %5343 = vmatprep.subr.bf16.mxu0 %v5585_v6  ;;  %v6271_v37 = vpack.c.bf16 %v2594_v10, %v2593_v61  ;;  %v3231_v61 = vld [vmem:[#allocation2 + $0x45] sm:$0xff] }
 0x1b2   : > { %5292 = vmatpush3.bf16.msra.mxu1 %v5583_v11 }
 0x1b3   : > { %5344 = vmatpush3.bf16.msra.mxu0 %v5585_v6  ;;  %5381 = vmatprep.subr.bf16.mxu1 %v6244_v27  ;;  %v2282_v6 = vpack.c.bf16 %v2262_v2, %v2261_v23  ;;  %v5587_v23 = vld [vmem:[%s7042_s4 + $0x230] sm:$0xff]  }
 0x1b4   : > { %5206 = vmatmul.mubr.bf16.gmra.mxu1 %v2276_v33 }
 0x1b5   : > { %5258 = vmatmul.mubr.bf16.gmra.mxu0 %v6246_v31  ;;  %5209 = vmatprep.mubr.bf16.mxu1 %v2277_v0 }
 0x1b6   : > { %5261 = vmatprep.mubr.bf16.mxu0 %v6248_v9 }
 0x1bc   : > { %5210 = vmatmul.mubr.bf16.gmra.mxu1 %v2278_v41 }
 0x1bd   : > { %5262 = vmatmul.mubr.bf16.gmra.mxu0 %v6253_v5  ;;  %5213 = vmatprep.mubr.bf16.mxu1 %v2279_v56 }
 0x1be   : > { %5265 = vmatprep.mubr.bf16.mxu0 %v6255_v43 }
 0x1c3   : > { %v4983_v50 = vpop.f32.mrf.mxu1 }
 0x1c4   : > { %v5035_v55 = vpop.f32.mrf.mxu0  ;;  %5214 = vmatmul.mubr.bf16.gmra.mxu1 %v2280_v49 }
 0x1c5   : > { %5266 = vmatmul.mubr.bf16.gmra.mxu0 %v6259_v58  ;;  %v6264_v63 = vadd.f32 %v5035_v55, %v4983_v50  ;;  %5217 = vmatprep.mubr.bf16.mxu1 %v2281_v52  ;;  %v1199_v3 = vpop.f32.mrf.mxu1 }
 0x1c6   : > { %5269 = vmatprep.mubr.bf16.mxu0 %v6261_v16  ;;  %v1424_v48 = vpop.f32.mrf.mxu0 }
 0x1c7   : > { %v6267_v57 = vadd.f32 %v1424_v48, %v1199_v3  ;;  %v4984_v12 = vpop.f32.mrf.mxu1  ;;  %v3229_v3 = vld [vmem:[#allocation2 + $0x35] sm:$0xff]  ;;  %v3230_v48 = vld [vmem:[#allocation2 + $0x3d] sm:$0xff] }
 0x1c8   : > { %v5036_v18 = vpop.f32.mrf.mxu0  ;;  %v3264_v20 = vpack.c.bf16 %v3230_v48, %v3229_v3  ;;  %v3238_v3 = vld [vmem:[#allocation2 + $0x7d] sm:$0xff] }
 0x1c9   : > { %v6269_v21 = vadd.f32 %v5036_v18, %v4984_v12  ;;  %v1202_v25 = vpop.f32.mrf.mxu1  ;;  %v3232_v18 = vld [vmem:[#allocation2 + $0x4d] sm:$0xff]  ;;  %v5590_v48 = vld [vmem:[%s7042_s4 + $0x218] sm:$0xff]  }
 0x1ca   : > { %v1427_v11 = vpop.f32.mrf.mxu0 }
 0x1cb   : > { %v6273_v28 = vadd.f32 %v1427_v11, %v1202_v25 }
 0x1cc   : > { %v4987_v32 = vpop.f32.mrf.mxu1  ;;  %5218 = vmatmul.mubr.bf16.gmra.mxu1 %v2282_v6  ;;  %v3265_v6 = vpack.c.bf16 %v3232_v18, %v3231_v61  ;;  %v3240_v18 = vld [vmem:[#allocation2 + $0x8d] sm:$0xff] }
 0x1cd   : > { %v5039_v13 = vpop.f32.mrf.mxu0  ;;  %5270 = vmatmul.mubr.bf16.gmra.mxu0 %v6271_v37  ;;  %5221 = vmatprep.mubr.bf16.mxu1 %v2283_v59 }
 0x1ce   : > { %v6278_v33 = vadd.f32 %v5039_v13, %v4987_v32  ;;  %5273 = vmatprep.mubr.bf16.mxu0 %v6275_v30  ;;  %v1215_v4 = vpop.f32.mrf.mxu1  ;;  %v5588_v13 = vld [vmem:[%s7042_s4 + $0x228] sm:$0xff]  }
 0x1cf   : > { %v1440_v0 = vpop.f32.mrf.mxu0 }
 0x1d0   : > { %v6281_v17 = vadd.f32 %v1440_v0, %v1215_v4  ;;  %v4988_v39 = vpop.f32.mrf.mxu1  ;;  %v3233_v0 = vld [vmem:[#allocation2 + $0x55] sm:$0xff] }
 0x1d1   : > { %v5040_v53 = vpop.f32.mrf.mxu0 }
 0x1d2   : > { %v6283_v41 = vadd.f32 %v5040_v53, %v4988_v39  ;;  %v1218_v56 = vpop.f32.mrf.mxu1 }
 0x1d3   : > { %v1443_v44 = vpop.f32.mrf.mxu0 }
 0x1d4   : > { %v6287_v24 = vadd.f32 %v1443_v44, %v1218_v56  ;;  %v4991_v47 = vpop.f32.mrf.mxu1  ;;  %5222 = vmatmul.mubr.bf16.gmra.mxu1 %v2284_v62  ;;  %v3267_v56 = vpack.c.bf16 %v3236_v7, %v3235_v40  ;;  %v5589_v44 = vld [vmem:[%s7042_s4 + $0x220] sm:$0xff]  }
 0x1d5   : > { %v5043_v49 = vpop.f32.mrf.mxu0  ;;  %5274 = vmatmul.mubr.bf16.gmra.mxu0 %v6285_v45  ;;  %5293 = vmatprep.mubr.bf16.mxu1 %v6172_v34 }
 0x1d6   : > { %v6290_v51 = vadd.f32 %v5043_v49, %v4991_v47  ;;  %5345 = vmatprep.mubr.bf16.mxu0 %v3263_v46  ;;  %v1231_v52 = vpop.f32.mrf.mxu1 }
 0x1d7   : > { %v1456_v50 = vpop.f32.mrf.mxu0 }
 0x1d8   : > { %v6293_v55 = vadd.f32 %v1456_v50, %v1231_v52  ;;  %v4992_v2 = vpop.f32.mrf.mxu1  ;;  %v3237_v50 = vld [vmem:[#allocation2 + $0x75] sm:$0xff] }
 0x1d9   : > { %v5044_v10 = vpop.f32.mrf.mxu0 }
 0x1da   : > { %v6295_v12 = vadd.f32 %v5044_v10, %v4992_v2  ;;  %v1234_v8 = vpop.f32.mrf.mxu1  ;;  %v3239_v10 = vld [vmem:[#allocation2 + $0x85] sm:$0xff] }
 0x1db   : > { %v1459_v19 = vpop.f32.mrf.mxu0  ;;  %v3269_v61 = vpack.c.bf16 %v3240_v18, %v3239_v10  ;;  %v3246_v10 = vld [vmem:[#allocation2 + $0xbd] sm:$0xff] }
 0x1dc   : > { %v6300_v34 = vadd.f32 %v1459_v19, %v1234_v8  ;;  %v4995_v25 = vpop.f32.mrf.mxu1  ;;  %5294 = vmatmul.mubr.bf16.vlgmr.msra.gmra.mxu1 %v6178_v35  ;;  %v3234_v35 = vld [vmem:[#allocation2 + $0x5d] sm:$0xff] }
 0x1dd   : > { %v5047_v11 = vpop.f32.mrf.mxu0  ;;  %5346 = vmatmul.mubr.bf16.vlgmr.msra.gmra.mxu0 %v3264_v20  ;;  %5382 = vmatpush3.bf16.msra.mxu1 %v6244_v27  ;;  %v3266_v53 = vpack.c.bf16 %v3234_v35, %v3233_v0  ;;  %v3268_v20 = vpack.c.bf16 %v3238_v3, %v3237_v50  ;;  %v3241_v35 = vld [vmem:[#allocation2 + $0x95] sm:$0xff] }
 0x1de   : > { %v6303_v26 = vadd.f32 %v5047_v11, %v4995_v25  ;;  %5297 = vmatprep.mubr.bf16.mxu1 %v6189_v29  ;;  %5349 = vmatprep.mubr.bf16.mxu0 %v3265_v6  ;;  %v1247_v59 = vpop.f32.mrf.mxu1  ;;  %v5591_v25 = vld [vmem:[%s7042_s4 + $0x210] sm:$0xff]  }
 0x1df   : > { %v1472_v32 = vpop.f32.mrf.mxu0  ;;  %5383 = vmatprep.subr.bf16.mxu1 %v5587_v23 }
 0x1e0   : > { %v6310_v4 = vadd.f32 %v1472_v32, %v1247_v59  ;;  %v4996_v36 = vpop.f32.mrf.mxu1 }
 0x1e1   : > { %v5048_v38 = vpop.f32.mrf.mxu0  ;;  %5384 = vmatpush3.bf16.msra.mxu1 %v5587_v23 }
 0x1e2   : > { %v6312_v39 = vadd.f32 %v5048_v38, %v4996_v36  ;;  %v1250_v27 = vpop.f32.mrf.mxu1  ;;  %5385 = vmatprep.subr.bf16.mxu1 %v5588_v13  ;;  %v3242_v36 = vld [vmem:[#allocation2 + $0x9d] sm:$0xff]  ;;  %v5592_v38 = vld [vmem:[%s7042_s4 + $0x208] sm:$0xff]  }
 0x1e3   : > { %v1475_v29 = vpop.f32.mrf.mxu0  ;;  %v3270_v40 = vpack.c.bf16 %v3242_v36, %v3241_v35 }
 0x1e4   : > { %v6314_v42 = vadd.f32 %v1475_v29, %v1250_v27  ;;  %v4999_v62 = vpop.f32.mrf.mxu1  ;;  %5298 = vmatmul.mubr.bf16.gmra.mxu1 %v6194_v14  ;;  %v3244_v27 = vld [vmem:[#allocation2 + $0xad] sm:$0xff] }
 0x1e5   : > { %v5051_v1 = vpop.f32.mrf.mxu0  ;;  %5350 = vmatmul.mubr.bf16.gmra.mxu0 %v3266_v53  ;;  %5301 = vmatprep.mubr.bf16.mxu1 %v6207_v54 }
 0x1e6   : > { %v6320_v46 = vadd.f32 %v5051_v1, %v4999_v62  ;;  %5353 = vmatprep.mubr.bf16.mxu0 %v3267_v56  ;;  %v1263_v47 = vpop.f32.mrf.mxu1  ;;  %5386 = vmatpush3.bf16.msra.mxu1 %v5588_v13  ;;  %v3243_v56 = vld [vmem:[#allocation2 + $0xa5] sm:$0xff] }
 0x1e7   : > { %v1488_v49 = vpop.f32.mrf.mxu0  ;;  %5387 = vmatprep.subr.bf16.mxu1 %v5589_v44  ;;  %v3271_v62 = vpack.c.bf16 %v3244_v27, %v3243_v56  ;;  %v5593_v1 = vld [vmem:[%s7042_s4 + $0x200] sm:$0xff]  }
 0x1e8   : > { %v6323_v52 = vadd.f32 %v1488_v49, %v1263_v47  ;;  %v5000_v2 = vpop.f32.mrf.mxu1  ;;  %v3250_v27 = vld [vmem:[#allocation2 + $0xdd] sm:$0xff] }
 0x1e9   : > { %v5052_v14 = vpop.f32.mrf.mxu0 }
 0x1ea   : > { %v6328_v8 = vadd.f32 %v5052_v14, %v5000_v2  ;;  %v1266_v54 = vpop.f32.mrf.mxu1  ;;  %5388 = vmatpush3.bf16.msra.mxu1 %v5589_v44  ;;  %v3245_v14 = vld [vmem:[#allocation2 + $0xb5] sm:$0xff] }
 0x1eb   : > { %v1491_v19 = vpop.f32.mrf.mxu0  ;;  %5389 = vmatprep.subr.bf16.mxu1 %v5590_v48 }
 0x1ec   : > { %v6330_v23 = vadd.f32 %v1491_v19, %v1266_v54  ;;  %v5003_v11 = vpop.f32.mrf.mxu1  ;;  %5302 = vmatmul.mubr.bf16.gmra.mxu1 %v6213_v15  ;;  %v3248_v19 = vld [vmem:[#allocation2 + $0xcd] sm:$0xff] }
 0x1ed   : > { %v5055_v6 = vpop.f32.mrf.mxu0  ;;  %5354 = vmatmul.mubr.bf16.gmra.mxu0 %v3268_v20  ;;  %5305 = vmatprep.mubr.bf16.mxu1 %v6226_v22 }
 0x1ee   : > { %v6336_v59 = vadd.f32 %v5055_v6, %v5003_v11  ;;  %5357 = vmatprep.mubr.bf16.mxu0 %v3269_v61  ;;  %v1279_v32 = vpop.f32.mrf.mxu1  ;;  %5390 = vmatpush3.bf16.msra.mxu1 %v5590_v48  ;;  %v3247_v11 = vld [vmem:[#allocation2 + $0xc5] sm:$0xff] }
 0x1ef   : > { %v1504_v13 = vpop.f32.mrf.mxu0  ;;  %5391 = vmatprep.subr.bf16.mxu1 %v5591_v25  ;;  %v3273_v6 = vpack.c.bf16 %v3248_v19, %v3247_v11  ;;  %v3253_v19 = vld [vmem:[#allocation2 + $0xf5] sm:$0xff]  ;;  %v3256_v11 = vld [vmem:[#allocation2 + $0x10d] sm:$0xff] }
 0x1f0   : > { %v6339_v0 = vadd.f32 %v1504_v13, %v1279_v32  ;;  %v5004_v7 = vpop.f32.mrf.mxu1 }
 0x1f1   : > { %v5056_v15 = vpop.f32.mrf.mxu0 }
 0x1f2   : > { %v6344_v29 = vadd.f32 %v5056_v15, %v5004_v7  ;;  %v1282_v53 = vpop.f32.mrf.mxu1  ;;  %5392 = vmatpush3.bf16.msra.mxu1 %v5591_v25  ;;  %v3272_v25 = vpack.c.bf16 %v3246_v10, %v3245_v14  ;;  %v3249_v15 = vld [vmem:[#allocation2 + $0xd5] sm:$0xff] }
 0x1f3   : > { %v1507_v22 = vpop.f32.mrf.mxu0  ;;  %5393 = vmatprep.subr.bf16.mxu1 %v5592_v38 }
 0x1f4   : > { %v6346_v44 = vadd.f32 %v1507_v22, %v1282_v53  ;;  %v5007_v47 = vpop.f32.mrf.mxu1  ;;  %5306 = vmatmul.mubr.bf16.gmra.mxu1 %v6231_v60 }
 0x1f5   : > { %v5059_v49 = vpop.f32.mrf.mxu0  ;;  %5358 = vmatmul.mubr.bf16.gmra.mxu0 %v3270_v40  ;;  %5309 = vmatprep.mubr.bf16.mxu1 %v6246_v31  ;;  %v3252_v40 = vld [vmem:[#allocation2 + $0xed] sm:$0xff] }
 0x1f6   : > { %v6352_v50 = vadd.f32 %v5059_v49, %v5007_v47  ;;  %5361 = vmatprep.mubr.bf16.mxu0 %v3271_v62  ;;  %v1295_v3 = vpop.f32.mrf.mxu1  ;;  %5394 = vmatpush3.bf16.msra.mxu1 %v5592_v38  ;;  %v3251_v47 = vld [vmem:[#allocation2 + $0xe5] sm:$0xff] }
 0x1f7   : > { %v1520_v48 = vpop.f32.mrf.mxu0  ;;  %5395 = vmatprep.subr.bf16.mxu1 %v5593_v1 }
 0x1f8   : > { %v6355_v2 = vadd.f32 %v1520_v48, %v1295_v3  ;;  %v5008_v18 = vpop.f32.mrf.mxu1  ;;  %v3275_v3 = vpack.c.bf16 %v3252_v40, %v3251_v47 }
 0x1f9   : > { %v5060_v54 = vpop.f32.mrf.mxu0 }
 0x1fa   : > { %v6357_v20 = vadd.f32 %v5060_v54, %v5008_v18  ;;  %v1298_v60 = vpop.f32.mrf.mxu1  ;;  %5396 = vmatpush3.bf16.msra.mxu1 %v5593_v1 }
 0x1fb   : > { %v1523_v61 = vpop.f32.mrf.mxu0 }
 0x1fc   : > { %v6359_v31 = vadd.f32 %v1523_v61, %v1298_v60  ;;  %v5011_v32 = vpop.f32.mrf.mxu1  ;;  %5310 = vmatmul.mubr.bf16.gmra.mxu1 %v6248_v9  ;;  %v3274_v9 = vpack.c.bf16 %v3250_v27, %v3249_v15  ;;  %v3254_v60 = vld [vmem:[#allocation2 + $0xfd] sm:$0xff] }
 0x1fd   : > { %v5063_v13 = vpop.f32.mrf.mxu0  ;;  %5362 = vmatmul.mubr.bf16.gmra.mxu0 %v3272_v25  ;;  %5313 = vmatprep.mubr.bf16.mxu1 %v6253_v5 }
 0x1fe   : > { %v6362_v35 = vadd.f32 %v5063_v13, %v5011_v32  ;;  %5365 = vmatprep.mubr.bf16.mxu0 %v3273_v6  ;;  %v1311_v36 = vpop.f32.mrf.mxu1  ;;  %v3276_v13 = vpack.c.bf16 %v3254_v60, %v3253_v19 }
 0x1ff   : > { %v1536_v38 = vpop.f32.mrf.mxu0 }
 0x200   : > { %v6365_v7 = vadd.f32 %v1536_v38, %v1311_v36  ;;  %v5012_v53 = vpop.f32.mrf.mxu1  ;;  %v3255_v36 = vld [vmem:[#allocation2 + $0x105] sm:$0xff] }
 0x201   : > { %v5064_v22 = vpop.f32.mrf.mxu0  ;;  %v3277_v38 = vpack.c.bf16 %v3256_v11, %v3255_v36  ;;  %v2929_v11 = vld [vmem:[#allocation2 + $0x134] sm:$0xff] }
 0x202   : > { %v6367_v56 = vadd.f32 %v5064_v22, %v5012_v53  ;;  %v1314_v62 = vpop.f32.mrf.mxu1  ;;  %v3261_v36 = vld [vmem:[#allocation2 + $0x135] sm:$0xff] }
 0x203   : > { %v1539_v1 = vpop.f32.mrf.mxu0 }
 0x204   : > { %v6369_v49 = vadd.f32 %v1539_v1, %v1314_v62  ;;  %v5015_v5 = vpop.f32.mrf.mxu1  ;;  %5314 = vmatmul.mubr.bf16.gmra.mxu1 %v6255_v43  ;;  %v3257_v1 = vld [vmem:[#allocation2 + $0x115] sm:$0xff] }
 0x205   : > { %v5067_v48 = vpop.f32.mrf.mxu0  ;;  %5366 = vmatmul.mubr.bf16.gmra.mxu0 %v3274_v9  ;;  %5317 = vmatprep.mubr.bf16.mxu1 %v6259_v58  ;;  %v3258_v9 = vld [vmem:[#allocation2 + $0x11d] sm:$0xff] }
 0x206   : > { %v6372_v14 = vadd.f32 %v5067_v48, %v5015_v5  ;;  %5369 = vmatprep.mubr.bf16.mxu0 %v3275_v3  ;;  %v1327_v10 = vpop.f32.mrf.mxu1  ;;  %v3259_v5 = vld [vmem:[#allocation2 + $0x125] sm:$0xff]  ;;  %v3260_v48 = vld [vmem:[#allocation2 + $0x12d] sm:$0xff] }
 0x207   : > { %v1552_v18 = vpop.f32.mrf.mxu0 }
 0x208   : > { %v6375_v54 = vadd.f32 %v1552_v18, %v1327_v10  ;;  %v5016_v61 = vpop.f32.mrf.mxu1 }
 0x209   : > { %v5068_v25 = vpop.f32.mrf.mxu0 }
 0x20a   : > { %v6377_v6 = vadd.f32 %v5068_v25, %v5016_v61  ;;  %v6379_v32 = vpop.f32.mrf.mxu1 }
 0x20b   : > { %v6381_v43 = vpop.f32.mrf.mxu0 }
 0x20c   : > { %v5087_v58 = vpop.f32.mrf.mxu1  ;;  %5318 = vmatmul.mubr.bf16.gmra.mxu1 %v6261_v16 }
 0x20d   : > { %v5139_v15 = vpop.f32.mrf.mxu0  ;;  %5370 = vmatmul.mubr.bf16.gmra.mxu0 %v3276_v13  ;;  %v1865_v27 = vadd.f32 %v5087_v58, %v6264_v63  ;;  %5321 = vmatprep.mubr.bf16.mxu1 %v6271_v37  ;;  %v3278_v37 = vpack.c.bf16 %v3258_v9, %v3257_v1 }
 0x20e   : > { %5373 = vmatprep.mubr.bf16.mxu0 %v3277_v38  ;;  %v1720_v53 = vpop.f32.mrf.mxu1  ;;  %v3262_v38 = vld [vmem:[#allocation2 + $0x13d] sm:$0xff] }
 0x20f   : > { %v2052_v22 = vpop.f32.mrf.mxu0  ;;  %v6386_v40 = vadd.f32 %v5139_v15, %v1865_v27  ;;  %v1863_v62 = vadd.f32 %v1720_v53, %v6267_v57  ;;  %v3279_v57 = vpack.c.bf16 %v3260_v48, %v3259_v5  ;;  %v3280_v1 = vpack.c.bf16 %v3262_v38, %v3261_v36 }
 0x210   : > { %v5088_v47 = vpop.f32.mrf.mxu1 }
 0x211   : > { %v5140_v3 = vpop.f32.mrf.mxu0  ;;  %v6389_v10 = vadd.f32 %v2052_v22, %v1863_v62  ;;  %v1866_v16 = vadd.f32 %v5088_v47, %v6269_v21  ;;  %v2930_v21 = vld [vmem:[#allocation2 + $0x13c] sm:$0xff] }
 0x212   : > { %v1723_v63 = vpop.f32.mrf.mxu1  ;;  %v2948_v62 = vpack.c.bf16 %v2930_v21, %v2929_v11  ;;  %v3561_v11 = vld [vmem:[#allocation2 + $0x36] sm:$0xff] }
 0x213   : > { %v6392_v18 = vpop.f32.mrf.mxu0  ;;  %v6394_v19 = vadd.f32 %v5140_v3, %v1866_v16  ;;  %v6397_v60 = vadd.f32 %v1723_v63, %v6273_v28  ;;  %v3559_v3 = vld [vmem:[#allocation2 + $0x26] sm:$0xff] }
 0x214   : > { %v5091_v61 = vpop.f32.mrf.mxu1  ;;  %5322 = vmatmul.mubr.bf16.gmra.mxu1 %v6275_v30  ;;  %v3560_v30 = vld [vmem:[#allocation2 + $0x2e] sm:$0xff] }
 0x215   : > { %v5143_v25 = vpop.f32.mrf.mxu0  ;;  %5374 = vmatmul.mubr.bf16.gmra.mxu0 %v3278_v37  ;;  %v1869_v13 = vadd.f32 %v5091_v61, %v6278_v33  ;;  %5325 = vmatprep.mubr.bf16.mxu1 %v6285_v45  ;;  %v3595_v16 = vpack.c.bf16 %v3560_v30, %v3559_v3 }
 0x216   : > { %5377 = vmatprep.mubr.bf16.mxu0 %v3279_v57  ;;  %v1736_v58 = vpop.f32.mrf.mxu1 }
 0x217   : > { %v2068_v15 = vpop.f32.mrf.mxu0  ;;  %v6402_v27 = vadd.f32 %v5143_v25, %v1869_v13  ;;  %v1867_v28 = vadd.f32 %v1736_v58, %v6281_v17  ;;  %v3562_v13 = vld [vmem:[#allocation2 + $0x3e] sm:$0xff] }
 0x218   : > { %v5092_v53 = vpop.f32.mrf.mxu1 }
 0x219   : > { %v5144_v22 = vpop.f32.mrf.mxu0  ;;  %v6405_v9 = vadd.f32 %v2068_v15, %v1867_v28  ;;  %v1870_v33 = vadd.f32 %v5092_v53, %v6283_v41  ;;  %v3563_v53 = vld [vmem:[#allocation2 + $0x46] sm:$0xff] }
 0x21a   : > { %v1739_v45 = vpop.f32.mrf.mxu1 }
 0x21b   : > { %v6408_v47 = vpop.f32.mrf.mxu0  ;;  %v6410_v5 = vadd.f32 %v5144_v22, %v1870_v33  ;;  %v6413_v48 = vadd.f32 %v1739_v45, %v6287_v24  ;;  %v3564_v24 = vld [vmem:[#allocation2 + $0x4e] sm:$0xff] }
 0x21c   : > { %v5095_v17 = vpop.f32.mrf.mxu1  ;;  %5326 = vmatmul.mubr.bf16.gmra.mxu1 %v2948_v62 }
 0x21d   : > { %v5147_v63 = vpop.f32.mrf.mxu0  ;;  %5378 = vmatmul.mubr.bf16.gmra.mxu0 %v3280_v1  ;;  %v1873_v37 = vadd.f32 %v5095_v17, %v6290_v51  ;;  %5397 = vmatprep.mubr.bf16.mxu1 %v3595_v16  ;;  %v3596_v51 = vpack.c.bf16 %v3562_v13, %v3561_v11  ;;  %v3565_v17 = vld [vmem:[#allocation2 + $0x56] sm:$0xff] }
 0x21e   : > { %v1752_v57 = vpop.f32.mrf.mxu1 }
 0x21f   : > { %v2084_v61 = vpop.f32.mrf.mxu0  ;;  %v6416_v41 = vadd.f32 %v5147_v63, %v1873_v37  ;;  %v1871_v25 = vadd.f32 %v1752_v57, %v6293_v55  ;;  %v3597_v55 = vpack.c.bf16 %v3564_v24, %v3563_v53  ;;  %v3566_v63 = vld [vmem:[#allocation2 + $0x5e] sm:$0xff] }
 0x220   : > { %v5096_v21 = vpop.f32.mrf.mxu1 }
 0x221   : > { %v5148_v36 = vpop.f32.mrf.mxu0  ;;  %v6419_v38 = vadd.f32 %v2084_v61, %v1871_v25  ;;  %v1874_v58 = vadd.f32 %v5096_v21, %v6295_v12  ;;  %v3568_v61 = vld [vmem:[#allocation2 + $0x6e] sm:$0xff]  ;;  %v3567_v21 = vld [vmem:[#allocation2 + $0x66] sm:$0xff] }
 0x222   : > { %v1755_v15 = vpop.f32.mrf.mxu1 }
 0x223   : > { %v6422_v28 = vpop.f32.mrf.mxu0  ;;  %v6424_v22 = vadd.f32 %v5148_v36, %v1874_v58  ;;  %v6427_v62 = vadd.f32 %v1755_v15, %v6300_v34 }
 0x224   : > { %v5099_v30 = vpop.f32.mrf.mxu1  ;;  %5398 = vmatmul.mubr.bf16.vlgmr.msra.gmra.mxu1 %v3596_v51 }
 0x225   : > { %v5151_v1 = vpop.f32.mrf.mxu0  ;;  %v1877_v33 = vadd.f32 %v5099_v30, %v6303_v26  ;;  %5401 = vmatprep.mubr.bf16.mxu1 %v3597_v55  ;;  %v3598_v26 = vpack.c.bf16 %v3566_v63, %v3565_v17  ;;  %v3572_v17 = vld [vmem:[#allocation2 + $0x8e] sm:$0xff] }
 0x226   : > { %v1768_v45 = vpop.f32.mrf.mxu1 }
 0x227   : > { %v2100_v3 = vpop.f32.mrf.mxu0  ;;  %v6430_v12 = vadd.f32 %v5151_v1, %v1877_v33  ;;  %v1875_v16 = vadd.f32 %v1768_v45, %v6310_v4  ;;  %v3599_v4 = vpack.c.bf16 %v3568_v61, %v3567_v21  ;;  %v3569_v33 = vld [vmem:[#allocation2 + $0x76] sm:$0xff] }
 0x228   : > { %v5100_v37 = vpop.f32.mrf.mxu1 }
 0x229   : > { %v5152_v57 = vpop.f32.mrf.mxu0  ;;  %v6433_v34 = vadd.f32 %v2100_v3, %v1875_v16  ;;  %v1878_v25 = vadd.f32 %v5100_v37, %v6312_v39  ;;  %v5594_v39 = vld [vmem:[%s7044_s6 + $0x38] sm:$0xff]   ;;  %v3571_v16 = vld [vmem:[#allocation2 + $0x86] sm:$0xff] }
 0x22a   : > { %v1771_v11 = vpop.f32.mrf.mxu1  ;;  %5433 = vmatprep.subr.bf16.mxu0 %v5594_v39 }
 0x22b   : > { %v6436_v13 = vpop.f32.mrf.mxu0  ;;  %v6438_v36 = vadd.f32 %v5152_v57, %v1878_v25  ;;  %v6441_v24 = vadd.f32 %v1771_v11, %v6314_v42  ;;  %v3570_v42 = vld [vmem:[#allocation2 + $0x7e] sm:$0xff]  ;;  %5434 = vmatpush3.bf16.msra.mxu0 %v5594_v39  ;;  %v3601_v11 = vpack.c.bf16 %v3572_v17, %v3571_v16  ;;  %v3573_v39 = vld [vmem:[#allocation2 + $0x96] sm:$0xff]  ;;  %v3575_v17 = vld [vmem:[#allocation2 + $0xa6] sm:$0xff] }
 0x22c   : > { %v5103_v58 = vpop.f32.mrf.mxu1  ;;  %5402 = vmatmul.mubr.bf16.gmra.mxu1 %v3598_v26  ;;  %v3600_v61 = vpack.c.bf16 %v3570_v42, %v3569_v33  ;;  %v3576_v33 = vld [vmem:[#allocation2 + $0xae] sm:$0xff] }
 0x22d   : > { %v5155_v15 = vpop.f32.mrf.mxu0  ;;  %v1881_v51 = vadd.f32 %v5103_v58, %v6320_v46  ;;  %5405 = vmatprep.mubr.bf16.mxu1 %v3599_v4 }
 0x22e   : > { %v1784_v53 = vpop.f32.mrf.mxu1 }
 0x22f   : > { %v2116_v55 = vpop.f32.mrf.mxu0  ;;  %v6447_v30 = vadd.f32 %v5155_v15, %v1881_v51  ;;  %v1879_v1 = vadd.f32 %v1784_v53, %v6323_v52  ;;  %v3574_v53 = vld [vmem:[#allocation2 + $0x9e] sm:$0xff] }
 0x230   : > { %v5104_v45 = vpop.f32.mrf.mxu1  ;;  %v3602_v16 = vpack.c.bf16 %v3574_v53, %v3573_v39 }
 0x231   : > { %v5156_v3 = vpop.f32.mrf.mxu0  ;;  %v6450_v46 = vadd.f32 %v2116_v55, %v1879_v1  ;;  %v1882_v63 = vadd.f32 %v5104_v45, %v6328_v8 }
 0x232   : > { %v1787_v37 = vpop.f32.mrf.mxu1 }
 0x233   : > { %v6453_v57 = vpop.f32.mrf.mxu0  ;;  %v6455_v25 = vadd.f32 %v5156_v3, %v1882_v63  ;;  %v6458_v52 = vadd.f32 %v1787_v37, %v6330_v23  ;;  %v5595_v23 = vld [vmem:[%s7044_s6 + $0x30] sm:$0xff]   ;;  %v3603_v37 = vpack.c.bf16 %v3576_v33, %v3575_v17 }
 0x234   : > { %v5107_v26 = vpop.f32.mrf.mxu1  ;;  %5406 = vmatmul.mubr.bf16.gmra.mxu1 %v3600_v61  ;;  %5435 = vmatprep.subr.bf16.mxu0 %v5595_v23 }
 0x235   : > { %v5159_v21 = vpop.f32.mrf.mxu0  ;;  %v1885_v4 = vadd.f32 %v5107_v26, %v6336_v59  ;;  %5409 = vmatprep.mubr.bf16.mxu1 %v3601_v11  ;;  %5436 = vmatpush3.bf16.msra.mxu0 %v5595_v23  ;;  %v3580_v23 = vld [vmem:[#allocation2 + $0xce] sm:$0xff] }
 0x236   : > { %v1800_v58 = vpop.f32.mrf.mxu1 }
 0x237   : > { %v2132_v15 = vpop.f32.mrf.mxu0  ;;  %v6461_v51 = vadd.f32 %v5159_v21, %v1885_v4  ;;  %v1883_v8 = vadd.f32 %v1800_v58, %v6339_v0 }
 0x238   : > { %v5108_v55 = vpop.f32.mrf.mxu1 }
 0x239   : > { %v5160_v1 = vpop.f32.mrf.mxu0  ;;  %v6467_v42 = vadd.f32 %v2132_v15, %v1883_v8  ;;  %v1886_v59 = vadd.f32 %v5108_v55, %v6344_v29  ;;  %v3577_v15 = vld [vmem:[#allocation2 + $0xb6] sm:$0xff]  ;;  %v3578_v8 = vld [vmem:[#allocation2 + $0xbe] sm:$0xff] }
 0x23a   : > { %v1803_v45 = vpop.f32.mrf.mxu1 }
 0x23b   : > { %v6470_v3 = vpop.f32.mrf.mxu0  ;;  %v6472_v0 = vadd.f32 %v5160_v1, %v1886_v59  ;;  %v6475_v63 = vadd.f32 %v1803_v45, %v6346_v44  ;;  %v5596_v44 = vld [vmem:[%s7044_s6 + $0x28] sm:$0xff]   ;;  %v3604_v59 = vpack.c.bf16 %v3578_v8, %v3577_v15  ;;  %v3582_v15 = vld [vmem:[#allocation2 + $0xde] sm:$0xff] }
 0x23c   : > { %v5111_v61 = vpop.f32.mrf.mxu1  ;;  %5410 = vmatmul.mubr.bf16.gmra.mxu1 %v3602_v16  ;;  %5437 = vmatprep.subr.bf16.mxu0 %v5596_v44  ;;  %v3579_v45 = vld [vmem:[#allocation2 + $0xc6] sm:$0xff] }
 0x23d   : > { %v5163_v11 = vpop.f32.mrf.mxu0  ;;  %v1889_v26 = vadd.f32 %v5111_v61, %v6352_v50  ;;  %5413 = vmatprep.mubr.bf16.mxu1 %v3603_v37  ;;  %5438 = vmatpush3.bf16.msra.mxu0 %v5596_v44  ;;  %v3605_v17 = vpack.c.bf16 %v3580_v23, %v3579_v45 }
 0x23e   : > { %v1816_v29 = vpop.f32.mrf.mxu1 }
 0x23f   : > { %v2148_v21 = vpop.f32.mrf.mxu0  ;;  %v6478_v4 = vadd.f32 %v5163_v11, %v1889_v26  ;;  %v1887_v58 = vadd.f32 %v1816_v29, %v6355_v2 }
 0x240   : > { %v5112_v39 = vpop.f32.mrf.mxu1 }
 0x241   : > { %v5164_v53 = vpop.f32.mrf.mxu0  ;;  %v6484_v55 = vadd.f32 %v2148_v21, %v1887_v58  ;;  %v1890_v50 = vadd.f32 %v5112_v39, %v6357_v20  ;;  %v3581_v58 = vld [vmem:[#allocation2 + $0xd6] sm:$0xff]  ;;  %v3584_v39 = vld [vmem:[#allocation2 + $0xee] sm:$0xff] }
 0x242   : > { %v1819_v1 = vpop.f32.mrf.mxu1 }
 0x243   : > { %v6487_v33 = vpop.f32.mrf.mxu0  ;;  %v6489_v2 = vadd.f32 %v5164_v53, %v1890_v50  ;;  %v6492_v16 = vadd.f32 %v1819_v1, %v6359_v31  ;;  %v3606_v1 = vpack.c.bf16 %v3582_v15, %v3581_v58  ;;  %v3585_v58 = vld [vmem:[#allocation2 + $0xf6] sm:$0xff]  ;;  %v3586_v15 = vld [vmem:[#allocation2 + $0xfe] sm:$0xff] }
 0x244   : > { %v5115_v37 = vpop.f32.mrf.mxu1  ;;  %5414 = vmatmul.mubr.bf16.gmra.mxu1 %v3604_v59  ;;  %v3583_v59 = vld [vmem:[#allocation2 + $0xe6] sm:$0xff] }
 0x245   : > { %v5167_v61 = vpop.f32.mrf.mxu0  ;;  %v1893_v11 = vadd.f32 %v5115_v37, %v6362_v35  ;;  %5417 = vmatprep.mubr.bf16.mxu1 %v3605_v17  ;;  %v5597_v35 = vld [vmem:[%s7044_s6 + $0x20] sm:$0xff]   ;;  %v3607_v17 = vpack.c.bf16 %v3584_v39, %v3583_v59  ;;  %v1556_v39 = vadd.f32 %v6381_v43, %v6379_v32  ;;  %v3608_v59 = vpack.c.bf16 %v3586_v15, %v3585_v58  ;;  %v3589_v15 = vld [vmem:[#allocation2 + $0x116] sm:$0xff] }
 0x246   : > { %v1832_v20 = vpop.f32.mrf.mxu1  ;;  %5439 = vmatprep.subr.bf16.mxu0 %v5597_v35 }
 0x247   : > { %v2164_v26 = vpop.f32.mrf.mxu0  ;;  %v6495_v29 = vadd.f32 %v5167_v61, %v1893_v11  ;;  %v1891_v21 = vadd.f32 %v1832_v20, %v6365_v7  ;;  %5440 = vmatpush3.bf16.msra.mxu0 %v5597_v35 }
 0x248   : > { %v5116_v8 = vpop.f32.mrf.mxu1 }
 0x249   : > { %v5168_v44 = vpop.f32.mrf.mxu0  ;;  %v6498_v31 = vadd.f32 %v2164_v26, %v1891_v21  ;;  %v1894_v53 = vadd.f32 %v5116_v8, %v6367_v56 }
 0x24a   : > { %v1835_v23 = vpop.f32.mrf.mxu1 }
 0x24b   : > { %v6504_v50 = vpop.f32.mrf.mxu0  ;;  %v6506_v45 = vadd.f32 %v5168_v44, %v1894_v53  ;;  %v6509_v7 = vadd.f32 %v1835_v23, %v6369_v49  ;;  %v3588_v44 = vld [vmem:[#allocation2 + $0x10e] sm:$0xff] }
 0x24c   : > { %v5119_v37 = vpop.f32.mrf.mxu1  ;;  %5418 = vmatmul.mubr.bf16.gmra.mxu1 %v3606_v1 }
 0x24d   : > { %v5171_v61 = vpop.f32.mrf.mxu0  ;;  %v1897_v56 = vadd.f32 %v5119_v37, %v6372_v14  ;;  %5421 = vmatprep.mubr.bf16.mxu1 %v3607_v17  ;;  %v5598_v14 = vld [vmem:[%s7044_s6 + $0x18] sm:$0xff]  }
 0x24e   : > { %v1848_v11 = vpop.f32.mrf.mxu1  ;;  %5441 = vmatprep.subr.bf16.mxu0 %v5598_v14 }
 0x24f   : > { %v2180_v20 = vpop.f32.mrf.mxu0  ;;  %v6512_v26 = vadd.f32 %v5171_v61, %v1897_v56  ;;  %v1895_v21 = vadd.f32 %v1848_v11, %v6375_v54  ;;  %v3587_v54 = vld [vmem:[#allocation2 + $0x106] sm:$0xff]  ;;  %5442 = vmatpush3.bf16.msra.mxu0 %v5598_v14  ;;  %v2196_v14 = vadd.f32 %v6392_v18, %v6397_v60  ;;  %v3594_v60 = vld [vmem:[#allocation2 + $0x13e] sm:$0xff] }
 0x250   : > { %v5120_v8 = vpop.f32.mrf.mxu1  ;;  %v3609_v61 = vpack.c.bf16 %v3588_v44, %v3587_v54 }
 0x251   : > { %v5172_v49 = vpop.f32.mrf.mxu0  ;;  %v6517_v53 = vadd.f32 %v2180_v20, %v1895_v21  ;;  %v1898_v35 = vadd.f32 %v5120_v8, %v6377_v6  ;;  %v3590_v8 = vld [vmem:[#allocation2 + $0x11e] sm:$0xff] }
 0x252   : > { %v1851_v23 = vpop.f32.mrf.mxu1  ;;  %v3610_v54 = vpack.c.bf16 %v3590_v8, %v3589_v15 }
 0x253   : > { %v2183_v1 = vpop.f32.mrf.mxu0  ;;  %v6523_v17 = vadd.f32 %v5172_v49, %v1898_v35  ;;  %v1896_v37 = vadd.f32 %v1851_v23, %v1556_v39  ;;  %v3591_v39 = vld [vmem:[#allocation2 + $0x126] sm:$0xff]  ;;  %v3592_v35 = vld [vmem:[#allocation2 + $0x12e] sm:$0xff] }
 0x254   : > { %v5191_v56 = vpop.f32.mrf.mxu1  ;;  %5422 = vmatmul.mubr.bf16.gmra.mxu1 %v3608_v59 }
 0x255   : > { %v5243_v11 = vpop.f32.mrf.mxu0  ;;  %v6525_v32 = vadd.f32 %v2183_v1, %v1896_v37  ;;  %v2529_v6 = vadd.f32 %v5191_v56, %v6386_v40  ;;  %5425 = vmatprep.mubr.bf16.mxu1 %v3609_v61  ;;  %v5599_v56 = vld [vmem:[%s7044_s6 + $0x10] sm:$0xff]  }
 0x256   : > { %v2384_v43 = vpop.f32.mrf.mxu1  ;;  %5443 = vmatprep.subr.bf16.mxu0 %v5599_v56 }
 0x257   : > { %v2716_v20 = vpop.f32.mrf.mxu0  ;;  %v6528_v21 = vadd.f32 %v5243_v11, %v2529_v6  ;;  %v2527_v58 = vadd.f32 %v2384_v43, %v6389_v10  ;;  %v3611_v10 = vpack.c.bf16 %v3592_v35, %v3591_v39  ;;  %5444 = vmatpush3.bf16.msra.mxu0 %v5599_v56  ;;  %v2200_v35 = vadd.f32 %v6408_v47, %v6413_v48 }
 0x258   : > { %v5192_v49 = vpop.f32.mrf.mxu1 }
 0x259   : > { %v5244_v44 = vpop.f32.mrf.mxu0  ;;  %v6533_v23 = vadd.f32 %v2716_v20, %v2527_v58  ;;  %v2530_v40 = vadd.f32 %v5192_v49, %v6394_v19  ;;  %v3593_v19 = vld [vmem:[#allocation2 + $0x136] sm:$0xff] }
 0x25a   : > { %v2387_v1 = vpop.f32.mrf.mxu1  ;;  %v3612_v39 = vpack.c.bf16 %v3594_v60, %v3593_v19  ;;  %v2204_v60 = vadd.f32 %v6422_v28, %v6427_v62 }
 0x25b   : > { %v2719_v59 = vpop.f32.mrf.mxu0  ;;  %v6536_v37 = vadd.f32 %v5244_v44, %v2530_v40  ;;  %v2528_v61 = vadd.f32 %v2387_v1, %v2196_v14  ;;  %v5600_v40 = vld [vmem:[%s7044_s6 + $0x8] sm:$0xff]  }
 0x25c   : > { %v5195_v11 = vpop.f32.mrf.mxu1  ;;  %5426 = vmatmul.mubr.bf16.gmra.mxu1 %v3610_v54  ;;  %5445 = vmatprep.subr.bf16.mxu0 %v5600_v40 }
 0x25d   : > { %v5247_v6 = vpop.f32.mrf.mxu0  ;;  %v6541_v43 = vadd.f32 %v2719_v59, %v2528_v61  ;;  %v2533_v18 = vadd.f32 %v5195_v11, %v6402_v27  ;;  %5429 = vmatprep.mubr.bf16.mxu1 %v3611_v10  ;;  %5446 = vmatpush3.bf16.msra.mxu0 %v5600_v40 }
 0x25e   : > { %v2400_v20 = vpop.f32.mrf.mxu1 }
 0x25f   : > { %v2732_v58 = vpop.f32.mrf.mxu0  ;;  %v6544_v15 = vadd.f32 %v5247_v6, %v2533_v18  ;;  %v2531_v8 = vadd.f32 %v2400_v20, %v6405_v9 }
 0x260   : > { %v5196_v49 = vpop.f32.mrf.mxu1 }
 0x261   : > { %v5248_v44 = vpop.f32.mrf.mxu0  ;;  %v6549_v14 = vadd.f32 %v2732_v58, %v2531_v8  ;;  %v2534_v27 = vadd.f32 %v5196_v49, %v6410_v5 }
 0x262   : > { %v2403_v1 = vpop.f32.mrf.mxu1 }
 0x263   : > { %v2735_v59 = vpop.f32.mrf.mxu0  ;;  %v6555_v54 = vadd.f32 %v5248_v44, %v2534_v27  ;;  %v2532_v61 = vadd.f32 %v2403_v1, %v2200_v35 }
 0x264   : > { %v5199_v9 = vpop.f32.mrf.mxu1  ;;  %5430 = vmatmul.mubr.bf16.gmra.mxu1 %v3612_v39 }
 0x265   : > { %v5251_v10 = vpop.f32.mrf.mxu0  ;;  %v6557_v56 = vadd.f32 %v2735_v59, %v2532_v61  ;;  %v2537_v47 = vadd.f32 %v5199_v9, %v6416_v41  ;;  %v2208_v9 = vadd.f32 %v6436_v13, %v6441_v24 }
 0x266   : > { %v2416_v48 = vpop.f32.mrf.mxu1 }
 0x267   : > { %v2748_v5 = vpop.f32.mrf.mxu0  ;;  %v6560_v11 = vadd.f32 %v5251_v10, %v2537_v47  ;;  %v2535_v6 = vadd.f32 %v2416_v48, %v6419_v38 }
 0x268   : > { %v5200_v18 = vpop.f32.mrf.mxu1 }
 0x269   : > { %v5252_v19 = vpop.f32.mrf.mxu0  ;;  %v6565_v20 = vadd.f32 %v2748_v5, %v2535_v6  ;;  %v2538_v58 = vadd.f32 %v5200_v18, %v6424_v22  ;;  %v5601_v22 = vld [vmem:[%s7044_s6] sm:$0xff]  }
 0x26a   : > { %v2419_v8 = vpop.f32.mrf.mxu1  ;;  %5447 = vmatprep.subr.bf16.mxu0 %v5601_v22 }
 0x26b   : > { %v2751_v49 = vpop.f32.mrf.mxu0  ;;  %v6568_v44 = vadd.f32 %v5252_v19, %v2538_v58  ;;  %v2536_v41 = vadd.f32 %v2419_v8, %v2204_v60  ;;  %5448 = vmatpush3.bf16.msra.mxu0 %v5601_v22 }
 0x26c   : > { %v5203_v39 = vpop.f32.mrf.mxu1 }
 0x26d   : > { %v5255_v35 = vpop.f32.mrf.mxu0  ;;  %v6570_v27 = vadd.f32 %v2751_v49, %v2536_v41  ;;  %v2541_v38 = vadd.f32 %v5203_v39, %v6430_v12  ;;  %v2212_v41 = vadd.f32 %v6453_v57, %v6458_v52 }
 0x26e   : > { %v2432_v40 = vpop.f32.mrf.mxu1 }
 0x26f   : > { %v2764_v1 = vpop.f32.mrf.mxu0  ;;  %v6573_v59 = vadd.f32 %v5255_v35, %v2541_v38  ;;  %v2539_v28 = vadd.f32 %v2432_v40, %v6433_v34 }
 0x270   : > { %v5204_v62 = vpop.f32.mrf.mxu1 }
 0x271   : > { %v5256_v61 = vpop.f32.mrf.mxu0  ;;  %v6581_v10 = vadd.f32 %v2764_v1, %v2539_v28  ;;  %v2542_v47 = vadd.f32 %v5204_v62, %v6438_v36 }
 0x272   : > { %v2435_v12 = vpop.f32.mrf.mxu1 }
 0x273   : > { %v2767_v48 = vpop.f32.mrf.mxu0  ;;  %v6584_v5 = vadd.f32 %v5256_v61, %v2542_v47  ;;  %v2540_v34 = vadd.f32 %v2435_v12, %v2208_v9 }
 0x274   : > { %v5207_v6 = vpop.f32.mrf.mxu1 }
 0x275   : > { %v5259_v18 = vpop.f32.mrf.mxu0  ;;  %v6586_v19 = vadd.f32 %v2767_v48, %v2540_v34  ;;  %v2545_v60 = vadd.f32 %v5207_v6, %v6447_v30 }
 0x276   : > { %v2448_v58 = vpop.f32.mrf.mxu1 }
 0x277   : > { %v2780_v8 = vpop.f32.mrf.mxu0  ;;  %v6589_v13 = vadd.f32 %v5259_v18, %v2545_v60  ;;  %v2543_v24 = vadd.f32 %v2448_v58, %v6450_v46 }
 0x278   : > { %v5208_v36 = vpop.f32.mrf.mxu1 }
 0x279   : > { %v5260_v49 = vpop.f32.mrf.mxu0  ;;  %v6594_v39 = vadd.f32 %v2780_v8, %v2543_v24  ;;  %v2546_v35 = vadd.f32 %v5208_v36, %v6455_v25  ;;  %v2216_v25 = vadd.f32 %v6470_v3, %v6475_v63 }
 0x27a   : > { %v2451_v38 = vpop.f32.mrf.mxu1 }
 0x27b   : > { %v2783_v40 = vpop.f32.mrf.mxu0  ;;  %v6597_v1 = vadd.f32 %v5260_v49, %v2546_v35  ;;  %v2544_v30 = vadd.f32 %v2451_v38, %v2212_v41 }
 0x27c   : > { %v5211_v28 = vpop.f32.mrf.mxu1 }
 0x27d   : > { %v5263_v22 = vpop.f32.mrf.mxu0  ;;  %v6599_v62 = vadd.f32 %v2783_v40, %v2544_v30  ;;  %v2549_v46 = vadd.f32 %v5211_v28, %v6461_v51 }
 0x27e   : > { %v2464_v61 = vpop.f32.mrf.mxu1 }
 0x27f   : > { %v2796_v9 = vpop.f32.mrf.mxu0  ;;  %v6602_v47 = vadd.f32 %v5263_v22, %v2549_v46  ;;  %v2547_v57 = vadd.f32 %v2464_v61, %v6467_v42 }
 0x280   : > { %v5212_v52 = vpop.f32.mrf.mxu1 }
 0x281   : > { %v5264_v12 = vpop.f32.mrf.mxu0  ;;  %v6607_v48 = vadd.f32 %v2796_v9, %v2547_v57  ;;  %v2550_v34 = vadd.f32 %v5212_v52, %v6472_v0  ;;  %v2220_v0 = vadd.f32 %v6487_v33, %v6492_v16 }
 0x282   : > { %v2467_v6 = vpop.f32.mrf.mxu1 }
 0x283   : > { %v2799_v18 = vpop.f32.mrf.mxu0  ;;  %v6610_v60 = vadd.f32 %v5264_v12, %v2550_v34  ;;  %v2548_v51 = vadd.f32 %v2467_v6, %v2216_v25 }
 0x284   : > { %v5215_v58 = vpop.f32.mrf.mxu1 }
 0x285   : > { %v5267_v8 = vpop.f32.mrf.mxu0  ;;  %v6612_v24 = vadd.f32 %v2799_v18, %v2548_v51  ;;  %v2553_v42 = vadd.f32 %v5215_v58, %v6478_v4 }
 0x286   : > { %v2480_v36 = vpop.f32.mrf.mxu1 }
 0x287   : > { %v2812_v49 = vpop.f32.mrf.mxu0  ;;  %v6615_v41 = vadd.f32 %v5267_v8, %v2553_v42  ;;  %v2551_v3 = vadd.f32 %v2480_v36, %v6484_v55 }
 0x288   : > { %v5216_v63 = vpop.f32.mrf.mxu1 }
 0x289   : > { %v5268_v35 = vpop.f32.mrf.mxu0  ;;  %v6620_v38 = vadd.f32 %v2812_v49, %v2551_v3  ;;  %v2554_v40 = vadd.f32 %v5216_v63, %v6489_v2  ;;  %v2224_v2 = vadd.f32 %v6504_v50, %v6509_v7 }
 0x28a   : > { %v2483_v30 = vpop.f32.mrf.mxu1 }
 0x28b   : > { %v2815_v28 = vpop.f32.mrf.mxu0  ;;  %v6623_v22 = vadd.f32 %v5268_v35, %v2554_v40  ;;  %v2552_v4 = vadd.f32 %v2483_v30, %v2220_v0 }
 0x28c   : > { %v5219_v46 = vpop.f32.mrf.mxu1 }
 0x28d   : > { %v5271_v61 = vpop.f32.mrf.mxu0  ;;  %v6625_v9 = vadd.f32 %v2815_v28, %v2552_v4  ;;  %v2557_v55 = vadd.f32 %v5219_v46, %v6495_v29 }
 0x28e   : > { %v2496_v57 = vpop.f32.mrf.mxu1 }
 0x28f   : > { %v2828_v52 = vpop.f32.mrf.mxu0  ;;  %v6628_v12 = vadd.f32 %v5271_v61, %v2557_v55  ;;  %v2555_v33 = vadd.f32 %v2496_v57, %v6498_v31 }
 0x290   : > { %v5220_v16 = vpop.f32.mrf.mxu1 }
 0x291   : > { %v5272_v25 = vpop.f32.mrf.mxu0  ;;  %v6633_v34 = vadd.f32 %v2828_v52, %v2555_v33  ;;  %v2558_v6 = vadd.f32 %v5220_v16, %v6506_v45 }
 0x292   : > { %v2499_v18 = vpop.f32.mrf.mxu1 }
 0x293   : > { %v2831_v51 = vpop.f32.mrf.mxu0  ;;  %v6636_v58 = vadd.f32 %v5272_v25, %v2558_v6  ;;  %v2556_v29 = vadd.f32 %v2499_v18, %v2224_v2 }
 0x294   : > { %v5223_v8 = vpop.f32.mrf.mxu1 }
 0x295   : > { %v5275_v42 = vpop.f32.mrf.mxu0  ;;  %v6638_v36 = vadd.f32 %v2831_v51, %v2556_v29  ;;  %v2561_v31 = vadd.f32 %v5223_v8, %v6512_v26 }
 0x296   : > { %v2512_v49 = vpop.f32.mrf.mxu1 }
 0x297   : > { %v2844_v3 = vpop.f32.mrf.mxu0  ;;  %v6641_v63 = vadd.f32 %v5275_v42, %v2561_v31  ;;  %v2559_v50 = vadd.f32 %v2512_v49, %v6517_v53 }
 0x298   : > { %v5224_v7 = vpop.f32.mrf.mxu1 }
 0x299   : > { %v5276_v35 = vpop.f32.mrf.mxu0  ;;  %v6644_v45 = vadd.f32 %v2844_v3, %v2559_v50  ;;  %v2562_v0 = vadd.f32 %v5224_v7, %v6523_v17 }
 0x29a   : > { %v2515_v40 = vpop.f32.mrf.mxu1 }
 0x29b   : > { %v2847_v30 = vpop.f32.mrf.mxu0  ;;  %v6647_v28 = vadd.f32 %v5276_v35, %v2562_v0  ;;  %v2560_v4 = vadd.f32 %v2515_v40, %v6525_v32 }
 0x29c   : > { %v5295_v46 = vpop.f32.mrf.mxu1 }
 0x29d   : > { %v6650_v26 = vpop.f32.mrf.mxu0  ;;  %v6652_v61 = vadd.f32 %v2847_v30, %v2560_v4  ;;  %v6655_v55 = vadd.f32 %v5295_v46, %v6528_v21 }
 0x29e   : > { %v3048_v53 = vpop.f32.mrf.mxu1 }
 0x29f   : > { %v6658_v57 = vadd.f32 %v3048_v53, %v6533_v23  ;;  %v6660_v52 = vpop.f32.mrf.mxu0 }
 0x2a0   : > { %v5296_v17 = vpop.f32.mrf.mxu1 }
 0x2a1   : > { %v6663_v33 = vadd.f32 %v5296_v17, %v6536_v37  ;;  %v6668_v25 = vpop.f32.mrf.mxu0 }
 0x2a2   : > { %v3051_v16 = vpop.f32.mrf.mxu1 }
 0x2a3   : > { %v6666_v32 = vadd.f32 %v3051_v16, %v6541_v43  ;;  %v6676_v18 = vpop.f32.mrf.mxu0 }
 0x2a4   : > { %v5299_v2 = vpop.f32.mrf.mxu1 }
 0x2a5   : > { %v6671_v21 = vadd.f32 %v5299_v2, %v6544_v15  ;;  %v6684_v8 = vpop.f32.mrf.mxu0 }
 0x2a6   : > { %v3064_v6 = vpop.f32.mrf.mxu1 }
 0x2a7   : > { %v6674_v23 = vadd.f32 %v3064_v6, %v6549_v14  ;;  %v6692_v49 = vpop.f32.mrf.mxu0 }
 0x2a8   : > { %v5300_v51 = vpop.f32.mrf.mxu1 }
 0x2a9   : > { %v6679_v37 = vadd.f32 %v5300_v51, %v6555_v54  ;;  %v6700_v7 = vpop.f32.mrf.mxu0 }
 0x2aa   : > { %v3067_v29 = vpop.f32.mrf.mxu1 }
 0x2ab   : > { %v6682_v43 = vadd.f32 %v3067_v29, %v6557_v56  ;;  %v6708_v40 = vpop.f32.mrf.mxu0 }
 0x2ac   : > { %v5303_v42 = vpop.f32.mrf.mxu1 }
 0x2ad   : > { %v6687_v15 = vadd.f32 %v5303_v42, %v6560_v11  ;;  %v6716_v46 = vpop.f32.mrf.mxu0 }
 0x2ae   : > { %v3080_v31 = vpop.f32.mrf.mxu1 }
 0x2af   : > { %v6690_v14 = vadd.f32 %v3080_v31, %v6565_v20  ;;  %v6724_v16 = vpop.f32.mrf.mxu0 }
 0x2b0   : > { %v5304_v3 = vpop.f32.mrf.mxu1 }
 0x2b1   : > { %v6695_v54 = vadd.f32 %v5304_v3, %v6568_v44  ;;  %v6732_v51 = vpop.f32.mrf.mxu0 }
 0x2b2   : > { %v3083_v50 = vpop.f32.mrf.mxu1 }
 0x2b3   : > { %v6698_v56 = vadd.f32 %v3083_v50, %v6570_v27  ;;  %v6740_v31 = vpop.f32.mrf.mxu0 }
 0x2b4   : > { %v5307_v35 = vpop.f32.mrf.mxu1 }
 0x2b5   : > { %v6703_v11 = vadd.f32 %v5307_v35, %v6573_v59  ;;  %v6748_v35 = vpop.f32.mrf.mxu0 }
 0x2b6   : > { %v3096_v0 = vpop.f32.mrf.mxu1 }
 0x2b7   : > { %v6706_v20 = vadd.f32 %v3096_v0, %v6581_v10 }
 0x2b8   : > { %v5308_v30 = vpop.f32.mrf.mxu1 }
 0x2b9   : > { %v6711_v44 = vadd.f32 %v5308_v30, %v6584_v5 }
 0x2ba   : > { %v3099_v4 = vpop.f32.mrf.mxu1 }
 0x2bb   : > { %v6714_v27 = vadd.f32 %v3099_v4, %v6586_v19  ;;  %v6756_v4 = vpop.f32.mrf.mxu0 }
 0x2bc   : > { %v5311_v53 = vpop.f32.mrf.mxu1 }
 0x2bd   : > { %v6719_v59 = vadd.f32 %v5311_v53, %v6589_v13 }
 0x2be   : > { %v3112_v17 = vpop.f32.mrf.mxu1 }
 0x2bf   : > { %v6722_v10 = vadd.f32 %v3112_v17, %v6594_v39 }
 0x2c0   : > { %v5312_v2 = vpop.f32.mrf.mxu1 }
 0x2c1   : > { %v6727_v5 = vadd.f32 %v5312_v2, %v6597_v1  ;;  %v6764_v2 = vpop.f32.mrf.mxu0 }
 0x2c2   : > { %v3115_v6 = vpop.f32.mrf.mxu1 }
 0x2c3   : > { %v6730_v19 = vadd.f32 %v3115_v6, %v6599_v62 }
 0x2c4   : > { %v5315_v29 = vpop.f32.mrf.mxu1 }
 0x2c5   : > { %v6735_v13 = vadd.f32 %v5315_v29, %v6602_v47 }
 0x2c6   : > { %v3128_v42 = vpop.f32.mrf.mxu1 }
 0x2c7   : > { %v6738_v39 = vadd.f32 %v3128_v42, %v6607_v48  ;;  %v6772_v42 = vpop.f32.mrf.mxu0 }
 0x2c8   : > { %v5316_v3 = vpop.f32.mrf.mxu1 }
 0x2c9   : > { %v6743_v1 = vadd.f32 %v5316_v3, %v6610_v60 }
 0x2ca   : > { %v3131_v50 = vpop.f32.mrf.mxu1 }
 0x2cb   : > { %v6746_v62 = vadd.f32 %v3131_v50, %v6612_v24 }
 0x2cc   : > { %v5319_v0 = vpop.f32.mrf.mxu1 }
 0x2cd   : > { %v6751_v47 = vadd.f32 %v5319_v0, %v6615_v41  ;;  %v6780_v0 = vpop.f32.mrf.mxu0 }
 0x2ce   : > { %v3144_v30 = vpop.f32.mrf.mxu1 }
 0x2cf   : > { %v6754_v48 = vadd.f32 %v3144_v30, %v6620_v38 }
 0x2d0   : > { %v5320_v53 = vpop.f32.mrf.mxu1 }
 0x2d1   : > { %v6759_v60 = vadd.f32 %v5320_v53, %v6623_v22 }
 0x2d2   : > { %v3147_v17 = vpop.f32.mrf.mxu1 }
 0x2d3   : > { %v6762_v24 = vadd.f32 %v3147_v17, %v6625_v9  ;;  %v6788_v17 = vpop.f32.mrf.mxu0 }
 0x2d4   : > { %v5323_v6 = vpop.f32.mrf.mxu1 }
 0x2d5   : > { %v6767_v41 = vadd.f32 %v5323_v6, %v6628_v12 }
 0x2d6   : > { %v3160_v29 = vpop.f32.mrf.mxu1 }
 0x2d7   : > { %v6770_v38 = vadd.f32 %v3160_v29, %v6633_v34 }
 0x2d8   : > { %v5324_v3 = vpop.f32.mrf.mxu1 }
 0x2d9   : > { %v6775_v22 = vadd.f32 %v5324_v3, %v6636_v58 }
 0x2da   : > { %v3163_v50 = vpop.f32.mrf.mxu1 }
 0x2db   : > { %v6778_v9 = vadd.f32 %v3163_v50, %v6638_v36  ;;  %v3525_v36 = vadd.f32 %v6650_v26, %v6655_v55  ;;  %v6798_v50 = vpop.f32.mrf.mxu0 }
 0x2dc   : > { %v5327_v30 = vpop.f32.mrf.mxu1 }
 0x2dd   : > { %v6783_v12 = vadd.f32 %v5327_v30, %v6641_v63  ;;  %v6809_v55 = vpop.f32.mrf.mxu0 }
 0x2de   : > { %v3176_v53 = vpop.f32.mrf.mxu1 }
 0x2df   : > { %v6786_v34 = vadd.f32 %v3176_v53, %v6644_v45  ;;  %v3523_v45 = vadd.f32 %v6660_v52, %v6658_v57  ;;  %v6805_v53 = vld [vmem:[%s7043_s5] ss:$0 sm:$0xff] }
 0x2e0   : > { %v5328_v6 = vpop.f32.mrf.mxu1 }
 0x2e1   : > { %7047 = vst [vmem:[#allocation3_spill] sm:$0xff] %v6786_v34  ;;  %v6791_v58 = vadd.f32 %v5328_v6, %v6647_v28  ;;  %v3526_v6 = vadd.f32 %v6668_v25, %v6663_v33  ;;  %v3527_v33 = vadd.f32 %v6692_v49, %v6674_v23  ;;  %v6820_v25 = vpop.f32.mrf.mxu0  ;;  %v3528_v23 = vadd.f32 %v6708_v40, %v6682_v43 }
 0x2e2   : > { %v3179_v29 = vpop.f32.mrf.mxu1 }
 0x2e3   : > { %7048 = vst [vmem:[#allocation4_spill] sm:$0xff] %v6791_v58  ;;  %v6796_v3 = vadd.f32 %v3179_v29, %v6652_v61  ;;  %v3524_v29 = vadd.f32 %v6676_v18, %v6666_v32 }
 0x2e4   : > { %v5399_v63 = vpop.f32.mrf.mxu1 }
 0x2e5   : > { %7049 = vst [vmem:[#allocation5_spill] sm:$0xff] %v6796_v3  ;;  %v3857_v30 = vadd.f32 %v5399_v63, %v3525_v36  ;;  %v3529_v36 = vadd.f32 %v6684_v8, %v6671_v21 }
 0x2e6   : > { %v3712_v28 = vpop.f32.mrf.mxu1 }
 0x2e7   : > { %v3855_v26 = vadd.f32 %v3712_v28, %v3523_v45  ;;  %v3900_v3 = vadd.f32 %v6805_v53, %v3857_v30 }
 0x2e8   : > { %v5400_v61 = vpop.f32.mrf.mxu1 }
 0x2e9   : > { %v3858_v57 = vadd.f32 %v5400_v61, %v3526_v6  ;;  %v3898_v63 = vadd.f32 %v6805_v53, %v3855_v26  ;;  %v3936_v28 = vmax.f32 %v3900_v3, 0.0  ;;  %v3530_v6 = vadd.f32 %v6700_v7, %v6679_v37 }
 0x2ea   : > { %v3715_v52 = vpop.f32.mrf.mxu1 }
 0x2eb   : > { %v3901_v58 = vadd.f32 %v6805_v53, %v3858_v57  ;;  %v3856_v34 = vadd.f32 %v3715_v52, %v3524_v29  ;;  %v3934_v8 = vmax.f32 %v3898_v63, 0.0  ;;  %v6825_v29 = vpop.f32.mrf.mxu0 }
 0x2ec   : > { %v5403_v45 = vpop.f32.mrf.mxu1 }
 0x2ed   : > { %v3937_v32 = vmax.f32 %v3901_v58, 0.0  ;;  %v3899_v18 = vadd.f32 %v6805_v53, %v3856_v34  ;;  %v3861_v30 = vadd.f32 %v5403_v45, %v3529_v36  ;;  %v3533_v36 = vadd.f32 %v6716_v46, %v6687_v15  ;;  %v6836_v45 = vpop.f32.mrf.mxu0 }
 0x2ee   : > { %v3728_v21 = vpop.f32.mrf.mxu1  ;;  %v3534_v15 = vadd.f32 %v6732_v51, %v6695_v54 }
 0x2ef   : > { %v3971_v26 = vpack.c.bf16 %v3937_v32, %v3936_v28  ;;  %v3935_v61 = vmax.f32 %v3899_v18, 0.0  ;;  %v3859_v57 = vadd.f32 %v3728_v21, %v3527_v33  ;;  %v3904_v49 = vadd.f32 %v6805_v53, %v3861_v30 }
 0x2f0   : > { %v5404_v52 = vpop.f32.mrf.mxu1  ;;  %v3531_v33 = vadd.f32 %v6724_v16, %v6690_v14  ;;  %v3532_v16 = vadd.f32 %v6740_v31, %v6698_v56 }
 0x2f1   : > { %v3862_v58 = vadd.f32 %v5404_v52, %v3530_v6  ;;  %v3970_v3 = vpack.c.bf16 %v3935_v61, %v3934_v8  ;;  %v3902_v37 = vadd.f32 %v6805_v53, %v3859_v57  ;;  %v3940_v40 = vmax.f32 %v3904_v49, 0.0  ;;  %v6841_v61 = vpop.f32.mrf.mxu0 }
 0x2f2   : > { %v3731_v34 = vpop.f32.mrf.mxu1  ;;  %v3537_v49 = vadd.f32 %v6748_v35, %v6703_v11  ;;  %v3538_v11 = vadd.f32 %v6764_v2, %v6711_v44 }
 0x2f3   : > { %v3905_v7 = vadd.f32 %v6805_v53, %v3862_v58  ;;  %v3860_v63 = vadd.f32 %v3731_v34, %v3528_v23  ;;  %5449 = vmatprep.mubr.bf16.mxu0 %v3970_v3  ;;  %v3938_v30 = vmax.f32 %v3902_v37, 0.0  ;;  %v3535_v3 = vadd.f32 %v6756_v4, %v6706_v20  ;;  %v6852_v34 = vpop.f32.mrf.mxu0 }
 0x2f4   : > { %v5407_v43 = vpop.f32.mrf.mxu1  ;;  %5450 = vmatmul.mubr.bf16.vlgmr.msra.gmra.mxu0 %v3971_v26  ;;  %v3536_v4 = vadd.f32 %v6772_v42, %v6714_v27 }
 0x2f5   : > { %v3941_v28 = vmax.f32 %v3905_v7, 0.0  ;;  %v3903_v32 = vadd.f32 %v6805_v53, %v3860_v63  ;;  %v3865_v18 = vadd.f32 %v5407_v43, %v3533_v36 }
 0x2f6   : > { %v3744_v46 = vpop.f32.mrf.mxu1 }
 0x2f7   : > { %v3973_v6 = vpack.c.bf16 %v3941_v28, %v3940_v40  ;;  %v3939_v21 = vmax.f32 %v3903_v32, 0.0  ;;  %v3863_v8 = vadd.f32 %v3744_v46, %v3531_v33  ;;  %v3908_v26 = vadd.f32 %v6805_v53, %v3865_v18  ;;  %v6857_v28 = vpop.f32.mrf.mxu0 }
 0x2f8   : > { %v5408_v14 = vpop.f32.mrf.mxu1 }
 0x2f9   : > { %v3866_v57 = vadd.f32 %v5408_v14, %v3534_v15  ;;  %v3972_v52 = vpack.c.bf16 %v3939_v21, %v3938_v30  ;;  %v3906_v54 = vadd.f32 %v6805_v53, %v3863_v8  ;;  %v3944_v31 = vmax.f32 %v3908_v26, 0.0  ;;  %v5372_v8 = vpop.f32.mrf.mxu0 }
 0x2fa   : > { %v3747_v23 = vpop.f32.mrf.mxu1  ;;  %v3541_v30 = vadd.f32 %v6780_v0, %v6719_v59  ;;  %v3539_v21 = vadd.f32 %v6788_v17, %v6722_v10  ;;  %v3542_v59 = vadd.f32 %v6798_v50, %v6727_v5  ;;  %v3540_v10 = vadd.f32 %v6809_v55, %v6730_v19 }
 0x2fb   : > { %v3909_v51 = vadd.f32 %v6805_v53, %v3866_v57  ;;  %v3864_v58 = vadd.f32 %v3747_v23, %v3532_v16  ;;  %5453 = vmatprep.mubr.bf16.mxu0 %v3972_v52  ;;  %v3942_v63 = vmax.f32 %v3906_v54, 0.0  ;;  %v3479_v54 = vpop.f32.mrf.mxu0 }
 0x2fc   : > { %v5411_v56 = vpop.f32.mrf.mxu1  ;;  %5454 = vmatmul.mubr.bf16.gmra.mxu0 %v3973_v6 }
 0x2fd   : > { %v3945_v36 = vmax.f32 %v3909_v51, 0.0  ;;  %v3907_v37 = vadd.f32 %v6805_v53, %v3864_v58  ;;  %v3869_v7 = vadd.f32 %v5411_v56, %v3537_v49 }
 0x2fe   : > { %v3760_v35 = vpop.f32.mrf.mxu1 }
 0x2ff   : > { %v3975_v33 = vpack.c.bf16 %v3945_v36, %v3944_v31  ;;  %v3943_v43 = vmax.f32 %v3907_v37, 0.0  ;;  %v3867_v40 = vadd.f32 %v3760_v35, %v3535_v3  ;;  %v3912_v32 = vadd.f32 %v6805_v53, %v3869_v7  ;;  %v5375_v7 = vpop.f32.mrf.mxu0 }
 0x300   : > { %v5412_v20 = vpop.f32.mrf.mxu1  ;;  %v3545_v31 = vadd.f32 %v6820_v25, %v6735_v13  ;;  %v3543_v37 = vadd.f32 %v6825_v29, %v6738_v39  ;;  %v3546_v13 = vadd.f32 %v6836_v45, %v6743_v1  ;;  %v3544_v39 = vadd.f32 %v6841_v61, %v6746_v62 }
 0x301   : > { %v3870_v18 = vadd.f32 %v5412_v20, %v3538_v11  ;;  %v3974_v15 = vpack.c.bf16 %v3943_v43, %v3942_v63  ;;  %v3910_v44 = vadd.f32 %v6805_v53, %v3867_v40  ;;  %v3948_v27 = vmax.f32 %v3912_v32, 0.0 }
 0x302   : > { %v3763_v46 = vpop.f32.mrf.mxu1 }
 0x303   : > { %v3913_v2 = vadd.f32 %v6805_v53, %v3870_v18  ;;  %v3868_v6 = vadd.f32 %v3763_v46, %v3536_v4  ;;  %5457 = vmatprep.mubr.bf16.mxu0 %v3974_v15  ;;  %v3946_v57 = vmax.f32 %v3910_v44, 0.0  ;;  %v3492_v4 = vpop.f32.mrf.mxu0 }
 0x304   : > { %v5415_v14 = vpop.f32.mrf.mxu1  ;;  %5458 = vmatmul.mubr.bf16.gmra.mxu0 %v3975_v33 }
 0x305   : > { %v3949_v42 = vmax.f32 %v3913_v2, 0.0  ;;  %v3911_v16 = vadd.f32 %v6805_v53, %v3868_v6  ;;  %v3873_v26 = vadd.f32 %v5415_v14, %v3541_v30  ;;  %v3549_v30 = vadd.f32 %v6852_v34, %v6751_v47  ;;  %v5376_v6 = vpop.f32.mrf.mxu0 }
 0x306   : > { %v3776_v0 = vpop.f32.mrf.mxu1  ;;  %v3547_v2 = vadd.f32 %v6857_v28, %v6754_v48 }
 0x307   : > { %v3977_v52 = vpack.c.bf16 %v3949_v42, %v3948_v27  ;;  %v3947_v23 = vmax.f32 %v3911_v16, 0.0  ;;  %v3871_v49 = vadd.f32 %v3776_v0, %v3539_v21  ;;  %v3916_v17 = vadd.f32 %v6805_v53, %v3873_v26  ;;  %v3495_v0 = vpop.f32.mrf.mxu0 }
 0x308   : > { %v5416_v51 = vpop.f32.mrf.mxu1  ;;  %v3550_v42 = vadd.f32 %v5372_v8, %v6759_v60 }
 0x309   : > { %v3874_v58 = vadd.f32 %v5416_v51, %v3542_v59  ;;  %v3976_v3 = vpack.c.bf16 %v3947_v23, %v3946_v57  ;;  %v3914_v5 = vadd.f32 %v6805_v53, %v3871_v49  ;;  %v3952_v19 = vmax.f32 %v3916_v17, 0.0  ;;  %v5379_v49 = vpop.f32.mrf.mxu0 }
 0x30a   : > { %v3779_v56 = vpop.f32.mrf.mxu1 }
 0x30b   : > { %v3917_v50 = vadd.f32 %v6805_v53, %v3874_v58  ;;  %v3872_v36 = vadd.f32 %v3779_v56, %v3540_v10  ;;  %5461 = vmatprep.mubr.bf16.mxu0 %v3976_v3  ;;  %v3950_v33 = vmax.f32 %v3914_v5, 0.0  ;;  %v3553_v10 = vadd.f32 %v5375_v7, %v6767_v41 }
 0x30c   : > { %v5419_v11 = vpop.f32.mrf.mxu1  ;;  %5462 = vmatmul.mubr.bf16.gmra.mxu0 %v3977_v52  ;;  %v3548_v52 = vadd.f32 %v3479_v54, %v6762_v24  ;;  %v3551_v58 = vadd.f32 %v3492_v4, %v6770_v38  ;;  %v3554_v5 = vadd.f32 %v5376_v6, %v6775_v22 }
 0x30d   : > { %v3953_v55 = vmax.f32 %v3917_v50, 0.0  ;;  %v3915_v35 = vadd.f32 %v6805_v53, %v3872_v36  ;;  %v3877_v63 = vadd.f32 %v5419_v11, %v3545_v31  ;;  %v3508_v50 = vpop.f32.mrf.mxu0 }
 0x30e   : > { %v3792_v25 = vpop.f32.mrf.mxu1 }
 0x30f   : > { %v3979_v43 = vpack.c.bf16 %v3953_v55, %v3952_v19  ;;  %v3951_v40 = vmax.f32 %v3915_v35, 0.0  ;;  %v3875_v20 = vadd.f32 %v3792_v25, %v3543_v37  ;;  %v3920_v29 = vadd.f32 %v6805_v53, %v3877_v63 }
 0x310   : > { %v5420_v32 = vpop.f32.mrf.mxu1  ;;  %v3552_v55 = vadd.f32 %v3495_v0, %v6778_v9 }
 0x311   : > { %v3878_v18 = vadd.f32 %v5420_v32, %v3546_v13  ;;  %v3978_v15 = vpack.c.bf16 %v3951_v40, %v3950_v33  ;;  %v3918_v1 = vadd.f32 %v6805_v53, %v3875_v20  ;;  %v3956_v62 = vmax.f32 %v3920_v29, 0.0  ;;  %v5380_v13 = vpop.f32.mrf.mxu0  ;;  %v7050_v20 = vld [vmem:[#allocation3_spill] sm:$0xff] }
 0x312   : > { %v3795_v46 = vpop.f32.mrf.mxu1  ;;  %v3557_v33 = vadd.f32 %v5379_v49, %v6783_v12  ;;  %v3555_v4 = vadd.f32 %v3508_v50, %v7050_v20 }
 0x313   : > { %v3921_v45 = vadd.f32 %v6805_v53, %v3878_v18  ;;  %v3876_v44 = vadd.f32 %v3795_v46, %v3544_v39  ;;  %5465 = vmatprep.mubr.bf16.mxu0 %v3978_v15  ;;  %v3954_v34 = vmax.f32 %v3918_v1, 0.0  ;;  %v7051_v15 = vld [vmem:[#allocation4_spill] sm:$0xff] }
 0x314   : > { %v5423_v21 = vpop.f32.mrf.mxu1  ;;  %5466 = vmatmul.mubr.bf16.gmra.mxu0 %v3979_v43  ;;  %v3558_v46 = vadd.f32 %v5380_v13, %v7051_v15  ;;  %v5609_v15 = vld [vmem:[%s5719_s16 + $0x28] sm:$0xff] }
 0x315   : > { %v3957_v61 = vmax.f32 %v3921_v45, 0.0  ;;  %v3919_v14 = vadd.f32 %v6805_v53, %v3876_v44  ;;  %v3881_v27 = vadd.f32 %v5423_v21, %v3549_v30  ;;  %v3511_v30 = vpop.f32.mrf.mxu0  ;;  %v7052_v21 = vld [vmem:[#allocation5_spill] sm:$0xff] }
 0x316   : > { %v3808_v47 = vpop.f32.mrf.mxu1 }
 0x317   : > { %v3981_v16 = vpack.c.bf16 %v3957_v61, %v3956_v62  ;;  %v3955_v26 = vmax.f32 %v3919_v14, 0.0  ;;  %v3879_v59 = vadd.f32 %v3808_v47, %v3547_v2  ;;  %v3924_v48 = vadd.f32 %v6805_v53, %v3881_v27 }
 0x318   : > { %v5424_v57 = vpop.f32.mrf.mxu1  ;;  %v3556_v62 = vadd.f32 %v3511_v30, %v7052_v21 }
 0x319   : > { %v3882_v28 = vadd.f32 %v5424_v57, %v3550_v42  ;;  %v3980_v23 = vpack.c.bf16 %v3955_v26, %v3954_v34  ;;  %v3922_v17 = vadd.f32 %v6805_v53, %v3879_v59  ;;  %v3960_v56 = vmax.f32 %v3924_v48, 0.0 }
 0x31a   : > { %v3811_v51 = vpop.f32.mrf.mxu1 }
 0x31b   : > { %v3925_v60 = vadd.f32 %v6805_v53, %v3882_v28  ;;  %v3880_v8 = vadd.f32 %v3811_v51, %v3548_v52  ;;  %5469 = vmatprep.mubr.bf16.mxu0 %v3980_v23  ;;  %v3958_v41 = vmax.f32 %v3922_v17, 0.0  ;;  %v6918_v23 = vld [vmem:[%s7045_s7] ss:$0 sm:$0xff]  ;;  %v5602_v17 = vld [vmem:[%s5719_s16 + $0x10] sm:$0xff] }
 0x31c   : > { %v5427_v3 = vpop.f32.mrf.mxu1  ;;  %5470 = vmatmul.mubr.bf16.gmra.mxu0 %v3981_v16 }
 0x31d   : > { %v3961_v24 = vmax.f32 %v3925_v60, 0.0  ;;  %v3923_v54 = vadd.f32 %v6805_v53, %v3880_v8  ;;  %v3885_v31 = vadd.f32 %v5427_v3, %v3553_v10  ;;  %v5603_v3 = vld [vmem:[%s5719_s16] sm:$0xff] }
 0x31e   : > { %v3824_v36 = vpop.f32.mrf.mxu1 }
 0x31f   : > { %v3983_v37 = vpack.c.bf16 %v3961_v24, %v3960_v56  ;;  %v3959_v7 = vmax.f32 %v3923_v54, 0.0  ;;  %v3883_v11 = vadd.f32 %v3824_v36, %v3551_v58  ;;  %v3928_v38 = vadd.f32 %v6805_v53, %v3885_v31 }
 0x320   : > { %v5428_v19 = vpop.f32.mrf.mxu1 }
 0x321   : > { %v3886_v35 = vadd.f32 %v5428_v19, %v3554_v5  ;;  %v3982_v63 = vpack.c.bf16 %v3959_v7, %v3958_v41  ;;  %v3926_v43 = vadd.f32 %v6805_v53, %v3883_v11  ;;  %v3964_v39 = vmax.f32 %v3928_v38, 0.0  ;;  %v5604_v5 = vld [vmem:[%s5719_s16 + $0x18] sm:$0xff]  ;;  %v5605_v7 = vld [vmem:[%s5719_s16 + $0x8] sm:$0xff] }
 0x322   : > { %v3827_v25 = vpop.f32.mrf.mxu1 }
 0x323   : > { %v3929_v22 = vadd.f32 %v6805_v53, %v3886_v35  ;;  %v3884_v40 = vadd.f32 %v3827_v25, %v3552_v55  ;;  %5473 = vmatprep.mubr.bf16.mxu0 %v3982_v63  ;;  %v3962_v12 = vmax.f32 %v3926_v43, 0.0  ;;  %v5606_v35 = vld [vmem:[%s5719_s16 + $0x30] sm:$0xff]  ;;  %v5607_v43 = vld [vmem:[%s5719_s16 + $0x20] sm:$0xff] }
 0x324   : > { %v5431_v32 = vpop.f32.mrf.mxu1  ;;  %5474 = vmatmul.mubr.bf16.gmra.mxu0 %v3983_v37 }
 0x325   : > { %v3965_v9 = vmax.f32 %v3929_v22, 0.0  ;;  %v3927_v29 = vadd.f32 %v6805_v53, %v3884_v40  ;;  %v3889_v18 = vadd.f32 %v5431_v32, %v3557_v33  ;;  %v5608_v32 = vld [vmem:[%s5719_s16 + $0x38] sm:$0xff] }
 0x326   : > { %v3840_v1 = vpop.f32.mrf.mxu1 }
 0x327   : > { %v3985_v45 = vpack.c.bf16 %v3965_v9, %v3964_v39  ;;  %v3963_v44 = vmax.f32 %v3927_v29, 0.0  ;;  %v3887_v2 = vadd.f32 %v3840_v1, %v3555_v4  ;;  %v3932_v61 = vadd.f32 %v6805_v53, %v3889_v18 }
 0x328   : > { %v5432_v6 = vpop.f32.mrf.mxu1 }
 0x329   : > { %v3890_v14 = vadd.f32 %v5432_v6, %v3558_v46  ;;  %v3984_v27 = vpack.c.bf16 %v3963_v44, %v3962_v12  ;;  %v3930_v47 = vadd.f32 %v6805_v53, %v3887_v2  ;;  %v3968_v26 = vmax.f32 %v3932_v61, 0.0 }
 0x32a   : > { %v3843_v42 = vpop.f32.mrf.mxu1 }
 0x32b   : > { %v3933_v34 = vadd.f32 %v6805_v53, %v3890_v14  ;;  %v3888_v16 = vadd.f32 %v3843_v42, %v3556_v62  ;;  %5477 = vmatprep.mubr.bf16.mxu0 %v3984_v27  ;;  %v3966_v57 = vmax.f32 %v3930_v47, 0.0  ;;  %v5611_v62 = vld [vmem:[%s5719_s16 + $0x40] sm:$0xff]  ;;  %v5612_v47 = vld [vmem:[%s5719_s16 + $0x58] sm:$0xff] }
 0x32c   : > { %5478 = vmatmul.mubr.bf16.gmra.mxu0 %v3985_v45  ;;  %v5610_v45 = vld [vmem:[%s5719_s16 + $0x50] sm:$0xff] }
 0x32d   : > { %v3969_v59 = vmax.f32 %v3933_v34, 0.0  ;;  %v3931_v0 = vadd.f32 %v6805_v53, %v3888_v16 }
 0x32f   : > { %v3987_v52 = vpack.c.bf16 %v3969_v59, %v3968_v26  ;;  %v3967_v48 = vmax.f32 %v3931_v0, 0.0  ;;  %v5613_v0 = vld [vmem:[%s5719_s16 + $0x48] sm:$0xff] }
 0x331   : > { %v3986_v28 = vpack.c.bf16 %v3967_v48, %v3966_v57 }
 0x333   : > { %5481 = vmatprep.mubr.bf16.mxu0 %v3986_v28 }
 0x334   : > { %5482 = vmatmul.mubr.bf16.gmra.mxu0 %v3987_v52 }
 0x3b4   : > { %v5451_v49 = vpop.f32.mrf.mxu0 }
 0x3b5   : > { %v4102_v51 = vadd.f32 %v5451_v49, %v6918_v23  ;;  %v5614_v49 = vld [vmem:[%s5719_s16 + $0x70] sm:$0xff] }
 0x3b6   : > { %v4093_v10 = vpop.f32.mrf.mxu0 }
 0x3b7   : > { %v4238_v60 = vadd.f32 %v5602_v17, %v4102_v51  ;;  %v4094_v53 = vadd.f32 %v6918_v23, %v4093_v10 }
 0x3b8   : > { %v5452_v8 = vpop.f32.mrf.mxu0 }
 0x3b9   : > { %v4274_v58 = vmax.f32 %v4238_v60, 0.0  ;;  %v4236_v56 = vadd.f32 %v5603_v3, %v4094_v53  ;;  %v4105_v24 = vadd.f32 %v5452_v8, %v6918_v23  ;;  %v5615_v53 = vld [vmem:[%s5719_s16 + $0x60] sm:$0xff] }
 0x3ba   : > { %v4096_v54 = vpop.f32.mrf.mxu0 }
 0x3bb   : > { %4310 = vst [vmem:[%s6928_s14 + $0x10] sm:$0xff] %v4274_v58  ;;  %v4272_v31 = vmax.f32 %v4236_v56, 0.0  ;;  %v4239_v50 = vadd.f32 %v5604_v5, %v4105_v24  ;;  %v4097_v36 = vadd.f32 %v6918_v23, %v4096_v54  ;;  %v5616_v24 = vld [vmem:[%s5719_s16 + $0x78] sm:$0xff] }
 0x3bc   : > { %v5455_v41 = vpop.f32.mrf.mxu0 }
 0x3bd   : > { %4308 = vst [vmem:[%s6928_s14] sm:$0xff] %v4272_v31  ;;  %v4275_v37 = vmax.f32 %v4239_v50, 0.0  ;;  %v4237_v11 = vadd.f32 %v5605_v7, %v4097_v36  ;;  %v4118_v19 = vadd.f32 %v5455_v41, %v6918_v23  ;;  %v5617_v36 = vld [vmem:[%s5719_s16 + $0x68] sm:$0xff] }
 0x3be   : > { %v4109_v55 = vpop.f32.mrf.mxu0 }
 0x3bf   : > { %4311 = vst [vmem:[%s6928_s14 + $0x18] sm:$0xff] %v4275_v37  ;;  %v4273_v38 = vmax.f32 %v4237_v11, 0.0  ;;  %v4242_v63 = vadd.f32 %v5606_v35, %v4118_v19  ;;  %v4110_v13 = vadd.f32 %v6918_v23, %v4109_v55  ;;  %v5618_v19 = vld [vmem:[%s5719_s16 + $0x90] sm:$0xff] }
 0x3c0   : > { %v5456_v25 = vpop.f32.mrf.mxu0 }
 0x3c1   : > { %4309 = vst [vmem:[%s6928_s14 + $0x8] sm:$0xff] %v4273_v38  ;;  %v4278_v33 = vmax.f32 %v4242_v63, 0.0  ;;  %v4240_v22 = vadd.f32 %v5607_v43, %v4110_v13  ;;  %v4121_v40 = vadd.f32 %v5456_v25, %v6918_v23  ;;  %v5619_v13 = vld [vmem:[%s5719_s16 + $0x80] sm:$0xff] }
 0x3c2   : > { %v4112_v20 = vpop.f32.mrf.mxu0 }
 0x3c3   : > { %4314 = vst [vmem:[%s6928_s14 + $0x30] sm:$0xff] %v4278_v33  ;;  %v4276_v4 = vmax.f32 %v4240_v22, 0.0  ;;  %v4243_v39 = vadd.f32 %v5608_v32, %v4121_v40  ;;  %v4113_v9 = vadd.f32 %v6918_v23, %v4112_v20  ;;  %v5620_v40 = vld [vmem:[%s5719_s16 + $0x98] sm:$0xff] }
 0x3c4   : > { %v5459_v29 = vpop.f32.mrf.mxu0 }
 0x3c5   : > { %4312 = vst [vmem:[%s6928_s14 + $0x20] sm:$0xff] %v4276_v4  ;;  %v4279_v18 = vmax.f32 %v4243_v39, 0.0  ;;  %v4241_v46 = vadd.f32 %v5609_v15, %v4113_v9  ;;  %v4134_v30 = vadd.f32 %v5459_v29, %v6918_v23  ;;  %v5621_v9 = vld [vmem:[%s5719_s16 + $0x88] sm:$0xff] }
 0x3c6   : > { %v4125_v1 = vpop.f32.mrf.mxu0 }
 0x3c7   : > { %4315 = vst [vmem:[%s6928_s14 + $0x38] sm:$0xff] %v4279_v18  ;;  %v4277_v12 = vmax.f32 %v4241_v46, 0.0  ;;  %v4246_v44 = vadd.f32 %v5610_v45, %v4134_v30  ;;  %v4126_v2 = vadd.f32 %v6918_v23, %v4125_v1  ;;  %v5622_v30 = vld [vmem:[%s5719_s16 + $0xb0] sm:$0xff] }
 0x3c8   : > { %v5460_v6 = vpop.f32.mrf.mxu0 }
 0x3c9   : > { %4313 = vst [vmem:[%s6928_s14 + $0x28] sm:$0xff] %v4277_v12  ;;  %v4282_v21 = vmax.f32 %v4246_v44, 0.0  ;;  %v4244_v61 = vadd.f32 %v5611_v62, %v4126_v2  ;;  %v4137_v14 = vadd.f32 %v5460_v6, %v6918_v23  ;;  %v5623_v2 = vld [vmem:[%s5719_s16 + $0xa0] sm:$0xff] }
 0x3ca   : > { %v4128_v27 = vpop.f32.mrf.mxu0 }
 0x3cb   : > { %4318 = vst [vmem:[%s6928_s14 + $0x50] sm:$0xff] %v4282_v21  ;;  %v4280_v42 = vmax.f32 %v4244_v61, 0.0  ;;  %v4247_v34 = vadd.f32 %v5612_v47, %v4137_v14  ;;  %v4129_v16 = vadd.f32 %v6918_v23, %v4128_v27  ;;  %v5624_v14 = vld [vmem:[%s5719_s16 + $0xb8] sm:$0xff] }
 0x3cc   : > { %v5463_v26 = vpop.f32.mrf.mxu0 }
 0x3cd   : > { %4316 = vst [vmem:[%s6928_s14 + $0x40] sm:$0xff] %v4280_v42  ;;  %v4283_v59 = vmax.f32 %v4247_v34, 0.0  ;;  %v4245_v57 = vadd.f32 %v5613_v0, %v4129_v16  ;;  %v4150_v52 = vadd.f32 %v5463_v26, %v6918_v23  ;;  %v5625_v16 = vld [vmem:[%s5719_s16 + $0xa8] sm:$0xff] }
 0x3ce   : > { %v4141_v48 = vpop.f32.mrf.mxu0 }
 0x3cf   : > { %4319 = vst [vmem:[%s6928_s14 + $0x58] sm:$0xff] %v4283_v59  ;;  %v4281_v28 = vmax.f32 %v4245_v57, 0.0  ;;  %v4250_v51 = vadd.f32 %v5614_v49, %v4150_v52  ;;  %v4142_v10 = vadd.f32 %v6918_v23, %v4141_v48  ;;  %v5626_v52 = vld [vmem:[%s5719_s16 + $0xd0] sm:$0xff] }
 0x3d0   : > { %v5464_v17 = vpop.f32.mrf.mxu0 }
 0x3d1   : > { %4317 = vst [vmem:[%s6928_s14 + $0x48] sm:$0xff] %v4281_v28  ;;  %v4286_v60 = vmax.f32 %v4250_v51, 0.0  ;;  %v4248_v8 = vadd.f32 %v5615_v53, %v4142_v10  ;;  %v4153_v58 = vadd.f32 %v5464_v17, %v6918_v23  ;;  %v5627_v10 = vld [vmem:[%s5719_s16 + $0xc0] sm:$0xff] }
 0x3d2   : > { %v4144_v3 = vpop.f32.mrf.mxu0 }
 0x3d3   : > { %4322 = vst [vmem:[%s6928_s14 + $0x70] sm:$0xff] %v4286_v60  ;;  %v4284_v56 = vmax.f32 %v4248_v8, 0.0  ;;  %v4251_v54 = vadd.f32 %v5616_v24, %v4153_v58  ;;  %v4145_v31 = vadd.f32 %v6918_v23, %v4144_v3  ;;  %v5628_v58 = vld [vmem:[%s5719_s16 + $0xd8] sm:$0xff] }
 0x3d4   : > { %v5467_v5 = vpop.f32.mrf.mxu0 }
 0x3d5   : > { %4320 = vst [vmem:[%s6928_s14 + $0x60] sm:$0xff] %v4284_v56  ;;  %v4287_v50 = vmax.f32 %v4251_v54, 0.0  ;;  %v4249_v41 = vadd.f32 %v5617_v36, %v4145_v31  ;;  %v4166_v37 = vadd.f32 %v5467_v5, %v6918_v23  ;;  %v5629_v31 = vld [vmem:[%s5719_s16 + $0xc8] sm:$0xff] }
 0x3d6   : > { %v4157_v7 = vpop.f32.mrf.mxu0 }
 0x3d7   : > { %4323 = vst [vmem:[%s6928_s14 + $0x78] sm:$0xff] %v4287_v50  ;;  %v4285_v11 = vmax.f32 %v4249_v41, 0.0  ;;  %v4254_v55 = vadd.f32 %v5618_v19, %v4166_v37  ;;  %v4158_v38 = vadd.f32 %v6918_v23, %v4157_v7  ;;  %v5630_v37 = vld [vmem:[%s5719_s16 + $0xf0] sm:$0xff] }
 0x3d8   : > { %v5468_v35 = vpop.f32.mrf.mxu0 }
 0x3d9   : > { %4321 = vst [vmem:[%s6928_s14 + $0x68] sm:$0xff] %v4285_v11  ;;  %v4290_v63 = vmax.f32 %v4254_v55, 0.0  ;;  %v4252_v25 = vadd.f32 %v5619_v13, %v4158_v38  ;;  %v4169_v33 = vadd.f32 %v5468_v35, %v6918_v23  ;;  %v5631_v38 = vld [vmem:[%s5719_s16 + $0xe0] sm:$0xff] }
 0x3da   : > { %v4160_v43 = vpop.f32.mrf.mxu0 }
 0x3db   : > { %4326 = vst [vmem:[%s6928_s14 + $0x90] sm:$0xff] %v4290_v63  ;;  %v4288_v22 = vmax.f32 %v4252_v25, 0.0  ;;  %v4255_v20 = vadd.f32 %v5620_v40, %v4169_v33  ;;  %v4161_v4 = vadd.f32 %v6918_v23, %v4160_v43  ;;  %v5632_v33 = vld [vmem:[%s5719_s16 + $0xf8] sm:$0xff] }
 0x3dc   : > { %v5471_v32 = vpop.f32.mrf.mxu0 }
 0x3dd   : > { %4324 = vst [vmem:[%s6928_s14 + $0x80] sm:$0xff] %v4288_v22  ;;  %v4291_v39 = vmax.f32 %v4255_v20, 0.0  ;;  %v4253_v29 = vadd.f32 %v5621_v9, %v4161_v4  ;;  %v4182_v18 = vadd.f32 %v5471_v32, %v6918_v23  ;;  %v5633_v4 = vld [vmem:[%s5719_s16 + $0xe8] sm:$0xff] }
 0x3de   : > { %v4173_v15 = vpop.f32.mrf.mxu0 }
 0x3df   : > { %4327 = vst [vmem:[%s6928_s14 + $0x98] sm:$0xff] %v4291_v39  ;;  %v4289_v46 = vmax.f32 %v4253_v29, 0.0  ;;  %v4258_v1 = vadd.f32 %v5622_v30, %v4182_v18  ;;  %v4174_v12 = vadd.f32 %v6918_v23, %v4173_v15  ;;  %v5634_v18 = vld [vmem:[%s5719_s16 + $0x110] sm:$0xff] }
 0x3e0   : > { %v5472_v45 = vpop.f32.mrf.mxu0 }
 0x3e1   : > { %4325 = vst [vmem:[%s6928_s14 + $0x88] sm:$0xff] %v4289_v46  ;;  %v4294_v44 = vmax.f32 %v4258_v1, 0.0  ;;  %v4256_v6 = vadd.f32 %v5623_v2, %v4174_v12  ;;  %v4185_v21 = vadd.f32 %v5472_v45, %v6918_v23  ;;  %v5635_v12 = vld [vmem:[%s5719_s16 + $0x100] sm:$0xff] }
 0x3e2   : > { %v4176_v62 = vpop.f32.mrf.mxu0 }
 0x3e3   : > { %4330 = vst [vmem:[%s6928_s14 + $0xb0] sm:$0xff] %v4294_v44  ;;  %v4292_v61 = vmax.f32 %v4256_v6, 0.0  ;;  %v4259_v27 = vadd.f32 %v5624_v14, %v4185_v21  ;;  %v4177_v42 = vadd.f32 %v6918_v23, %v4176_v62  ;;  %v5636_v21 = vld [vmem:[%s5719_s16 + $0x118] sm:$0xff] }
 0x3e4   : > { %v5475_v47 = vpop.f32.mrf.mxu0 }
 0x3e5   : > { %4328 = vst [vmem:[%s6928_s14 + $0xa0] sm:$0xff] %v4292_v61  ;;  %v4295_v34 = vmax.f32 %v4259_v27, 0.0  ;;  %v4257_v26 = vadd.f32 %v5625_v16, %v4177_v42  ;;  %v4198_v59 = vadd.f32 %v5475_v47, %v6918_v23  ;;  %v5637_v27 = vld [vmem:[%s5719_s16 + $0x108] sm:$0xff] }
 0x3e6   : > { %v4189_v0 = vpop.f32.mrf.mxu0 }
 0x3e7   : > { %4331 = vst [vmem:[%s6928_s14 + $0xb8] sm:$0xff] %v4295_v34  ;;  %v4293_v57 = vmax.f32 %v4257_v26, 0.0  ;;  %v4262_v48 = vadd.f32 %v5626_v52, %v4198_v59  ;;  %v4190_v28 = vadd.f32 %v6918_v23, %v4189_v0 }
 0x3e8   : > { %v5476_v49 = vpop.f32.mrf.mxu0 }
 0x3e9   : > { %4329 = vst [vmem:[%s6928_s14 + $0xa8] sm:$0xff] %v4293_v57  ;;  %v4298_v51 = vmax.f32 %v4262_v48, 0.0  ;;  %v4260_v17 = vadd.f32 %v5627_v10, %v4190_v28  ;;  %v4201_v60 = vadd.f32 %v5476_v49, %v6918_v23 }
 0x3ea   : > { %v4192_v53 = vpop.f32.mrf.mxu0 }
 0x3eb   : > { %4334 = vst [vmem:[%s6928_s14 + $0xd0] sm:$0xff] %v4298_v51  ;;  %v4296_v8 = vmax.f32 %v4260_v17, 0.0  ;;  %v4263_v3 = vadd.f32 %v5628_v58, %v4201_v60  ;;  %v4193_v56 = vadd.f32 %v6918_v23, %v4192_v53 }
 0x3ec   : > { %v5479_v24 = vpop.f32.mrf.mxu0 }
 0x3ed   : > { %4332 = vst [vmem:[%s6928_s14 + $0xc0] sm:$0xff] %v4296_v8  ;;  %v4299_v54 = vmax.f32 %v4263_v3, 0.0  ;;  %v4261_v5 = vadd.f32 %v5629_v31, %v4193_v56  ;;  %v4214_v50 = vadd.f32 %v5479_v24, %v6918_v23 }
 0x3ee   : > { %v4205_v36 = vpop.f32.mrf.mxu0 }
 0x3ef   : > { %4335 = vst [vmem:[%s6928_s14 + $0xd8] sm:$0xff] %v4299_v54  ;;  %v4297_v41 = vmax.f32 %v4261_v5, 0.0  ;;  %v4266_v7 = vadd.f32 %v5630_v37, %v4214_v50  ;;  %v4206_v11 = vadd.f32 %v6918_v23, %v4205_v36 }
 0x3f0   : > { %v5480_v19 = vpop.f32.mrf.mxu0 }
 0x3f1   : > { %4333 = vst [vmem:[%s6928_s14 + $0xc8] sm:$0xff] %v4297_v41  ;;  %v4302_v55 = vmax.f32 %v4266_v7, 0.0  ;;  %v4264_v35 = vadd.f32 %v5631_v38, %v4206_v11  ;;  %v4217_v63 = vadd.f32 %v5480_v19, %v6918_v23 }
 0x3f2   : > { %v4208_v13 = vpop.f32.mrf.mxu0 }
 0x3f3   : > { %4338 = vst [vmem:[%s6928_s14 + $0xf0] sm:$0xff] %v4302_v55  ;;  %v4300_v25 = vmax.f32 %v4264_v35, 0.0  ;;  %v4267_v43 = vadd.f32 %v5632_v33, %v4217_v63  ;;  %v4209_v22 = vadd.f32 %v6918_v23, %v4208_v13 }
 0x3f4   : > { %v5483_v40 = vpop.f32.mrf.mxu0 }
 0x3f5   : > { %4336 = vst [vmem:[%s6928_s14 + $0xe0] sm:$0xff] %v4300_v25  ;;  %v4303_v20 = vmax.f32 %v4267_v43, 0.0  ;;  %v4265_v32 = vadd.f32 %v5633_v4, %v4209_v22  ;;  %v4230_v39 = vadd.f32 %v5483_v40, %v6918_v23 }
 0x3f6   : > { %v4221_v9 = vpop.f32.mrf.mxu0 }
 0x3f7   : > { %4339 = vst [vmem:[%s6928_s14 + $0xf8] sm:$0xff] %v4303_v20  ;;  %v4301_v29 = vmax.f32 %v4265_v32, 0.0  ;;  %v4270_v15 = vadd.f32 %v5634_v18, %v4230_v39  ;;  %v4222_v46 = vadd.f32 %v6918_v23, %v4221_v9 }
 0x3f8   : > { %v5484_v30 = vpop.f32.mrf.mxu0 }
 0x3f9   : > { %4337 = vst [vmem:[%s6928_s14 + $0xe8] sm:$0xff] %v4301_v29  ;;  %v4306_v1 = vmax.f32 %v4270_v15, 0.0  ;;  %v4268_v45 = vadd.f32 %v5635_v12, %v4222_v46  ;;  %v4233_v44 = vadd.f32 %v5484_v30, %v6918_v23 }
 0x3fa   : > { %v4224_v2 = vpop.f32.mrf.mxu0 }
 0x3fb   : > { %4342 = vst [vmem:[%s6928_s14 + $0x110] sm:$0xff] %v4306_v1  ;;  %v4304_v6 = vmax.f32 %v4268_v45, 0.0  ;;  %v4271_v62 = vadd.f32 %v5636_v21, %v4233_v44  ;;  %v4225_v61 = vadd.f32 %v6918_v23, %v4224_v2 }
 0x3fd   : > { %4340 = vst [vmem:[%s6928_s14 + $0x100] sm:$0xff] %v4304_v6  ;;  %v4307_v14 = vmax.f32 %v4271_v62, 0.0  ;;  %v4269_v42 = vadd.f32 %v5637_v27, %v4225_v61 }
 0x3ff   : > { %4343 = vst [vmem:[%s6928_s14 + $0x118] sm:$0xff] %v4307_v14  ;;  %v4305_v47 = vmax.f32 %v4269_v42, 0.0 }
 0x401   : > { %4341 = vst [vmem:[%s6928_s14 + $0x108] sm:$0xff] %v4305_v47 }
 0x402 PF: > { %s18_s27 = sadd.s32 1, %s5644_s27  }
 0x403   : > { %p15_p4 = scmp.ge.s32.totalorder %s18_s27, 4  }
 0x405   :  { %17 = sbr.rel (!%p15_p4) target bundleno = 1 (0x1), region = 90 }

</bundles_post_ra>
